<compile_context>
chip_gen: v5e
topology: v5e:2x2
jax: 0.10.0
libtpu: 0.0.40
codegen_flags: <defaults>
</compile_context>

<pallas_src>
import jax
import jax.numpy as jnp
from jax.experimental import pallas as pl
from jax.experimental.pallas import tpu as pltpu

BN_EPS = 1e-5
WEIGHT_DTYPE = jnp.bfloat16   # jnp.float32 for full-f32 parity with torch


# -----------------------------------------------------------------------------
# Fused ConvHead kernel
# -----------------------------------------------------------------------------
def _convhead_kernel(x_ref,
                     w1_ref, g1_ref, be1_ref,
                     w2_hbm, g2_ref, be2_ref,
                     w3_hbm, g3_ref, be3_ref,
                     wo_ref, bo_ref,
                     o_ref,
                     w2_vmem, w3_vmem, dma_sem):
    B, T, _ = x_ref.shape
    S = o_ref.shape[1]

    # Kick off the big-weight DMAs immediately; they overlap layer-1 compute.
    cp2 = pltpu.make_async_copy(w2_hbm, w2_vmem, dma_sem.at[0])
    cp3 = pltpu.make_async_copy(w3_hbm, w3_vmem, dma_sem.at[1])
    cp2.start()
    cp3.start()

    def replicate_taps(x_btc, k):
        # (B, T, C) -> (B, T, k*C); tap kk holds x[:, clamp(t + kk - pad, 0, T-1), :].
        # Shifts via pltpu.roll along T + where over an iota (replicate padding).
        C = x_btc.shape[-1]
        pad = (k - 1) // 2
        t_idx = jax.lax.broadcasted_iota(jnp.int32, (B, T, C), 1)
        lo = jnp.broadcast_to(x_btc[:, 0:1, :], (B, T, C))       # left-edge row
        hi = jnp.broadcast_to(x_btc[:, T - 1:T, :], (B, T, C))   # right-edge row
        taps = []
        for kk in range(k):
            d = kk - pad
            if d == 0:
                taps.append(x_btc)
                continue
            rolled = pltpu.roll(x_btc, (-d) % T, 1)              # per-batch sublane roll
            if d < 0:
                taps.append(jnp.where(t_idx < -d, lo, rolled))
            else:
                taps.append(jnp.where(t_idx >= T - d, hi, rolled))
        return jnp.concatenate(taps, axis=-1)

    def conv_bn_relu(h_btc, w, gamma, beta, k):
        # One fused MXU matmul per layer: (B*T, k*Cin) @ (k*Cin, Cout), f32 accum.
        cout = w.shape[-1]
        xt = replicate_taps(h_btc, k).reshape(B * T, -1).astype(w.dtype)
        y = jnp.dot(xt, w, preferred_element_type=jnp.float32)
        # Training-mode BatchNorm1d (batch stats over B*T rows), single pass, folded
        # into one per-channel scale/shift.  The conv bias is omitted: it cancels
        # exactly against the mean subtraction.  (Eval-mode BN would fold running
        # stats into the same scale/shift.)
        inv_n = 1.0 / (B * T)
        mean = jnp.sum(y, axis=0, keepdims=True) * inv_n
        var = jnp.sum(y * y, axis=0, keepdims=True) * inv_n - mean * mean
        scale = gamma * jax.lax.rsqrt(var + BN_EPS)
        shift = beta - mean * scale
        return jnp.maximum(y * scale + shift, 0.0).reshape(B, T, cout)

    h = conv_bn_relu(x_ref[...], w1_ref[...], g1_ref[...], be1_ref[...], 3)
    cp2.wait()
    h = conv_bn_relu(h, w2_vmem[...], g2_ref[...], be2_ref[...], 5)
    cp3.wait()
    h = conv_bn_relu(h, w3_vmem[...], g3_ref[...], be3_ref[...], 5)

    # conv_out (kernel_size=1) + softmax over T (torch softmax(dim=-1) on (B,S,T)).
    wo = wo_ref[...]
    logits = (jnp.dot(h.reshape(B * T, -1).astype(wo.dtype), wo,
                      preferred_element_type=jnp.float32)
              + bo_ref[...]).reshape(B, T, S)
    m = jnp.max(logits, axis=1, keepdims=True)
    e = jnp.exp(logits - m)
    denom = jnp.sum(e, axis=1, keepdims=True)
    prob = e * pl.reciprocal(denom, approx=True)                 # (B, T, S)

    # Write the output already transposed to (B, S, T): per-batch MXU transpose
    # (identity @ prob_b^T, the well-supported A.B^T dot_general pattern) instead of a
    # small-shape XLU transpose, and no wrapper-side XLA transpose op.
    row = jax.lax.broadcasted_iota(jnp.int32, (S, S), 0)
    col = jax.lax.broadcasted_iota(jnp.int32, (S, S), 1)
    eye = (row == col).astype(jnp.float32)
    for b in range(B):
        o_ref[b] = jax.lax.dot_general(eye, prob[b], (((1,), (1,)), ((), ())),
                                       preferred_element_type=jnp.float32)


# -----------------------------------------------------------------------------
# Wrapper / weight prep
# -----------------------------------------------------------------------------
def _prep_conv_weight(w):
    # torch Conv1d weight (Cout, Cin, K) -> (K*Cin, Cout); tap-major rows match the
    # kernel's lane-axis concatenation of shifted inputs.
    cout, cin, k = w.shape
    return jnp.transpose(w, (2, 1, 0)).reshape(k * cin, cout).astype(WEIGHT_DTYPE)


def _prep_row(v):
    return v.reshape(1, -1).astype(jnp.float32)


def _full_spec(*shape):
    zeros = (0,) * len(shape)
    return pl.BlockSpec(shape, lambda i, _z=zeros: _z)


@jax.jit
def convhead_forward(feat, params):
    # feat: (B, T, 72) -- same tensor the torch module receives; its internal
    # (B, T, C) -> (B, C, T) transpose is absorbed by keeping the kernel channels-last.
    feat = feat.astype(jnp.float32)
    B, T, cin = feat.shape

    w1 = _prep_conv_weight(params["conv1_w"])
    g1, be1 = _prep_row(params["bn1_g"]), _prep_row(params["bn1_b"])
    w2 = _prep_conv_weight(params["conv2_w"])
    g2, be2 = _prep_row(params["bn2_g"]), _prep_row(params["bn2_b"])
    w3 = _prep_conv_weight(params["conv3_w"])
    g3, be3 = _prep_row(params["bn3_g"]), _prep_row(params["bn3_b"])
    wo = _prep_conv_weight(params["convo_w"])
    bo = _prep_row(params["convo_b"])
    S = wo.shape[-1]
    # conv1/2/3 biases are intentionally not passed: they cancel under training-mode BN.

    in_specs = [
        _full_spec(B, T, cin),
        _full_spec(*w1.shape), _full_spec(*g1.shape), _full_spec(*be1.shape),
        pl.BlockSpec(memory_space=pl.ANY),                  # w2 stays in HBM (manual DMA)
        _full_spec(*g2.shape), _full_spec(*be2.shape),
        pl.BlockSpec(memory_space=pl.ANY),                  # w3 stays in HBM (manual DMA)
        _full_spec(*g3.shape), _full_spec(*be3.shape),
        _full_spec(*wo.shape), _full_spec(*bo.shape),
    ]
    scratch_shapes = [
        pltpu.VMEM(w2.shape, w2.dtype),                     # w2 landing buffer
        pltpu.VMEM(w3.shape, w3.dtype),                     # w3 landing buffer
        pltpu.SemaphoreType.DMA((2,)),
    ]

    return pl.pallas_call(
        _convhead_kernel,
        out_shape=jax.ShapeDtypeStruct((B, S, T), jnp.float32),
        grid=(1,),
        in_specs=in_specs,
        out_specs=_full_spec(B, S, T),
        scratch_shapes=scratch_shapes,
        compiler_params=pltpu.CompilerParams(
            dimension_semantics=("arbitrary",)),
    )(feat, w1, g1, be1, w2, g2, be2, w3, g3, be3, wo, bo)


# -----------------------------------------------------------------------------
# Plain-JAX reference mirroring the torch forward (for self-validation)
# -----------------------------------------------------------------------------
def convhead_reference(feat, params):
    # Keeps the conv biases (they cancel under BN), uses two-pass BN stats, exact
    # softmax divide and clipped-index replicate padding -> independent code path.
    feat = feat.astype(jnp.float32)
    B, T, _ = feat.shape

    def conv_bn_relu(h_btc, w_torch, bias, gamma, beta):
        cout, cin, k = w_torch.shape
        pad = (k - 1) // 2
        w = _prep_conv_weight(w_torch)                          # (k*cin, cout)
        idx = jnp.clip(jnp.arange(T)[:, None] + jnp.arange(-pad, pad + 1)[None, :],
                       0, T - 1)                                # (T, k) replicate pad
        xt = h_btc[:, idx, :].reshape(B * T, k * cin)           # tap-major, matches w
        y = jnp.dot(xt.astype(w.dtype), w, preferred_element_type=jnp.float32)
        y = y + bias.reshape(1, -1)       # kept for torch fidelity (cancels under BN)
        mean = jnp.mean(y, axis=0, keepdims=True)
        var = jnp.mean(jnp.square(y - mean), axis=0, keepdims=True)
        y = (y - mean) * jax.lax.rsqrt(var + BN_EPS)
        y = y * gamma.reshape(1, -1) + beta.reshape(1, -1)
        return jnp.maximum(y, 0.0).reshape(B, T, cout)

    h = conv_bn_relu(feat, params["conv1_w"], params["conv1_b"],
                     params["bn1_g"], params["bn1_b"])
    h = conv_bn_relu(h, params["conv2_w"], params["conv2_b"],
                     params["bn2_g"], params["bn2_b"])
    h = conv_bn_relu(h, params["conv3_w"], params["conv3_b"],
                     params["bn3_g"], params["bn3_b"])

    wo = _prep_conv_weight(params["convo_w"])
    S = wo.shape[-1]
    logits = (jnp.dot(h.reshape(B * T, -1).astype(wo.dtype), wo,
                      preferred_element_type=jnp.float32)
              + params["convo_b"].reshape(1, -1)).reshape(B, T, S)
    prob = jax.nn.softmax(logits, axis=1)                       # softmax over T
    return jnp.transpose(prob, (0, 2, 1))                       # (B, S, T)


# -----------------------------------------------------------------------------
# Deterministic parameter init (shapes dictated by the module)
# -----------------------------------------------------------------------------
def init_params(key, seqlen, hidden=256, cin=24 * 3):
    keys = iter(jax.random.split(key, 32))

    def nrm(shape, scale=0.05):
        return jax.random.normal(next(keys), shape, jnp.float32) * scale

    p = {}
    p["conv1_w"] = nrm((hidden, cin, 3));    p["conv1_b"] = nrm((hidden,))
    p["bn1_g"] = 1.0 + nrm((hidden,));       p["bn1_b"] = nrm((hidden,))
    p["conv2_w"] = nrm((hidden, hidden, 5)); p["conv2_b"] = nrm((hidden,))
    p["bn2_g"] = 1.0 + nrm((hidden,));       p["bn2_b"] = nrm((hidden,))
    p["conv3_w"] = nrm((hidden, hidden, 5)); p["conv3_b"] = nrm((hidden,))
    p["bn3_g"] = 1.0 + nrm((hidden,));       p["bn3_b"] = nrm((hidden,))
    p["convo_w"] = nrm((seqlen, hidden, 1)); p["convo_b"] = nrm((seqlen,))
    return p


if __name__ == "__main__":
    B, T, SEQLEN = 2, 16, 16
    CIN = 24 * 3                   # fixed by the module (Conv1d(24*3, 256, ...))

    key = jax.random.PRNGKey(0)
    pkey, xkey = jax.random.split(key)
    params = init_params(pkey, SEQLEN)
    feat = jax.random.normal(xkey, (B, T, CIN), jnp.float32)

    prob_map = jax.block_until_ready(convhead_forward(feat, params))

    assert prob_map.shape == (B, SEQLEN, T)
    assert bool(jnp.all(jnp.isfinite(prob_map)))
    assert bool(jnp.all(prob_map >= -1e-6))
    row_sums = jnp.sum(prob_map, axis=-1)              # softmax over T sums to 1
    assert bool(jnp.all(jnp.abs(row_sums - 1.0) < 5e-3))

    ref = convhead_reference(feat, params)
    assert bool(jnp.max(jnp.abs(prob_map - ref)) < 5e-3)

    print("KERNEL_OK")
</pallas_src>

<mosaic_0001>
module attributes {stable_mosaic.version = 11 : i64} {
  func.func @_convhead_kernel(%arg0: i32, %arg1: memref<2x16x72xf32, #tpu.memory_space<vmem>>, %arg2: memref<216x256xbf16, #tpu.memory_space<vmem>>, %arg3: memref<1x256xf32, #tpu.memory_space<vmem>>, %arg4: memref<1x256xf32, #tpu.memory_space<vmem>>, %arg5: memref<1280x256xbf16, #tpu.memory_space<any>>, %arg6: memref<1x256xf32, #tpu.memory_space<vmem>>, %arg7: memref<1x256xf32, #tpu.memory_space<vmem>>, %arg8: memref<1280x256xbf16, #tpu.memory_space<any>>, %arg9: memref<1x256xf32, #tpu.memory_space<vmem>>, %arg10: memref<1x256xf32, #tpu.memory_space<vmem>>, %arg11: memref<256x16xbf16, #tpu.memory_space<vmem>>, %arg12: memref<1x16xf32, #tpu.memory_space<vmem>>, %arg13: memref<2x16x16xf32, #tpu.memory_space<vmem>>, %arg14: memref<1280x256xbf16, #tpu.memory_space<vmem>>, %arg15: memref<1280x256xbf16, #tpu.memory_space<vmem>>, %arg16: memref<2x!tpu.dma_semaphore, #tpu.memory_space<semaphore_mem>>) attributes {dimension_semantics = [#tpu.dimension_semantics<arbitrary>], iteration_bounds = array<i64: 1>, scalar_prefetch = 0 : i64, scratch_operands = 3 : i64, tpu.core_type = #tpu.core_type<tc>, window_params = [{pipeline_mode = #tpu.pipeline_mode<synchronous>, transform_indices = @transform_0, window_bounds = array<i64: 2, 16, 72>}, {pipeline_mode = #tpu.pipeline_mode<synchronous>, transform_indices = @transform_1, window_bounds = array<i64: 216, 256>}, {pipeline_mode = #tpu.pipeline_mode<synchronous>, transform_indices = @transform_2, window_bounds = array<i64: 1, 256>}, {pipeline_mode = #tpu.pipeline_mode<synchronous>, transform_indices = @transform_3, window_bounds = array<i64: 1, 256>}, {}, {pipeline_mode = #tpu.pipeline_mode<synchronous>, transform_indices = @transform_5, window_bounds = array<i64: 1, 256>}, {pipeline_mode = #tpu.pipeline_mode<synchronous>, transform_indices = @transform_6, window_bounds = array<i64: 1, 256>}, {}, {pipeline_mode = #tpu.pipeline_mode<synchronous>, transform_indices = @transform_8, window_bounds = array<i64: 1, 256>}, {pipeline_mode = #tpu.pipeline_mode<synchronous>, transform_indices = @transform_9, window_bounds = array<i64: 1, 256>}, {pipeline_mode = #tpu.pipeline_mode<synchronous>, transform_indices = @transform_10, window_bounds = array<i64: 256, 16>}, {pipeline_mode = #tpu.pipeline_mode<synchronous>, transform_indices = @transform_11, window_bounds = array<i64: 1, 16>}, {pipeline_mode = #tpu.pipeline_mode<synchronous>, transform_indices = @transform_12, window_bounds = array<i64: 2, 16, 16>}]} {
    %c0_i32 = arith.constant 0 : i32
    %0 = tpu.memref_slice %arg16[%c0_i32] : memref<2x!tpu.dma_semaphore, #tpu.memory_space<semaphore_mem>> -> memref<1x!tpu.dma_semaphore, #tpu.memory_space<semaphore_mem>>
    %1 = tpu.memref_squeeze %0 : memref<1x!tpu.dma_semaphore, #tpu.memory_space<semaphore_mem>> -> memref<!tpu.dma_semaphore, #tpu.memory_space<semaphore_mem>>
    tpu.enqueue_dma source(%arg5 : memref<1280x256xbf16, #tpu.memory_space<any>>) target(%arg14 : memref<1280x256xbf16, #tpu.memory_space<vmem>>) target_semaphore(%1 : memref<!tpu.dma_semaphore, #tpu.memory_space<semaphore_mem>>)
    %c1_i32 = arith.constant 1 : i32
    %2 = tpu.memref_slice %arg16[%c1_i32] : memref<2x!tpu.dma_semaphore, #tpu.memory_space<semaphore_mem>> -> memref<1x!tpu.dma_semaphore, #tpu.memory_space<semaphore_mem>>
    %3 = tpu.memref_squeeze %2 : memref<1x!tpu.dma_semaphore, #tpu.memory_space<semaphore_mem>> -> memref<!tpu.dma_semaphore, #tpu.memory_space<semaphore_mem>>
    tpu.enqueue_dma source(%arg8 : memref<1280x256xbf16, #tpu.memory_space<any>>) target(%arg15 : memref<1280x256xbf16, #tpu.memory_space<vmem>>) target_semaphore(%3 : memref<!tpu.dma_semaphore, #tpu.memory_space<semaphore_mem>>)
    %c0 = arith.constant 0 : index
    %c0_0 = arith.constant 0 : index
    %c0_1 = arith.constant 0 : index
    %4 = vector.load %arg1[%c0, %c0_0, %c0_1] : memref<2x16x72xf32, #tpu.memory_space<vmem>>, vector<2x16x72xf32>
    %c0_2 = arith.constant 0 : index
    %c0_3 = arith.constant 0 : index
    %5 = vector.load %arg2[%c0_2, %c0_3] : memref<216x256xbf16, #tpu.memory_space<vmem>>, vector<216x256xbf16>
    %c0_4 = arith.constant 0 : index
    %c0_5 = arith.constant 0 : index
    %6 = vector.load %arg3[%c0_4, %c0_5] : memref<1x256xf32, #tpu.memory_space<vmem>>, vector<1x256xf32>
    %c0_6 = arith.constant 0 : index
    %c0_7 = arith.constant 0 : index
    %7 = vector.load %arg4[%c0_6, %c0_7] : memref<1x256xf32, #tpu.memory_space<vmem>>, vector<1x256xf32>
    %8 = tpu.iota {dimensions = array<i32: 1>} : vector<2x16x72xi32>
    %9 = vector.extract_strided_slice %4 {offsets = [0, 0, 0], sizes = [2, 1, 72], strides = [1, 1, 1]} : vector<2x16x72xf32> to vector<2x1x72xf32>
    %10 = vector.shape_cast %9 : vector<2x1x72xf32> to vector<2x1x72xf32>
    %11 = vector.broadcast %10 : vector<2x1x72xf32> to vector<2x16x72xf32>
    %12 = vector.extract_strided_slice %4 {offsets = [0, 15, 0], sizes = [2, 1, 72], strides = [1, 1, 1]} : vector<2x16x72xf32> to vector<2x1x72xf32>
    %13 = vector.shape_cast %12 : vector<2x1x72xf32> to vector<2x1x72xf32>
    %14 = vector.broadcast %13 : vector<2x1x72xf32> to vector<2x16x72xf32>
    %c1_i32_8 = arith.constant 1 : i32
    %15 = tpu.dynamic_rotate %4 by %c1_i32_8 dim 1 : vector<2x16x72xf32>, i32 -> vector<2x16x72xf32>
    %c1_i32_9 = arith.constant 1 : i32
    %16 = vector.broadcast %c1_i32_9 : i32 to vector<2x16x72xi32>
    %17 = arith.cmpi slt, %8, %16 : vector<2x16x72xi32>
    %18 = arith.select %17, %11, %15 : vector<2x16x72xi1>, vector<2x16x72xf32>
    %c15_i32 = arith.constant 15 : i32
    %19 = tpu.dynamic_rotate %4 by %c15_i32 dim 1 : vector<2x16x72xf32>, i32 -> vector<2x16x72xf32>
    %c15_i32_10 = arith.constant 15 : i32
    %20 = vector.broadcast %c15_i32_10 : i32 to vector<2x16x72xi32>
    %21 = arith.cmpi sge, %8, %20 : vector<2x16x72xi32>
    %22 = arith.select %21, %14, %19 : vector<2x16x72xi1>, vector<2x16x72xf32>
    %23 = tpu.concatenate %18, %4, %22 in 2 : vector<2x16x72xf32>, vector<2x16x72xf32>, vector<2x16x72xf32> -> vector<2x16x216xf32>
    %24 = vector.shape_cast %23 : vector<2x16x216xf32> to vector<32x216xf32>
    %25 = arith.truncf %24 : vector<32x216xf32> to vector<32x216xbf16>
    %cst = arith.constant dense<0.000000e+00> : vector<32x256xf32>
    %26 = tpu.matmul %25, %5, %cst {dimension_numbers = #tpu.dot_dimension_numbers<[1], [0], [0], [1], [0, 0, 1, 1], [], []>} : vector<32x216xbf16>, vector<216x256xbf16>, vector<32x256xf32> -> vector<32x256xf32>
    %cst_11 = arith.constant dense<0.000000e+00> : vector<256xf32>
    %27 = vector.multi_reduction <add>, %26, %cst_11 [0] : vector<32x256xf32> to vector<256xf32>
    %28 = vector.shape_cast %27 : vector<256xf32> to vector<1x256xf32>
    %cst_12 = arith.constant 3.125000e-02 : f32
    %29 = vector.broadcast %cst_12 : f32 to vector<1x256xf32>
    %30 = arith.mulf %28, %29 : vector<1x256xf32>
    %31 = arith.mulf %26, %26 : vector<32x256xf32>
    %cst_13 = arith.constant dense<0.000000e+00> : vector<256xf32>
    %32 = vector.multi_reduction <add>, %31, %cst_13 [0] : vector<32x256xf32> to vector<256xf32>
    %33 = vector.shape_cast %32 : vector<256xf32> to vector<1x256xf32>
    %cst_14 = arith.constant 3.125000e-02 : f32
    %34 = vector.broadcast %cst_14 : f32 to vector<1x256xf32>
    %35 = arith.mulf %33, %34 : vector<1x256xf32>
    %36 = arith.mulf %30, %30 : vector<1x256xf32>
    %37 = arith.subf %35, %36 : vector<1x256xf32>
    %cst_15 = arith.constant 9.99999974E-6 : f32
    %38 = vector.broadcast %cst_15 : f32 to vector<1x256xf32>
    %39 = arith.addf %37, %38 : vector<1x256xf32>
    %40 = math.rsqrt %39 : vector<1x256xf32>
    %41 = arith.mulf %6, %40 : vector<1x256xf32>
    %42 = arith.mulf %30, %41 : vector<1x256xf32>
    %43 = arith.subf %7, %42 : vector<1x256xf32>
    %44 = vector.broadcast %41 : vector<1x256xf32> to vector<32x256xf32>
    %45 = arith.mulf %26, %44 : vector<32x256xf32>
    %46 = vector.broadcast %43 : vector<1x256xf32> to vector<32x256xf32>
    %47 = arith.addf %45, %46 : vector<32x256xf32>
    %cst_16 = arith.constant 0.000000e+00 : f32
    %48 = vector.broadcast %cst_16 : f32 to vector<32x256xf32>
    %49 = arith.maximumf %47, %48 : vector<32x256xf32>
    %50 = vector.shape_cast %49 : vector<32x256xf32> to vector<2x16x256xf32>
    %c0_i32_17 = arith.constant 0 : i32
    %51 = tpu.memref_slice %arg16[%c0_i32_17] : memref<2x!tpu.dma_semaphore, #tpu.memory_space<semaphore_mem>> -> memref<1x!tpu.dma_semaphore, #tpu.memory_space<semaphore_mem>>
    %52 = tpu.memref_squeeze %51 : memref<1x!tpu.dma_semaphore, #tpu.memory_space<semaphore_mem>> -> memref<!tpu.dma_semaphore, #tpu.memory_space<semaphore_mem>>
    tpu.wait_dma2 semaphore(%52 : memref<!tpu.dma_semaphore, #tpu.memory_space<semaphore_mem>>) src(%arg5 : memref<1280x256xbf16, #tpu.memory_space<any>>) dst(%arg14 : memref<1280x256xbf16, #tpu.memory_space<vmem>>)
    %c0_18 = arith.constant 0 : index
    %c0_19 = arith.constant 0 : index
    %53 = vector.load %arg14[%c0_18, %c0_19] : memref<1280x256xbf16, #tpu.memory_space<vmem>>, vector<1280x256xbf16>
    %c0_20 = arith.constant 0 : index
    %c0_21 = arith.constant 0 : index
    %54 = vector.load %arg6[%c0_20, %c0_21] : memref<1x256xf32, #tpu.memory_space<vmem>>, vector<1x256xf32>
    %c0_22 = arith.constant 0 : index
    %c0_23 = arith.constant 0 : index
    %55 = vector.load %arg7[%c0_22, %c0_23] : memref<1x256xf32, #tpu.memory_space<vmem>>, vector<1x256xf32>
    %56 = tpu.iota {dimensions = array<i32: 1>} : vector<2x16x256xi32>
    %57 = vector.extract_strided_slice %50 {offsets = [0, 0, 0], sizes = [2, 1, 256], strides = [1, 1, 1]} : vector<2x16x256xf32> to vector<2x1x256xf32>
    %58 = vector.shape_cast %57 : vector<2x1x256xf32> to vector<2x1x256xf32>
    %59 = vector.broadcast %58 : vector<2x1x256xf32> to vector<2x16x256xf32>
    %60 = vector.extract_strided_slice %50 {offsets = [0, 15, 0], sizes = [2, 1, 256], strides = [1, 1, 1]} : vector<2x16x256xf32> to vector<2x1x256xf32>
    %61 = vector.shape_cast %60 : vector<2x1x256xf32> to vector<2x1x256xf32>
    %62 = vector.broadcast %61 : vector<2x1x256xf32> to vector<2x16x256xf32>
    %c2_i32 = arith.constant 2 : i32
    %63 = tpu.dynamic_rotate %50 by %c2_i32 dim 1 : vector<2x16x256xf32>, i32 -> vector<2x16x256xf32>
    %c2_i32_24 = arith.constant 2 : i32
    %64 = vector.broadcast %c2_i32_24 : i32 to vector<2x16x256xi32>
    %65 = arith.cmpi slt, %56, %64 : vector<2x16x256xi32>
    %66 = arith.select %65, %59, %63 : vector<2x16x256xi1>, vector<2x16x256xf32>
    %c1_i32_25 = arith.constant 1 : i32
    %67 = tpu.dynamic_rotate %50 by %c1_i32_25 dim 1 : vector<2x16x256xf32>, i32 -> vector<2x16x256xf32>
    %c1_i32_26 = arith.constant 1 : i32
    %68 = vector.broadcast %c1_i32_26 : i32 to vector<2x16x256xi32>
    %69 = arith.cmpi slt, %56, %68 : vector<2x16x256xi32>
    %70 = arith.select %69, %59, %67 : vector<2x16x256xi1>, vector<2x16x256xf32>
    %c15_i32_27 = arith.constant 15 : i32
    %71 = tpu.dynamic_rotate %50 by %c15_i32_27 dim 1 : vector<2x16x256xf32>, i32 -> vector<2x16x256xf32>
    %c15_i32_28 = arith.constant 15 : i32
    %72 = vector.broadcast %c15_i32_28 : i32 to vector<2x16x256xi32>
    %73 = arith.cmpi sge, %56, %72 : vector<2x16x256xi32>
    %74 = arith.select %73, %62, %71 : vector<2x16x256xi1>, vector<2x16x256xf32>
    %c14_i32 = arith.constant 14 : i32
    %75 = tpu.dynamic_rotate %50 by %c14_i32 dim 1 : vector<2x16x256xf32>, i32 -> vector<2x16x256xf32>
    %c14_i32_29 = arith.constant 14 : i32
    %76 = vector.broadcast %c14_i32_29 : i32 to vector<2x16x256xi32>
    %77 = arith.cmpi sge, %56, %76 : vector<2x16x256xi32>
    %78 = arith.select %77, %62, %75 : vector<2x16x256xi1>, vector<2x16x256xf32>
    %79 = tpu.concatenate %66, %70, %50, %74, %78 in 2 : vector<2x16x256xf32>, vector<2x16x256xf32>, vector<2x16x256xf32>, vector<2x16x256xf32>, vector<2x16x256xf32> -> vector<2x16x1280xf32>
    %80 = vector.shape_cast %79 : vector<2x16x1280xf32> to vector<32x1280xf32>
    %81 = arith.truncf %80 : vector<32x1280xf32> to vector<32x1280xbf16>
    %cst_30 = arith.constant dense<0.000000e+00> : vector<32x256xf32>
    %82 = tpu.matmul %81, %53, %cst_30 {dimension_numbers = #tpu.dot_dimension_numbers<[1], [0], [0], [1], [0, 0, 1, 1], [], []>} : vector<32x1280xbf16>, vector<1280x256xbf16>, vector<32x256xf32> -> vector<32x256xf32>
    %cst_31 = arith.constant dense<0.000000e+00> : vector<256xf32>
    %83 = vector.multi_reduction <add>, %82, %cst_31 [0] : vector<32x256xf32> to vector<256xf32>
    %84 = vector.shape_cast %83 : vector<256xf32> to vector<1x256xf32>
    %cst_32 = arith.constant 3.125000e-02 : f32
    %85 = vector.broadcast %cst_32 : f32 to vector<1x256xf32>
    %86 = arith.mulf %84, %85 : vector<1x256xf32>
    %87 = arith.mulf %82, %82 : vector<32x256xf32>
    %cst_33 = arith.constant dense<0.000000e+00> : vector<256xf32>
    %88 = vector.multi_reduction <add>, %87, %cst_33 [0] : vector<32x256xf32> to vector<256xf32>
    %89 = vector.shape_cast %88 : vector<256xf32> to vector<1x256xf32>
    %cst_34 = arith.constant 3.125000e-02 : f32
    %90 = vector.broadcast %cst_34 : f32 to vector<1x256xf32>
    %91 = arith.mulf %89, %90 : vector<1x256xf32>
    %92 = arith.mulf %86, %86 : vector<1x256xf32>
    %93 = arith.subf %91, %92 : vector<1x256xf32>
    %cst_35 = arith.constant 9.99999974E-6 : f32
    %94 = vector.broadcast %cst_35 : f32 to vector<1x256xf32>
    %95 = arith.addf %93, %94 : vector<1x256xf32>
    %96 = math.rsqrt %95 : vector<1x256xf32>
    %97 = arith.mulf %54, %96 : vector<1x256xf32>
    %98 = arith.mulf %86, %97 : vector<1x256xf32>
    %99 = arith.subf %55, %98 : vector<1x256xf32>
    %100 = vector.broadcast %97 : vector<1x256xf32> to vector<32x256xf32>
    %101 = arith.mulf %82, %100 : vector<32x256xf32>
    %102 = vector.broadcast %99 : vector<1x256xf32> to vector<32x256xf32>
    %103 = arith.addf %101, %102 : vector<32x256xf32>
    %cst_36 = arith.constant 0.000000e+00 : f32
    %104 = vector.broadcast %cst_36 : f32 to vector<32x256xf32>
    %105 = arith.maximumf %103, %104 : vector<32x256xf32>
    %106 = vector.shape_cast %105 : vector<32x256xf32> to vector<2x16x256xf32>
    %c1_i32_37 = arith.constant 1 : i32
    %107 = tpu.memref_slice %arg16[%c1_i32_37] : memref<2x!tpu.dma_semaphore, #tpu.memory_space<semaphore_mem>> -> memref<1x!tpu.dma_semaphore, #tpu.memory_space<semaphore_mem>>
    %108 = tpu.memref_squeeze %107 : memref<1x!tpu.dma_semaphore, #tpu.memory_space<semaphore_mem>> -> memref<!tpu.dma_semaphore, #tpu.memory_space<semaphore_mem>>
    tpu.wait_dma2 semaphore(%108 : memref<!tpu.dma_semaphore, #tpu.memory_space<semaphore_mem>>) src(%arg8 : memref<1280x256xbf16, #tpu.memory_space<any>>) dst(%arg15 : memref<1280x256xbf16, #tpu.memory_space<vmem>>)
    %c0_38 = arith.constant 0 : index
    %c0_39 = arith.constant 0 : index
    %109 = vector.load %arg15[%c0_38, %c0_39] : memref<1280x256xbf16, #tpu.memory_space<vmem>>, vector<1280x256xbf16>
    %c0_40 = arith.constant 0 : index
    %c0_41 = arith.constant 0 : index
    %110 = vector.load %arg9[%c0_40, %c0_41] : memref<1x256xf32, #tpu.memory_space<vmem>>, vector<1x256xf32>
    %c0_42 = arith.constant 0 : index
    %c0_43 = arith.constant 0 : index
    %111 = vector.load %arg10[%c0_42, %c0_43] : memref<1x256xf32, #tpu.memory_space<vmem>>, vector<1x256xf32>
    %112 = tpu.iota {dimensions = array<i32: 1>} : vector<2x16x256xi32>
    %113 = vector.extract_strided_slice %106 {offsets = [0, 0, 0], sizes = [2, 1, 256], strides = [1, 1, 1]} : vector<2x16x256xf32> to vector<2x1x256xf32>
    %114 = vector.shape_cast %113 : vector<2x1x256xf32> to vector<2x1x256xf32>
    %115 = vector.broadcast %114 : vector<2x1x256xf32> to vector<2x16x256xf32>
    %116 = vector.extract_strided_slice %106 {offsets = [0, 15, 0], sizes = [2, 1, 256], strides = [1, 1, 1]} : vector<2x16x256xf32> to vector<2x1x256xf32>
    %117 = vector.shape_cast %116 : vector<2x1x256xf32> to vector<2x1x256xf32>
    %118 = vector.broadcast %117 : vector<2x1x256xf32> to vector<2x16x256xf32>
    %c2_i32_44 = arith.constant 2 : i32
    %119 = tpu.dynamic_rotate %106 by %c2_i32_44 dim 1 : vector<2x16x256xf32>, i32 -> vector<2x16x256xf32>
    %c2_i32_45 = arith.constant 2 : i32
    %120 = vector.broadcast %c2_i32_45 : i32 to vector<2x16x256xi32>
    %121 = arith.cmpi slt, %112, %120 : vector<2x16x256xi32>
    %122 = arith.select %121, %115, %119 : vector<2x16x256xi1>, vector<2x16x256xf32>
    %c1_i32_46 = arith.constant 1 : i32
    %123 = tpu.dynamic_rotate %106 by %c1_i32_46 dim 1 : vector<2x16x256xf32>, i32 -> vector<2x16x256xf32>
    %c1_i32_47 = arith.constant 1 : i32
    %124 = vector.broadcast %c1_i32_47 : i32 to vector<2x16x256xi32>
    %125 = arith.cmpi slt, %112, %124 : vector<2x16x256xi32>
    %126 = arith.select %125, %115, %123 : vector<2x16x256xi1>, vector<2x16x256xf32>
    %c15_i32_48 = arith.constant 15 : i32
    %127 = tpu.dynamic_rotate %106 by %c15_i32_48 dim 1 : vector<2x16x256xf32>, i32 -> vector<2x16x256xf32>
    %c15_i32_49 = arith.constant 15 : i32
    %128 = vector.broadcast %c15_i32_49 : i32 to vector<2x16x256xi32>
    %129 = arith.cmpi sge, %112, %128 : vector<2x16x256xi32>
    %130 = arith.select %129, %118, %127 : vector<2x16x256xi1>, vector<2x16x256xf32>
    %c14_i32_50 = arith.constant 14 : i32
    %131 = tpu.dynamic_rotate %106 by %c14_i32_50 dim 1 : vector<2x16x256xf32>, i32 -> vector<2x16x256xf32>
    %c14_i32_51 = arith.constant 14 : i32
    %132 = vector.broadcast %c14_i32_51 : i32 to vector<2x16x256xi32>
    %133 = arith.cmpi sge, %112, %132 : vector<2x16x256xi32>
    %134 = arith.select %133, %118, %131 : vector<2x16x256xi1>, vector<2x16x256xf32>
    %135 = tpu.concatenate %122, %126, %106, %130, %134 in 2 : vector<2x16x256xf32>, vector<2x16x256xf32>, vector<2x16x256xf32>, vector<2x16x256xf32>, vector<2x16x256xf32> -> vector<2x16x1280xf32>
    %136 = vector.shape_cast %135 : vector<2x16x1280xf32> to vector<32x1280xf32>
    %137 = arith.truncf %136 : vector<32x1280xf32> to vector<32x1280xbf16>
    %cst_52 = arith.constant dense<0.000000e+00> : vector<32x256xf32>
    %138 = tpu.matmul %137, %109, %cst_52 {dimension_numbers = #tpu.dot_dimension_numbers<[1], [0], [0], [1], [0, 0, 1, 1], [], []>} : vector<32x1280xbf16>, vector<1280x256xbf16>, vector<32x256xf32> -> vector<32x256xf32>
    %cst_53 = arith.constant dense<0.000000e+00> : vector<256xf32>
    %139 = vector.multi_reduction <add>, %138, %cst_53 [0] : vector<32x256xf32> to vector<256xf32>
    %140 = vector.shape_cast %139 : vector<256xf32> to vector<1x256xf32>
    %cst_54 = arith.constant 3.125000e-02 : f32
    %141 = vector.broadcast %cst_54 : f32 to vector<1x256xf32>
    %142 = arith.mulf %140, %141 : vector<1x256xf32>
    %143 = arith.mulf %138, %138 : vector<32x256xf32>
    %cst_55 = arith.constant dense<0.000000e+00> : vector<256xf32>
    %144 = vector.multi_reduction <add>, %143, %cst_55 [0] : vector<32x256xf32> to vector<256xf32>
    %145 = vector.shape_cast %144 : vector<256xf32> to vector<1x256xf32>
    %cst_56 = arith.constant 3.125000e-02 : f32
    %146 = vector.broadcast %cst_56 : f32 to vector<1x256xf32>
    %147 = arith.mulf %145, %146 : vector<1x256xf32>
    %148 = arith.mulf %142, %142 : vector<1x256xf32>
    %149 = arith.subf %147, %148 : vector<1x256xf32>
    %cst_57 = arith.constant 9.99999974E-6 : f32
    %150 = vector.broadcast %cst_57 : f32 to vector<1x256xf32>
    %151 = arith.addf %149, %150 : vector<1x256xf32>
    %152 = math.rsqrt %151 : vector<1x256xf32>
    %153 = arith.mulf %110, %152 : vector<1x256xf32>
    %154 = arith.mulf %142, %153 : vector<1x256xf32>
    %155 = arith.subf %111, %154 : vector<1x256xf32>
    %156 = vector.broadcast %153 : vector<1x256xf32> to vector<32x256xf32>
    %157 = arith.mulf %138, %156 : vector<32x256xf32>
    %158 = vector.broadcast %155 : vector<1x256xf32> to vector<32x256xf32>
    %159 = arith.addf %157, %158 : vector<32x256xf32>
    %cst_58 = arith.constant 0.000000e+00 : f32
    %160 = vector.broadcast %cst_58 : f32 to vector<32x256xf32>
    %161 = arith.maximumf %159, %160 : vector<32x256xf32>
    %162 = vector.shape_cast %161 : vector<32x256xf32> to vector<2x16x256xf32>
    %c0_59 = arith.constant 0 : index
    %c0_60 = arith.constant 0 : index
    %163 = vector.load %arg11[%c0_59, %c0_60] : memref<256x16xbf16, #tpu.memory_space<vmem>>, vector<256x16xbf16>
    %164 = vector.shape_cast %162 : vector<2x16x256xf32> to vector<32x256xf32>
    %165 = arith.truncf %164 : vector<32x256xf32> to vector<32x256xbf16>
    %cst_61 = arith.constant dense<0.000000e+00> : vector<32x16xf32>
    %166 = tpu.matmul %165, %163, %cst_61 {dimension_numbers = #tpu.dot_dimension_numbers<[1], [0], [0], [1], [0, 0, 1, 1], [], []>} : vector<32x256xbf16>, vector<256x16xbf16>, vector<32x16xf32> -> vector<32x16xf32>
    %c0_62 = arith.constant 0 : index
    %c0_63 = arith.constant 0 : index
    %167 = vector.load %arg12[%c0_62, %c0_63] : memref<1x16xf32, #tpu.memory_space<vmem>>, vector<1x16xf32>
    %168 = vector.broadcast %167 : vector<1x16xf32> to vector<32x16xf32>
    %169 = arith.addf %166, %168 : vector<32x16xf32>
    %170 = vector.shape_cast %169 : vector<32x16xf32> to vector<2x16x16xf32>
    %cst_64 = arith.constant dense<0xFF800000> : vector<2x16xf32>
    %171 = vector.multi_reduction <maximumf>, %170, %cst_64 [1] : vector<2x16x16xf32> to vector<2x16xf32>
    %172 = vector.shape_cast %171 : vector<2x16xf32> to vector<2x1x16xf32>
    %173 = vector.broadcast %172 : vector<2x1x16xf32> to vector<2x16x16xf32>
    %174 = arith.subf %170, %173 : vector<2x16x16xf32>
    %175 = math.exp %174 : vector<2x16x16xf32>
    %cst_65 = arith.constant dense<0.000000e+00> : vector<2x16xf32>
    %176 = vector.multi_reduction <add>, %175, %cst_65 [1] : vector<2x16x16xf32> to vector<2x16xf32>
    %177 = vector.shape_cast %176 : vector<2x16xf32> to vector<2x1x16xf32>
    %178 = tpu.reciprocal %177 {approx = true} : vector<2x1x16xf32> -> vector<2x1x16xf32>
    %179 = vector.broadcast %178 : vector<2x1x16xf32> to vector<2x16x16xf32>
    %180 = arith.mulf %175, %179 : vector<2x16x16xf32>
    %181 = tpu.iota {dimensions = array<i32: 0>} : vector<16x16xi32>
    %182 = tpu.iota {dimensions = array<i32: 1>} : vector<16x16xi32>
    %183 = arith.cmpi eq, %181, %182 : vector<16x16xi32>
    %184 = arith.extui %183 : vector<16x16xi1> to vector<16x16xi32>
    %185 = arith.sitofp %184 : vector<16x16xi32> to vector<16x16xf32>
    %186 = vector.extract_strided_slice %180 {offsets = [0, 0, 0], sizes = [1, 16, 16], strides = [1, 1, 1]} : vector<2x16x16xf32> to vector<1x16x16xf32>
    %187 = vector.shape_cast %186 : vector<1x16x16xf32> to vector<16x16xf32>
    %cst_66 = arith.constant dense<0.000000e+00> : vector<16x16xf32>
    %188 = tpu.matmul %185, %187, %cst_66 {dimension_numbers = #tpu.dot_dimension_numbers<[1], [1], [0], [0], [0, 0, 1, 0], [], []>} : vector<16x16xf32>, vector<16x16xf32>, vector<16x16xf32> -> vector<16x16xf32>
    %c0_67 = arith.constant 0 : index
    %c0_68 = arith.constant 0 : index
    %c0_69 = arith.constant 0 : index
    %189 = vector.load %arg13[%c0_67, %c0_68, %c0_69] : memref<2x16x16xf32, #tpu.memory_space<vmem>>, vector<1x16x16xf32>
    %190 = vector.shape_cast %189 : vector<1x16x16xf32> to vector<16x16xf32>
    %191 = vector.shape_cast %188 : vector<16x16xf32> to vector<1x16x16xf32>
    tpu.vector_store %arg13[%c0_67, %c0_68, %c0_69], %191 {strides = array<i32>} : memref<2x16x16xf32, #tpu.memory_space<vmem>>, vector<1x16x16xf32>,
    %192 = vector.extract_strided_slice %180 {offsets = [1, 0, 0], sizes = [1, 16, 16], strides = [1, 1, 1]} : vector<2x16x16xf32> to vector<1x16x16xf32>
    %193 = vector.shape_cast %192 : vector<1x16x16xf32> to vector<16x16xf32>
    %cst_70 = arith.constant dense<0.000000e+00> : vector<16x16xf32>
    %194 = tpu.matmul %185, %193, %cst_70 {dimension_numbers = #tpu.dot_dimension_numbers<[1], [1], [0], [0], [0, 0, 1, 0], [], []>} : vector<16x16xf32>, vector<16x16xf32>, vector<16x16xf32> -> vector<16x16xf32>
    %c1 = arith.constant 1 : index
    %c0_71 = arith.constant 0 : index
    %c0_72 = arith.constant 0 : index
    %195 = vector.load %arg13[%c1, %c0_71, %c0_72] : memref<2x16x16xf32, #tpu.memory_space<vmem>>, vector<1x16x16xf32>
    %196 = vector.shape_cast %195 : vector<1x16x16xf32> to vector<16x16xf32>
    %197 = vector.shape_cast %194 : vector<16x16xf32> to vector<1x16x16xf32>
    tpu.vector_store %arg13[%c1, %c0_71, %c0_72], %197 {strides = array<i32>} : memref<2x16x16xf32, #tpu.memory_space<vmem>>, vector<1x16x16xf32>,
    return
  }
  func.func @transform_0(%arg0: i32) -> (i32, i32, i32) {
    %c0_i32 = arith.constant 0 : i32
    %c0_i32_0 = arith.constant 0 : i32
    %c0_i32_1 = arith.constant 0 : i32
    %c0_i32_2 = arith.constant 0 : i32
    return %c0_i32, %c0_i32_0, %c0_i32_1 : i32, i32, i32
  }
  func.func @transform_1(%arg0: i32) -> (i32, i32) {
    %c0_i32 = arith.constant 0 : i32
    %c0_i32_0 = arith.constant 0 : i32
    %c0_i32_1 = arith.constant 0 : i32
    return %c0_i32, %c0_i32_0 : i32, i32
  }
  func.func @transform_2(%arg0: i32) -> (i32, i32) {
    %c0_i32 = arith.constant 0 : i32
    %c0_i32_0 = arith.constant 0 : i32
    %c0_i32_1 = arith.constant 0 : i32
    return %c0_i32, %c0_i32_0 : i32, i32
  }
  func.func @transform_3(%arg0: i32) -> (i32, i32) {
    %c0_i32 = arith.constant 0 : i32
    %c0_i32_0 = arith.constant 0 : i32
    %c0_i32_1 = arith.constant 0 : i32
    return %c0_i32, %c0_i32_0 : i32, i32
  }
  func.func @transform_5(%arg0: i32) -> (i32, i32) {
    %c0_i32 = arith.constant 0 : i32
    %c0_i32_0 = arith.constant 0 : i32
    %c0_i32_1 = arith.constant 0 : i32
    return %c0_i32, %c0_i32_0 : i32, i32
  }
  func.func @transform_6(%arg0: i32) -> (i32, i32) {
    %c0_i32 = arith.constant 0 : i32
    %c0_i32_0 = arith.constant 0 : i32
    %c0_i32_1 = arith.constant 0 : i32
    return %c0_i32, %c0_i32_0 : i32, i32
  }
  func.func @transform_8(%arg0: i32) -> (i32, i32) {
    %c0_i32 = arith.constant 0 : i32
    %c0_i32_0 = arith.constant 0 : i32
    %c0_i32_1 = arith.constant 0 : i32
    return %c0_i32, %c0_i32_0 : i32, i32
  }
  func.func @transform_9(%arg0: i32) -> (i32, i32) {
    %c0_i32 = arith.constant 0 : i32
    %c0_i32_0 = arith.constant 0 : i32
    %c0_i32_1 = arith.constant 0 : i32
    return %c0_i32, %c0_i32_0 : i32, i32
  }
  func.func @transform_10(%arg0: i32) -> (i32, i32) {
    %c0_i32 = arith.constant 0 : i32
    %c0_i32_0 = arith.constant 0 : i32
    %c0_i32_1 = arith.constant 0 : i32
    return %c0_i32, %c0_i32_0 : i32, i32
  }
  func.func @transform_11(%arg0: i32) -> (i32, i32) {
    %c0_i32 = arith.constant 0 : i32
    %c0_i32_0 = arith.constant 0 : i32
    %c0_i32_1 = arith.constant 0 : i32
    return %c0_i32, %c0_i32_0 : i32, i32
  }
  func.func @transform_12(%arg0: i32) -> (i32, i32, i32) {
    %c0_i32 = arith.constant 0 : i32
    %c0_i32_0 = arith.constant 0 : i32
    %c0_i32_1 = arith.constant 0 : i32
    %c0_i32_2 = arith.constant 0 : i32
    return %c0_i32, %c0_i32_0, %c0_i32_1 : i32, i32, i32
  }
}

</mosaic_0001>

<bundles_post_ra>
// kernel: convhead_forward.1
= control target key start
LH: loop header
LB: loop body
LE: loop exit
PB: predicated region body
PF: predicated region fallthrough
CT: control target
= control target key end

     0   :  { %17 = vsyncpa [#allocation6], 0  ;;  %s8680_s0 = inlined_call_operand.vmem [shape: f32[2,16,72], index: 0, kind: input, shape index: {}]   ;;  %s8681_s1 = inlined_call_operand.vmem [shape: bf16[216,256], index: 1, kind: input, shape index: {}]   ;;  %s8682_s2 = inlined_call_operand.vmem [shape: f32[1,256], index: 2, kind: input, shape index: {}]   ;;  %s8683_s3 = inlined_call_operand.vmem [shape: f32[1,256], index: 3, kind: input, shape index: {}]   ;;  %s8684_s4 = inlined_call_operand.vmem [shape: bf16[1280,256], index: 4, kind: input, shape index: {}]   ;;  %s8685_s5 = inlined_call_operand.vmem [shape: f32[1,256], index: 5, kind: input, shape index: {}]   ;;  %s8686_s6 = inlined_call_operand.vmem [shape: f32[1,256], index: 6, kind: input, shape index: {}]   ;;  %s8687_s7 = inlined_call_operand.vmem [shape: bf16[1280,256], index: 7, kind: input, shape index: {}]   ;;  %s8688_s8 = inlined_call_operand.vmem [shape: f32[1,256], index: 8, kind: input, shape index: {}]   ;;  %s8689_s9 = inlined_call_operand.vmem [shape: f32[1,256], index: 9, kind: input, shape index: {}]   ;;  %s8690_s10 = inlined_call_operand.vmem [shape: bf16[256,16], index: 10, kind: input, shape index: {}]   ;;  %s8691_s11 = inlined_call_operand.vmem [shape: f32[1,16], index: 11, kind: input, shape index: {}]   ;;  %s8692_s12 = inlined_call_operand.hbm [shape: f32[2,16,16], index: 12, kind: output, shape index: {}]  }
   0x1   :  { %v49_v0 = vld [vmem:[%s8684_s4] sm:$0xff]  ;;  %v51_v1 = vld [vmem:[%s8684_s4 + $0x8] sm:$0xff]  ;;  %v53_v2 = vld [vmem:[%s8684_s4 + $0x10] sm:$0xff] }
   0x2   :  { %50 = vst [vmem:[#allocation2] sm:$0xff] %v49_v0  ;;  %v55_v3 = vld [vmem:[%s8684_s4 + $0x18] sm:$0xff]  ;;  %v57_v4 = vld [vmem:[%s8684_s4 + $0x20] sm:$0xff]  ;;  %v59_v5 = vld [vmem:[%s8684_s4 + $0x28] sm:$0xff] }
   0x3   :  { %52 = vst [vmem:[#allocation2 + $0x8] sm:$0xff] %v51_v1  ;;  %v61_v6 = vld [vmem:[%s8684_s4 + $0x30] sm:$0xff]  ;;  %v63_v7 = vld [vmem:[%s8684_s4 + $0x38] sm:$0xff]  ;;  %v65_v8 = vld [vmem:[%s8684_s4 + $0x40] sm:$0xff] }
   0x4   :  { %54 = vst [vmem:[#allocation2 + $0x10] sm:$0xff] %v53_v2  ;;  %v67_v9 = vld [vmem:[%s8684_s4 + $0x48] sm:$0xff]  ;;  %v69_v10 = vld [vmem:[%s8684_s4 + $0x50] sm:$0xff]  ;;  %v71_v11 = vld [vmem:[%s8684_s4 + $0x58] sm:$0xff] }
   0x5   :  { %56 = vst [vmem:[#allocation2 + $0x18] sm:$0xff] %v55_v3  ;;  %v73_v12 = vld [vmem:[%s8684_s4 + $0x60] sm:$0xff]  ;;  %v75_v13 = vld [vmem:[%s8684_s4 + $0x68] sm:$0xff]  ;;  %v77_v14 = vld [vmem:[%s8684_s4 + $0x70] sm:$0xff] }
   0x6   :  { %58 = vst [vmem:[#allocation2 + $0x20] sm:$0xff] %v57_v4  ;;  %v79_v15 = vld [vmem:[%s8684_s4 + $0x78] sm:$0xff]  ;;  %v81_v16 = vld [vmem:[%s8684_s4 + $0x80] sm:$0xff]  ;;  %v83_v17 = vld [vmem:[%s8684_s4 + $0x88] sm:$0xff] }
   0x7   :  { %60 = vst [vmem:[#allocation2 + $0x28] sm:$0xff] %v59_v5  ;;  %v85_v18 = vld [vmem:[%s8684_s4 + $0x90] sm:$0xff]  ;;  %v87_v19 = vld [vmem:[%s8684_s4 + $0x98] sm:$0xff]  ;;  %v89_v20 = vld [vmem:[%s8684_s4 + $0xa0] sm:$0xff] }
   0x8   :  { %62 = vst [vmem:[#allocation2 + $0x30] sm:$0xff] %v61_v6  ;;  %v91_v21 = vld [vmem:[%s8684_s4 + $0xa8] sm:$0xff]  ;;  %v93_v22 = vld [vmem:[%s8684_s4 + $0xb0] sm:$0xff]  ;;  %v95_v23 = vld [vmem:[%s8684_s4 + $0xb8] sm:$0xff] }
   0x9   :  { %64 = vst [vmem:[#allocation2 + $0x38] sm:$0xff] %v63_v7  ;;  %v97_v24 = vld [vmem:[%s8684_s4 + $0xc0] sm:$0xff]  ;;  %v99_v25 = vld [vmem:[%s8684_s4 + $0xc8] sm:$0xff]  ;;  %v101_v26 = vld [vmem:[%s8684_s4 + $0xd0] sm:$0xff] }
   0xa   :  { %66 = vst [vmem:[#allocation2 + $0x40] sm:$0xff] %v65_v8  ;;  %v103_v27 = vld [vmem:[%s8684_s4 + $0xd8] sm:$0xff]  ;;  %v105_v28 = vld [vmem:[%s8684_s4 + $0xe0] sm:$0xff]  ;;  %v107_v29 = vld [vmem:[%s8684_s4 + $0xe8] sm:$0xff] }
   0xb   :  { %68 = vst [vmem:[#allocation2 + $0x48] sm:$0xff] %v67_v9  ;;  %v109_v30 = vld [vmem:[%s8684_s4 + $0xf0] sm:$0xff]  ;;  %v111_v31 = vld [vmem:[%s8684_s4 + $0xf8] sm:$0xff]  ;;  %v113_v32 = vld [vmem:[%s8684_s4 + $0x100] sm:$0xff] }
   0xc   :  { %70 = vst [vmem:[#allocation2 + $0x50] sm:$0xff] %v69_v10  ;;  %v115_v33 = vld [vmem:[%s8684_s4 + $0x108] sm:$0xff]  ;;  %v117_v34 = vld [vmem:[%s8684_s4 + $0x110] sm:$0xff]  ;;  %v119_v35 = vld [vmem:[%s8684_s4 + $0x118] sm:$0xff] }
   0xd   :  { %72 = vst [vmem:[#allocation2 + $0x58] sm:$0xff] %v71_v11  ;;  %v121_v36 = vld [vmem:[%s8684_s4 + $0x120] sm:$0xff]  ;;  %v123_v37 = vld [vmem:[%s8684_s4 + $0x128] sm:$0xff]  ;;  %v125_v38 = vld [vmem:[%s8684_s4 + $0x130] sm:$0xff] }
   0xe   :  { %74 = vst [vmem:[#allocation2 + $0x60] sm:$0xff] %v73_v12  ;;  %v127_v39 = vld [vmem:[%s8684_s4 + $0x138] sm:$0xff]  ;;  %v129_v40 = vld [vmem:[%s8684_s4 + $0x140] sm:$0xff]  ;;  %v131_v41 = vld [vmem:[%s8684_s4 + $0x148] sm:$0xff] }
   0xf   :  { %76 = vst [vmem:[#allocation2 + $0x68] sm:$0xff] %v75_v13  ;;  %v133_v42 = vld [vmem:[%s8684_s4 + $0x150] sm:$0xff]  ;;  %v135_v43 = vld [vmem:[%s8684_s4 + $0x158] sm:$0xff]  ;;  %v137_v44 = vld [vmem:[%s8684_s4 + $0x160] sm:$0xff] }
  0x10   :  { %78 = vst [vmem:[#allocation2 + $0x70] sm:$0xff] %v77_v14  ;;  %v139_v45 = vld [vmem:[%s8684_s4 + $0x168] sm:$0xff]  ;;  %v141_v46 = vld [vmem:[%s8684_s4 + $0x170] sm:$0xff]  ;;  %v143_v47 = vld [vmem:[%s8684_s4 + $0x178] sm:$0xff] }
  0x11   :  { %80 = vst [vmem:[#allocation2 + $0x78] sm:$0xff] %v79_v15  ;;  %v145_v48 = vld [vmem:[%s8684_s4 + $0x180] sm:$0xff]  ;;  %v147_v49 = vld [vmem:[%s8684_s4 + $0x188] sm:$0xff]  ;;  %v149_v50 = vld [vmem:[%s8684_s4 + $0x190] sm:$0xff] }
  0x12   :  { %82 = vst [vmem:[#allocation2 + $0x80] sm:$0xff] %v81_v16  ;;  %v151_v51 = vld [vmem:[%s8684_s4 + $0x198] sm:$0xff]  ;;  %v153_v52 = vld [vmem:[%s8684_s4 + $0x1a0] sm:$0xff]  ;;  %v155_v53 = vld [vmem:[%s8684_s4 + $0x1a8] sm:$0xff] }
  0x13   :  { %84 = vst [vmem:[#allocation2 + $0x88] sm:$0xff] %v83_v17  ;;  %v157_v54 = vld [vmem:[%s8684_s4 + $0x1b0] sm:$0xff]  ;;  %v159_v55 = vld [vmem:[%s8684_s4 + $0x1b8] sm:$0xff]  ;;  %v161_v56 = vld [vmem:[%s8684_s4 + $0x1c0] sm:$0xff] }
  0x14   :  { %86 = vst [vmem:[#allocation2 + $0x90] sm:$0xff] %v85_v18  ;;  %v163_v57 = vld [vmem:[%s8684_s4 + $0x1c8] sm:$0xff]  ;;  %v165_v58 = vld [vmem:[%s8684_s4 + $0x1d0] sm:$0xff]  ;;  %v167_v59 = vld [vmem:[%s8684_s4 + $0x1d8] sm:$0xff] }
  0x15   :  { %88 = vst [vmem:[#allocation2 + $0x98] sm:$0xff] %v87_v19  ;;  %v169_v60 = vld [vmem:[%s8684_s4 + $0x1e0] sm:$0xff]  ;;  %v171_v61 = vld [vmem:[%s8684_s4 + $0x1e8] sm:$0xff]  ;;  %v173_v62 = vld [vmem:[%s8684_s4 + $0x1f0] sm:$0xff] }
  0x16   :  { %90 = vst [vmem:[#allocation2 + $0xa0] sm:$0xff] %v89_v20  ;;  %v175_v63 = vld [vmem:[%s8684_s4 + $0x1f8] sm:$0xff]  ;;  %v177_v0 = vld [vmem:[%s8684_s4 + $0x200] sm:$0xff]  ;;  %v179_v1 = vld [vmem:[%s8684_s4 + $0x208] sm:$0xff] }
  0x17   :  { %92 = vst [vmem:[#allocation2 + $0xa8] sm:$0xff] %v91_v21  ;;  %v181_v2 = vld [vmem:[%s8684_s4 + $0x210] sm:$0xff]  ;;  %v183_v3 = vld [vmem:[%s8684_s4 + $0x218] sm:$0xff]  ;;  %v185_v4 = vld [vmem:[%s8684_s4 + $0x220] sm:$0xff] }
  0x18   :  { %94 = vst [vmem:[#allocation2 + $0xb0] sm:$0xff] %v93_v22  ;;  %v187_v5 = vld [vmem:[%s8684_s4 + $0x228] sm:$0xff]  ;;  %v189_v6 = vld [vmem:[%s8684_s4 + $0x230] sm:$0xff]  ;;  %v191_v7 = vld [vmem:[%s8684_s4 + $0x238] sm:$0xff] }
  0x19   :  { %96 = vst [vmem:[#allocation2 + $0xb8] sm:$0xff] %v95_v23  ;;  %v193_v8 = vld [vmem:[%s8684_s4 + $0x240] sm:$0xff]  ;;  %v195_v9 = vld [vmem:[%s8684_s4 + $0x248] sm:$0xff]  ;;  %v197_v10 = vld [vmem:[%s8684_s4 + $0x250] sm:$0xff] }
  0x1a   :  { %98 = vst [vmem:[#allocation2 + $0xc0] sm:$0xff] %v97_v24  ;;  %v199_v11 = vld [vmem:[%s8684_s4 + $0x258] sm:$0xff]  ;;  %v201_v12 = vld [vmem:[%s8684_s4 + $0x260] sm:$0xff]  ;;  %v203_v13 = vld [vmem:[%s8684_s4 + $0x268] sm:$0xff] }
  0x1b   :  { %100 = vst [vmem:[#allocation2 + $0xc8] sm:$0xff] %v99_v25  ;;  %v205_v14 = vld [vmem:[%s8684_s4 + $0x270] sm:$0xff]  ;;  %v207_v15 = vld [vmem:[%s8684_s4 + $0x278] sm:$0xff]  ;;  %v209_v16 = vld [vmem:[%s8684_s4 + $0x280] sm:$0xff] }
  0x1c   :  { %102 = vst [vmem:[#allocation2 + $0xd0] sm:$0xff] %v101_v26  ;;  %v211_v17 = vld [vmem:[%s8684_s4 + $0x288] sm:$0xff]  ;;  %v213_v18 = vld [vmem:[%s8684_s4 + $0x290] sm:$0xff]  ;;  %v215_v19 = vld [vmem:[%s8684_s4 + $0x298] sm:$0xff] }
  0x1d   :  { %104 = vst [vmem:[#allocation2 + $0xd8] sm:$0xff] %v103_v27  ;;  %v217_v20 = vld [vmem:[%s8684_s4 + $0x2a0] sm:$0xff]  ;;  %v219_v21 = vld [vmem:[%s8684_s4 + $0x2a8] sm:$0xff]  ;;  %v221_v22 = vld [vmem:[%s8684_s4 + $0x2b0] sm:$0xff] }
  0x1e   :  { %106 = vst [vmem:[#allocation2 + $0xe0] sm:$0xff] %v105_v28  ;;  %v223_v23 = vld [vmem:[%s8684_s4 + $0x2b8] sm:$0xff]  ;;  %v225_v24 = vld [vmem:[%s8684_s4 + $0x2c0] sm:$0xff]  ;;  %v227_v25 = vld [vmem:[%s8684_s4 + $0x2c8] sm:$0xff] }
  0x1f   :  { %108 = vst [vmem:[#allocation2 + $0xe8] sm:$0xff] %v107_v29  ;;  %v229_v26 = vld [vmem:[%s8684_s4 + $0x2d0] sm:$0xff]  ;;  %v231_v27 = vld [vmem:[%s8684_s4 + $0x2d8] sm:$0xff]  ;;  %v233_v28 = vld [vmem:[%s8684_s4 + $0x2e0] sm:$0xff] }
  0x20   :  { %110 = vst [vmem:[#allocation2 + $0xf0] sm:$0xff] %v109_v30  ;;  %v235_v29 = vld [vmem:[%s8684_s4 + $0x2e8] sm:$0xff]  ;;  %v237_v30 = vld [vmem:[%s8684_s4 + $0x2f0] sm:$0xff] }
  0x21   :  { %112 = vst [vmem:[#allocation2 + $0xf8] sm:$0xff] %v111_v31  ;;  %v239_v31 = vld [vmem:[%s8684_s4 + $0x2f8] sm:$0xff] }
  0x22   :  { %114 = vst [vmem:[#allocation2 + $0x100] sm:$0xff] %v113_v32  ;;  %v241_v32 = vld [vmem:[%s8684_s4 + $0x300] sm:$0xff] }
  0x23   :  { %116 = vst [vmem:[#allocation2 + $0x108] sm:$0xff] %v115_v33  ;;  %v243_v33 = vld [vmem:[%s8684_s4 + $0x308] sm:$0xff] }
  0x24   :  { %118 = vst [vmem:[#allocation2 + $0x110] sm:$0xff] %v117_v34  ;;  %v245_v34 = vld [vmem:[%s8684_s4 + $0x310] sm:$0xff] }
  0x25   :  { %120 = vst [vmem:[#allocation2 + $0x118] sm:$0xff] %v119_v35  ;;  %v247_v35 = vld [vmem:[%s8684_s4 + $0x318] sm:$0xff] }
  0x26   :  { %122 = vst [vmem:[#allocation2 + $0x120] sm:$0xff] %v121_v36  ;;  %v249_v36 = vld [vmem:[%s8684_s4 + $0x320] sm:$0xff] }
  0x27   :  { %124 = vst [vmem:[#allocation2 + $0x128] sm:$0xff] %v123_v37  ;;  %v251_v37 = vld [vmem:[%s8684_s4 + $0x328] sm:$0xff] }
  0x28   :  { %126 = vst [vmem:[#allocation2 + $0x130] sm:$0xff] %v125_v38  ;;  %v253_v38 = vld [vmem:[%s8684_s4 + $0x330] sm:$0xff] }
  0x29   :  { %128 = vst [vmem:[#allocation2 + $0x138] sm:$0xff] %v127_v39  ;;  %v255_v39 = vld [vmem:[%s8684_s4 + $0x338] sm:$0xff] }
  0x2a   :  { %130 = vst [vmem:[#allocation2 + $0x140] sm:$0xff] %v129_v40  ;;  %v257_v40 = vld [vmem:[%s8684_s4 + $0x340] sm:$0xff] }
  0x2b   :  { %132 = vst [vmem:[#allocation2 + $0x148] sm:$0xff] %v131_v41  ;;  %v259_v41 = vld [vmem:[%s8684_s4 + $0x348] sm:$0xff] }
  0x2c   :  { %134 = vst [vmem:[#allocation2 + $0x150] sm:$0xff] %v133_v42  ;;  %v261_v42 = vld [vmem:[%s8684_s4 + $0x350] sm:$0xff] }
  0x2d   :  { %136 = vst [vmem:[#allocation2 + $0x158] sm:$0xff] %v135_v43  ;;  %v263_v43 = vld [vmem:[%s8684_s4 + $0x358] sm:$0xff] }
  0x2e   :  { %138 = vst [vmem:[#allocation2 + $0x160] sm:$0xff] %v137_v44  ;;  %v265_v44 = vld [vmem:[%s8684_s4 + $0x360] sm:$0xff] }
  0x2f   :  { %140 = vst [vmem:[#allocation2 + $0x168] sm:$0xff] %v139_v45  ;;  %v267_v45 = vld [vmem:[%s8684_s4 + $0x368] sm:$0xff] }
  0x30   :  { %142 = vst [vmem:[#allocation2 + $0x170] sm:$0xff] %v141_v46  ;;  %v269_v46 = vld [vmem:[%s8684_s4 + $0x370] sm:$0xff] }
  0x31   :  { %144 = vst [vmem:[#allocation2 + $0x178] sm:$0xff] %v143_v47  ;;  %v271_v47 = vld [vmem:[%s8684_s4 + $0x378] sm:$0xff] }
  0x32   :  { %146 = vst [vmem:[#allocation2 + $0x180] sm:$0xff] %v145_v48  ;;  %v273_v48 = vld [vmem:[%s8684_s4 + $0x380] sm:$0xff] }
  0x33   :  { %148 = vst [vmem:[#allocation2 + $0x188] sm:$0xff] %v147_v49  ;;  %v275_v49 = vld [vmem:[%s8684_s4 + $0x388] sm:$0xff] }
  0x34   :  { %150 = vst [vmem:[#allocation2 + $0x190] sm:$0xff] %v149_v50  ;;  %v277_v50 = vld [vmem:[%s8684_s4 + $0x390] sm:$0xff] }
  0x35   :  { %152 = vst [vmem:[#allocation2 + $0x198] sm:$0xff] %v151_v51  ;;  %v279_v51 = vld [vmem:[%s8684_s4 + $0x398] sm:$0xff] }
  0x36   :  { %154 = vst [vmem:[#allocation2 + $0x1a0] sm:$0xff] %v153_v52  ;;  %v281_v52 = vld [vmem:[%s8684_s4 + $0x3a0] sm:$0xff] }
  0x37   :  { %156 = vst [vmem:[#allocation2 + $0x1a8] sm:$0xff] %v155_v53  ;;  %v283_v53 = vld [vmem:[%s8684_s4 + $0x3a8] sm:$0xff] }
  0x38   :  { %158 = vst [vmem:[#allocation2 + $0x1b0] sm:$0xff] %v157_v54  ;;  %v285_v54 = vld [vmem:[%s8684_s4 + $0x3b0] sm:$0xff] }
  0x39   :  { %160 = vst [vmem:[#allocation2 + $0x1b8] sm:$0xff] %v159_v55  ;;  %v287_v55 = vld [vmem:[%s8684_s4 + $0x3b8] sm:$0xff] }
  0x3a   :  { %162 = vst [vmem:[#allocation2 + $0x1c0] sm:$0xff] %v161_v56  ;;  %v289_v56 = vld [vmem:[%s8684_s4 + $0x3c0] sm:$0xff] }
  0x3b   :  { %164 = vst [vmem:[#allocation2 + $0x1c8] sm:$0xff] %v163_v57  ;;  %v291_v57 = vld [vmem:[%s8684_s4 + $0x3c8] sm:$0xff] }
  0x3c   :  { %166 = vst [vmem:[#allocation2 + $0x1d0] sm:$0xff] %v165_v58  ;;  %v293_v58 = vld [vmem:[%s8684_s4 + $0x3d0] sm:$0xff] }
  0x3d   :  { %168 = vst [vmem:[#allocation2 + $0x1d8] sm:$0xff] %v167_v59  ;;  %v295_v59 = vld [vmem:[%s8684_s4 + $0x3d8] sm:$0xff] }
  0x3e   :  { %170 = vst [vmem:[#allocation2 + $0x1e0] sm:$0xff] %v169_v60  ;;  %v297_v60 = vld [vmem:[%s8684_s4 + $0x3e0] sm:$0xff] }
  0x3f   :  { %172 = vst [vmem:[#allocation2 + $0x1e8] sm:$0xff] %v171_v61  ;;  %v299_v61 = vld [vmem:[%s8684_s4 + $0x3e8] sm:$0xff] }
  0x40   :  { %174 = vst [vmem:[#allocation2 + $0x1f0] sm:$0xff] %v173_v62  ;;  %v301_v62 = vld [vmem:[%s8684_s4 + $0x3f0] sm:$0xff] }
  0x41   :  { %176 = vst [vmem:[#allocation2 + $0x1f8] sm:$0xff] %v175_v63  ;;  %v303_v63 = vld [vmem:[%s8684_s4 + $0x3f8] sm:$0xff] }
  0x42   :  { %178 = vst [vmem:[#allocation2 + $0x200] sm:$0xff] %v177_v0  ;;  %v305_v0 = vld [vmem:[%s8684_s4 + $0x400] sm:$0xff] }
  0x43   :  { %180 = vst [vmem:[#allocation2 + $0x208] sm:$0xff] %v179_v1  ;;  %v307_v1 = vld [vmem:[%s8684_s4 + $0x408] sm:$0xff] }
  0x44   :  { %182 = vst [vmem:[#allocation2 + $0x210] sm:$0xff] %v181_v2  ;;  %v309_v2 = vld [vmem:[%s8684_s4 + $0x410] sm:$0xff] }
  0x45   :  { %184 = vst [vmem:[#allocation2 + $0x218] sm:$0xff] %v183_v3  ;;  %v311_v3 = vld [vmem:[%s8684_s4 + $0x418] sm:$0xff] }
  0x46   :  { %186 = vst [vmem:[#allocation2 + $0x220] sm:$0xff] %v185_v4  ;;  %v313_v4 = vld [vmem:[%s8684_s4 + $0x420] sm:$0xff] }
  0x47   :  { %188 = vst [vmem:[#allocation2 + $0x228] sm:$0xff] %v187_v5  ;;  %v315_v5 = vld [vmem:[%s8684_s4 + $0x428] sm:$0xff] }
  0x48   :  { %190 = vst [vmem:[#allocation2 + $0x230] sm:$0xff] %v189_v6  ;;  %v317_v6 = vld [vmem:[%s8684_s4 + $0x430] sm:$0xff] }
  0x49   :  { %192 = vst [vmem:[#allocation2 + $0x238] sm:$0xff] %v191_v7  ;;  %v319_v7 = vld [vmem:[%s8684_s4 + $0x438] sm:$0xff] }
  0x4a   :  { %194 = vst [vmem:[#allocation2 + $0x240] sm:$0xff] %v193_v8  ;;  %v321_v8 = vld [vmem:[%s8684_s4 + $0x440] sm:$0xff] }
  0x4b   :  { %196 = vst [vmem:[#allocation2 + $0x248] sm:$0xff] %v195_v9  ;;  %v323_v9 = vld [vmem:[%s8684_s4 + $0x448] sm:$0xff] }
  0x4c   :  { %198 = vst [vmem:[#allocation2 + $0x250] sm:$0xff] %v197_v10  ;;  %v325_v10 = vld [vmem:[%s8684_s4 + $0x450] sm:$0xff] }
  0x4d   :  { %200 = vst [vmem:[#allocation2 + $0x258] sm:$0xff] %v199_v11  ;;  %v327_v11 = vld [vmem:[%s8684_s4 + $0x458] sm:$0xff] }
  0x4e   :  { %202 = vst [vmem:[#allocation2 + $0x260] sm:$0xff] %v201_v12  ;;  %v329_v12 = vld [vmem:[%s8684_s4 + $0x460] sm:$0xff] }
  0x4f   :  { %204 = vst [vmem:[#allocation2 + $0x268] sm:$0xff] %v203_v13  ;;  %v331_v13 = vld [vmem:[%s8684_s4 + $0x468] sm:$0xff] }
  0x50   :  { %206 = vst [vmem:[#allocation2 + $0x270] sm:$0xff] %v205_v14  ;;  %v333_v14 = vld [vmem:[%s8684_s4 + $0x470] sm:$0xff] }
  0x51   :  { %208 = vst [vmem:[#allocation2 + $0x278] sm:$0xff] %v207_v15  ;;  %v335_v15 = vld [vmem:[%s8684_s4 + $0x478] sm:$0xff] }
  0x52   :  { %210 = vst [vmem:[#allocation2 + $0x280] sm:$0xff] %v209_v16  ;;  %v337_v16 = vld [vmem:[%s8684_s4 + $0x480] sm:$0xff] }
  0x53   :  { %212 = vst [vmem:[#allocation2 + $0x288] sm:$0xff] %v211_v17  ;;  %v339_v17 = vld [vmem:[%s8684_s4 + $0x488] sm:$0xff] }
  0x54   :  { %214 = vst [vmem:[#allocation2 + $0x290] sm:$0xff] %v213_v18  ;;  %v341_v18 = vld [vmem:[%s8684_s4 + $0x490] sm:$0xff] }
  0x55   :  { %216 = vst [vmem:[#allocation2 + $0x298] sm:$0xff] %v215_v19  ;;  %v343_v19 = vld [vmem:[%s8684_s4 + $0x498] sm:$0xff] }
  0x56   :  { %218 = vst [vmem:[#allocation2 + $0x2a0] sm:$0xff] %v217_v20  ;;  %v345_v20 = vld [vmem:[%s8684_s4 + $0x4a0] sm:$0xff] }
  0x57   :  { %220 = vst [vmem:[#allocation2 + $0x2a8] sm:$0xff] %v219_v21  ;;  %v347_v21 = vld [vmem:[%s8684_s4 + $0x4a8] sm:$0xff] }
  0x58   :  { %222 = vst [vmem:[#allocation2 + $0x2b0] sm:$0xff] %v221_v22  ;;  %v349_v22 = vld [vmem:[%s8684_s4 + $0x4b0] sm:$0xff] }
  0x59   :  { %224 = vst [vmem:[#allocation2 + $0x2b8] sm:$0xff] %v223_v23  ;;  %v351_v23 = vld [vmem:[%s8684_s4 + $0x4b8] sm:$0xff] }
  0x5a   :  { %226 = vst [vmem:[#allocation2 + $0x2c0] sm:$0xff] %v225_v24  ;;  %v353_v24 = vld [vmem:[%s8684_s4 + $0x4c0] sm:$0xff] }
  0x5b   :  { %228 = vst [vmem:[#allocation2 + $0x2c8] sm:$0xff] %v227_v25  ;;  %v355_v25 = vld [vmem:[%s8684_s4 + $0x4c8] sm:$0xff] }
  0x5c   :  { %230 = vst [vmem:[#allocation2 + $0x2d0] sm:$0xff] %v229_v26  ;;  %v357_v26 = vld [vmem:[%s8684_s4 + $0x4d0] sm:$0xff] }
  0x5d   :  { %232 = vst [vmem:[#allocation2 + $0x2d8] sm:$0xff] %v231_v27  ;;  %v359_v27 = vld [vmem:[%s8684_s4 + $0x4d8] sm:$0xff] }
  0x5e   :  { %234 = vst [vmem:[#allocation2 + $0x2e0] sm:$0xff] %v233_v28  ;;  %v361_v28 = vld [vmem:[%s8684_s4 + $0x4e0] sm:$0xff] }
  0x5f   :  { %236 = vst [vmem:[#allocation2 + $0x2e8] sm:$0xff] %v235_v29  ;;  %v363_v29 = vld [vmem:[%s8684_s4 + $0x4e8] sm:$0xff] }
  0x60   :  { %238 = vst [vmem:[#allocation2 + $0x2f0] sm:$0xff] %v237_v30  ;;  %v365_v30 = vld [vmem:[%s8684_s4 + $0x4f0] sm:$0xff] }
  0x61   :  { %240 = vst [vmem:[#allocation2 + $0x2f8] sm:$0xff] %v239_v31  ;;  %v367_v31 = vld [vmem:[%s8684_s4 + $0x4f8] sm:$0xff] }
  0x62   :  { %242 = vst [vmem:[#allocation2 + $0x300] sm:$0xff] %v241_v32 }
  0x63   :  { %244 = vst [vmem:[#allocation2 + $0x308] sm:$0xff] %v243_v33 }
  0x64   :  { %246 = vst [vmem:[#allocation2 + $0x310] sm:$0xff] %v245_v34 }
  0x65   :  { %248 = vst [vmem:[#allocation2 + $0x318] sm:$0xff] %v247_v35 }
  0x66   :  { %250 = vst [vmem:[#allocation2 + $0x320] sm:$0xff] %v249_v36 }
  0x67   :  { %252 = vst [vmem:[#allocation2 + $0x328] sm:$0xff] %v251_v37 }
  0x68   :  { %254 = vst [vmem:[#allocation2 + $0x330] sm:$0xff] %v253_v38 }
  0x69   :  { %256 = vst [vmem:[#allocation2 + $0x338] sm:$0xff] %v255_v39 }
  0x6a   :  { %258 = vst [vmem:[#allocation2 + $0x340] sm:$0xff] %v257_v40 }
  0x6b   :  { %260 = vst [vmem:[#allocation2 + $0x348] sm:$0xff] %v259_v41 }
  0x6c   :  { %262 = vst [vmem:[#allocation2 + $0x350] sm:$0xff] %v261_v42 }
  0x6d   :  { %264 = vst [vmem:[#allocation2 + $0x358] sm:$0xff] %v263_v43 }
  0x6e   :  { %266 = vst [vmem:[#allocation2 + $0x360] sm:$0xff] %v265_v44 }
  0x6f   :  { %268 = vst [vmem:[#allocation2 + $0x368] sm:$0xff] %v267_v45 }
  0x70   :  { %270 = vst [vmem:[#allocation2 + $0x370] sm:$0xff] %v269_v46 }
  0x71   :  { %272 = vst [vmem:[#allocation2 + $0x378] sm:$0xff] %v271_v47 }
  0x72   :  { %274 = vst [vmem:[#allocation2 + $0x380] sm:$0xff] %v273_v48 }
  0x73   :  { %276 = vst [vmem:[#allocation2 + $0x388] sm:$0xff] %v275_v49 }
  0x74   :  { %278 = vst [vmem:[#allocation2 + $0x390] sm:$0xff] %v277_v50 }
  0x75   :  { %280 = vst [vmem:[#allocation2 + $0x398] sm:$0xff] %v279_v51 }
  0x76   :  { %282 = vst [vmem:[#allocation2 + $0x3a0] sm:$0xff] %v281_v52 }
  0x77   :  { %284 = vst [vmem:[#allocation2 + $0x3a8] sm:$0xff] %v283_v53 }
  0x78   :  { %286 = vst [vmem:[#allocation2 + $0x3b0] sm:$0xff] %v285_v54 }
  0x79   :  { %288 = vst [vmem:[#allocation2 + $0x3b8] sm:$0xff] %v287_v55 }
  0x7a   :  { %290 = vst [vmem:[#allocation2 + $0x3c0] sm:$0xff] %v289_v56 }
  0x7b   :  { %292 = vst [vmem:[#allocation2 + $0x3c8] sm:$0xff] %v291_v57 }
  0x7c   :  { %294 = vst [vmem:[#allocation2 + $0x3d0] sm:$0xff] %v293_v58 }
  0x7d   :  { %296 = vst [vmem:[#allocation2 + $0x3d8] sm:$0xff] %v295_v59 }
  0x7e   :  { %298 = vst [vmem:[#allocation2 + $0x3e0] sm:$0xff] %v297_v60 }
  0x7f   :  { %300 = vst [vmem:[#allocation2 + $0x3e8] sm:$0xff] %v299_v61 }
  0x80   :  { %302 = vst [vmem:[#allocation2 + $0x3f0] sm:$0xff] %v301_v62 }
  0x81   :  { %304 = vst [vmem:[#allocation2 + $0x3f8] sm:$0xff] %v303_v63 }
  0x82   :  { %306 = vst [vmem:[#allocation2 + $0x400] sm:$0xff] %v305_v0 }
  0x83   :  { %308 = vst [vmem:[#allocation2 + $0x408] sm:$0xff] %v307_v1 }
  0x84   :  { %310 = vst [vmem:[#allocation2 + $0x410] sm:$0xff] %v309_v2 }
  0x85   :  { %312 = vst [vmem:[#allocation2 + $0x418] sm:$0xff] %v311_v3 }
  0x86   :  { %314 = vst [vmem:[#allocation2 + $0x420] sm:$0xff] %v313_v4 }
  0x87   :  { %316 = vst [vmem:[#allocation2 + $0x428] sm:$0xff] %v315_v5 }
  0x88   :  { %318 = vst [vmem:[#allocation2 + $0x430] sm:$0xff] %v317_v6 }
  0x89   :  { %320 = vst [vmem:[#allocation2 + $0x438] sm:$0xff] %v319_v7 }
  0x8a   :  { %322 = vst [vmem:[#allocation2 + $0x440] sm:$0xff] %v321_v8 }
  0x8b   :  { %324 = vst [vmem:[#allocation2 + $0x448] sm:$0xff] %v323_v9 }
  0x8c   :  { %326 = vst [vmem:[#allocation2 + $0x450] sm:$0xff] %v325_v10 }
  0x8d   :  { %328 = vst [vmem:[#allocation2 + $0x458] sm:$0xff] %v327_v11 }
  0x8e   :  { %330 = vst [vmem:[#allocation2 + $0x460] sm:$0xff] %v329_v12 }
  0x8f   :  { %332 = vst [vmem:[#allocation2 + $0x468] sm:$0xff] %v331_v13 }
  0x90   :  { %334 = vst [vmem:[#allocation2 + $0x470] sm:$0xff] %v333_v14 }
  0x91   :  { %336 = vst [vmem:[#allocation2 + $0x478] sm:$0xff] %v335_v15 }
  0x92   :  { %338 = vst [vmem:[#allocation2 + $0x480] sm:$0xff] %v337_v16 }
  0x93   :  { %340 = vst [vmem:[#allocation2 + $0x488] sm:$0xff] %v339_v17 }
  0x94   :  { %342 = vst [vmem:[#allocation2 + $0x490] sm:$0xff] %v341_v18 }
  0x95   :  { %344 = vst [vmem:[#allocation2 + $0x498] sm:$0xff] %v343_v19 }
  0x96   :  { %346 = vst [vmem:[#allocation2 + $0x4a0] sm:$0xff] %v345_v20 }
  0x97   :  { %348 = vst [vmem:[#allocation2 + $0x4a8] sm:$0xff] %v347_v21 }
  0x98   :  { %350 = vst [vmem:[#allocation2 + $0x4b0] sm:$0xff] %v349_v22 }
  0x99   :  { %352 = vst [vmem:[#allocation2 + $0x4b8] sm:$0xff] %v351_v23 }
  0x9a   :  { %354 = vst [vmem:[#allocation2 + $0x4c0] sm:$0xff] %v353_v24 }
  0x9b   :  { %356 = vst [vmem:[#allocation2 + $0x4c8] sm:$0xff] %v355_v25 }
  0x9c   :  { %358 = vst [vmem:[#allocation2 + $0x4d0] sm:$0xff] %v357_v26 }
  0x9d   :  { %360 = vst [vmem:[#allocation2 + $0x4d8] sm:$0xff] %v359_v27 }
  0x9e   :  { %362 = vst [vmem:[#allocation2 + $0x4e0] sm:$0xff] %v361_v28 }
  0x9f   :  { %364 = vst [vmem:[#allocation2 + $0x4e8] sm:$0xff] %v363_v29 }
  0xa0   :  { %366 = vst [vmem:[#allocation2 + $0x4f0] sm:$0xff] %v365_v30 }
  0xa1   :  { %368 = vst [vmem:[#allocation2 + $0x4f8] sm:$0xff] %v367_v31 }
  0xa2   :  { %374 = vsyncadd [#allocation4], 20480  ;;  %v386_v32 = vld [vmem:[%s8687_s7] sm:$0xff]  ;;  %v388_v33 = vld [vmem:[%s8687_s7 + $0x8] sm:$0xff] }
  0xa3   :  { %387 = vst [vmem:[#allocation3] sm:$0xff] %v386_v32  ;;  %v390_v34 = vld [vmem:[%s8687_s7 + $0x10] sm:$0xff]  ;;  %v392_v35 = vld [vmem:[%s8687_s7 + $0x18] sm:$0xff]  ;;  %v394_v36 = vld [vmem:[%s8687_s7 + $0x20] sm:$0xff] }
  0xa4   :  { %389 = vst [vmem:[#allocation3 + $0x8] sm:$0xff] %v388_v33  ;;  %v396_v37 = vld [vmem:[%s8687_s7 + $0x28] sm:$0xff]  ;;  %v398_v38 = vld [vmem:[%s8687_s7 + $0x30] sm:$0xff]  ;;  %v400_v39 = vld [vmem:[%s8687_s7 + $0x38] sm:$0xff] }
  0xa5   :  { %391 = vst [vmem:[#allocation3 + $0x10] sm:$0xff] %v390_v34  ;;  %v402_v40 = vld [vmem:[%s8687_s7 + $0x40] sm:$0xff]  ;;  %v404_v41 = vld [vmem:[%s8687_s7 + $0x48] sm:$0xff]  ;;  %v406_v42 = vld [vmem:[%s8687_s7 + $0x50] sm:$0xff] }
  0xa6   :  { %393 = vst [vmem:[#allocation3 + $0x18] sm:$0xff] %v392_v35  ;;  %v408_v43 = vld [vmem:[%s8687_s7 + $0x58] sm:$0xff]  ;;  %v410_v44 = vld [vmem:[%s8687_s7 + $0x60] sm:$0xff]  ;;  %v412_v45 = vld [vmem:[%s8687_s7 + $0x68] sm:$0xff] }
  0xa7   :  { %395 = vst [vmem:[#allocation3 + $0x20] sm:$0xff] %v394_v36  ;;  %v414_v46 = vld [vmem:[%s8687_s7 + $0x70] sm:$0xff]  ;;  %v416_v47 = vld [vmem:[%s8687_s7 + $0x78] sm:$0xff]  ;;  %v418_v48 = vld [vmem:[%s8687_s7 + $0x80] sm:$0xff] }
  0xa8   :  { %397 = vst [vmem:[#allocation3 + $0x28] sm:$0xff] %v396_v37  ;;  %v420_v49 = vld [vmem:[%s8687_s7 + $0x88] sm:$0xff]  ;;  %v422_v50 = vld [vmem:[%s8687_s7 + $0x90] sm:$0xff]  ;;  %v424_v51 = vld [vmem:[%s8687_s7 + $0x98] sm:$0xff] }
  0xa9   :  { %399 = vst [vmem:[#allocation3 + $0x30] sm:$0xff] %v398_v38  ;;  %v426_v52 = vld [vmem:[%s8687_s7 + $0xa0] sm:$0xff]  ;;  %v428_v53 = vld [vmem:[%s8687_s7 + $0xa8] sm:$0xff]  ;;  %v430_v54 = vld [vmem:[%s8687_s7 + $0xb0] sm:$0xff] }
  0xaa   :  { %401 = vst [vmem:[#allocation3 + $0x38] sm:$0xff] %v400_v39  ;;  %v432_v55 = vld [vmem:[%s8687_s7 + $0xb8] sm:$0xff]  ;;  %v434_v56 = vld [vmem:[%s8687_s7 + $0xc0] sm:$0xff]  ;;  %v436_v57 = vld [vmem:[%s8687_s7 + $0xc8] sm:$0xff] }
  0xab   :  { %403 = vst [vmem:[#allocation3 + $0x40] sm:$0xff] %v402_v40  ;;  %v438_v58 = vld [vmem:[%s8687_s7 + $0xd0] sm:$0xff]  ;;  %v440_v59 = vld [vmem:[%s8687_s7 + $0xd8] sm:$0xff]  ;;  %v442_v60 = vld [vmem:[%s8687_s7 + $0xe0] sm:$0xff] }
  0xac   :  { %405 = vst [vmem:[#allocation3 + $0x48] sm:$0xff] %v404_v41  ;;  %v444_v61 = vld [vmem:[%s8687_s7 + $0xe8] sm:$0xff]  ;;  %v446_v62 = vld [vmem:[%s8687_s7 + $0xf0] sm:$0xff]  ;;  %v448_v63 = vld [vmem:[%s8687_s7 + $0xf8] sm:$0xff] }
  0xad   :  { %407 = vst [vmem:[#allocation3 + $0x50] sm:$0xff] %v406_v42  ;;  %v450_v0 = vld [vmem:[%s8687_s7 + $0x100] sm:$0xff]  ;;  %v452_v1 = vld [vmem:[%s8687_s7 + $0x108] sm:$0xff]  ;;  %v454_v2 = vld [vmem:[%s8687_s7 + $0x110] sm:$0xff] }
  0xae   :  { %409 = vst [vmem:[#allocation3 + $0x58] sm:$0xff] %v408_v43  ;;  %v456_v3 = vld [vmem:[%s8687_s7 + $0x118] sm:$0xff]  ;;  %v458_v4 = vld [vmem:[%s8687_s7 + $0x120] sm:$0xff]  ;;  %v460_v5 = vld [vmem:[%s8687_s7 + $0x128] sm:$0xff] }
  0xaf   :  { %411 = vst [vmem:[#allocation3 + $0x60] sm:$0xff] %v410_v44  ;;  %v462_v6 = vld [vmem:[%s8687_s7 + $0x130] sm:$0xff]  ;;  %v464_v7 = vld [vmem:[%s8687_s7 + $0x138] sm:$0xff]  ;;  %v466_v8 = vld [vmem:[%s8687_s7 + $0x140] sm:$0xff] }
  0xb0   :  { %413 = vst [vmem:[#allocation3 + $0x68] sm:$0xff] %v412_v45  ;;  %v468_v9 = vld [vmem:[%s8687_s7 + $0x148] sm:$0xff]  ;;  %v470_v10 = vld [vmem:[%s8687_s7 + $0x150] sm:$0xff]  ;;  %v472_v11 = vld [vmem:[%s8687_s7 + $0x158] sm:$0xff] }
  0xb1   :  { %415 = vst [vmem:[#allocation3 + $0x70] sm:$0xff] %v414_v46  ;;  %v474_v12 = vld [vmem:[%s8687_s7 + $0x160] sm:$0xff]  ;;  %v476_v13 = vld [vmem:[%s8687_s7 + $0x168] sm:$0xff]  ;;  %v478_v14 = vld [vmem:[%s8687_s7 + $0x170] sm:$0xff] }
  0xb2   :  { %417 = vst [vmem:[#allocation3 + $0x78] sm:$0xff] %v416_v47  ;;  %v480_v15 = vld [vmem:[%s8687_s7 + $0x178] sm:$0xff]  ;;  %v482_v16 = vld [vmem:[%s8687_s7 + $0x180] sm:$0xff]  ;;  %v484_v17 = vld [vmem:[%s8687_s7 + $0x188] sm:$0xff] }
  0xb3   :  { %419 = vst [vmem:[#allocation3 + $0x80] sm:$0xff] %v418_v48  ;;  %v486_v18 = vld [vmem:[%s8687_s7 + $0x190] sm:$0xff]  ;;  %v488_v19 = vld [vmem:[%s8687_s7 + $0x198] sm:$0xff]  ;;  %v490_v20 = vld [vmem:[%s8687_s7 + $0x1a0] sm:$0xff] }
  0xb4   :  { %421 = vst [vmem:[#allocation3 + $0x88] sm:$0xff] %v420_v49  ;;  %v492_v21 = vld [vmem:[%s8687_s7 + $0x1a8] sm:$0xff]  ;;  %v494_v22 = vld [vmem:[%s8687_s7 + $0x1b0] sm:$0xff]  ;;  %v496_v23 = vld [vmem:[%s8687_s7 + $0x1b8] sm:$0xff] }
  0xb5   :  { %423 = vst [vmem:[#allocation3 + $0x90] sm:$0xff] %v422_v50  ;;  %v498_v24 = vld [vmem:[%s8687_s7 + $0x1c0] sm:$0xff]  ;;  %v500_v25 = vld [vmem:[%s8687_s7 + $0x1c8] sm:$0xff]  ;;  %v502_v26 = vld [vmem:[%s8687_s7 + $0x1d0] sm:$0xff] }
  0xb6   :  { %425 = vst [vmem:[#allocation3 + $0x98] sm:$0xff] %v424_v51  ;;  %v504_v27 = vld [vmem:[%s8687_s7 + $0x1d8] sm:$0xff]  ;;  %v506_v28 = vld [vmem:[%s8687_s7 + $0x1e0] sm:$0xff]  ;;  %v508_v29 = vld [vmem:[%s8687_s7 + $0x1e8] sm:$0xff] }
  0xb7   :  { %427 = vst [vmem:[#allocation3 + $0xa0] sm:$0xff] %v426_v52  ;;  %v510_v30 = vld [vmem:[%s8687_s7 + $0x1f0] sm:$0xff]  ;;  %v512_v31 = vld [vmem:[%s8687_s7 + $0x1f8] sm:$0xff]  ;;  %v514_v32 = vld [vmem:[%s8687_s7 + $0x200] sm:$0xff] }
  0xb8   :  { %429 = vst [vmem:[#allocation3 + $0xa8] sm:$0xff] %v428_v53  ;;  %v516_v33 = vld [vmem:[%s8687_s7 + $0x208] sm:$0xff]  ;;  %v518_v34 = vld [vmem:[%s8687_s7 + $0x210] sm:$0xff]  ;;  %v520_v35 = vld [vmem:[%s8687_s7 + $0x218] sm:$0xff] }
  0xb9   :  { %431 = vst [vmem:[#allocation3 + $0xb0] sm:$0xff] %v430_v54  ;;  %v522_v36 = vld [vmem:[%s8687_s7 + $0x220] sm:$0xff]  ;;  %v524_v37 = vld [vmem:[%s8687_s7 + $0x228] sm:$0xff]  ;;  %v526_v38 = vld [vmem:[%s8687_s7 + $0x230] sm:$0xff] }
  0xba   :  { %433 = vst [vmem:[#allocation3 + $0xb8] sm:$0xff] %v432_v55  ;;  %v528_v39 = vld [vmem:[%s8687_s7 + $0x238] sm:$0xff]  ;;  %v530_v40 = vld [vmem:[%s8687_s7 + $0x240] sm:$0xff]  ;;  %v532_v41 = vld [vmem:[%s8687_s7 + $0x248] sm:$0xff] }
  0xbb   :  { %435 = vst [vmem:[#allocation3 + $0xc0] sm:$0xff] %v434_v56  ;;  %v534_v42 = vld [vmem:[%s8687_s7 + $0x250] sm:$0xff]  ;;  %v536_v43 = vld [vmem:[%s8687_s7 + $0x258] sm:$0xff]  ;;  %v538_v44 = vld [vmem:[%s8687_s7 + $0x260] sm:$0xff] }
  0xbc   :  { %437 = vst [vmem:[#allocation3 + $0xc8] sm:$0xff] %v436_v57  ;;  %v540_v45 = vld [vmem:[%s8687_s7 + $0x268] sm:$0xff]  ;;  %v542_v46 = vld [vmem:[%s8687_s7 + $0x270] sm:$0xff]  ;;  %v544_v47 = vld [vmem:[%s8687_s7 + $0x278] sm:$0xff] }
  0xbd   :  { %439 = vst [vmem:[#allocation3 + $0xd0] sm:$0xff] %v438_v58  ;;  %v546_v48 = vld [vmem:[%s8687_s7 + $0x280] sm:$0xff]  ;;  %v548_v49 = vld [vmem:[%s8687_s7 + $0x288] sm:$0xff]  ;;  %v550_v50 = vld [vmem:[%s8687_s7 + $0x290] sm:$0xff] }
  0xbe   :  { %441 = vst [vmem:[#allocation3 + $0xd8] sm:$0xff] %v440_v59  ;;  %v552_v51 = vld [vmem:[%s8687_s7 + $0x298] sm:$0xff]  ;;  %v554_v52 = vld [vmem:[%s8687_s7 + $0x2a0] sm:$0xff]  ;;  %v556_v53 = vld [vmem:[%s8687_s7 + $0x2a8] sm:$0xff] }
  0xbf   :  { %443 = vst [vmem:[#allocation3 + $0xe0] sm:$0xff] %v442_v60  ;;  %v558_v54 = vld [vmem:[%s8687_s7 + $0x2b0] sm:$0xff]  ;;  %v560_v55 = vld [vmem:[%s8687_s7 + $0x2b8] sm:$0xff]  ;;  %v562_v56 = vld [vmem:[%s8687_s7 + $0x2c0] sm:$0xff] }
  0xc0   :  { %445 = vst [vmem:[#allocation3 + $0xe8] sm:$0xff] %v444_v61  ;;  %v564_v57 = vld [vmem:[%s8687_s7 + $0x2c8] sm:$0xff]  ;;  %v566_v58 = vld [vmem:[%s8687_s7 + $0x2d0] sm:$0xff]  ;;  %v568_v59 = vld [vmem:[%s8687_s7 + $0x2d8] sm:$0xff] }
  0xc1   :  { %447 = vst [vmem:[#allocation3 + $0xf0] sm:$0xff] %v446_v62  ;;  %v570_v60 = vld [vmem:[%s8687_s7 + $0x2e0] sm:$0xff]  ;;  %v572_v61 = vld [vmem:[%s8687_s7 + $0x2e8] sm:$0xff]  ;;  %v574_v62 = vld [vmem:[%s8687_s7 + $0x2f0] sm:$0xff] }
  0xc2   :  { %449 = vst [vmem:[#allocation3 + $0xf8] sm:$0xff] %v448_v63  ;;  %v576_v63 = vld [vmem:[%s8687_s7 + $0x2f8] sm:$0xff] }
  0xc3   :  { %451 = vst [vmem:[#allocation3 + $0x100] sm:$0xff] %v450_v0  ;;  %v578_v0 = vld [vmem:[%s8687_s7 + $0x300] sm:$0xff] }
  0xc4   :  { %453 = vst [vmem:[#allocation3 + $0x108] sm:$0xff] %v452_v1  ;;  %v580_v1 = vld [vmem:[%s8687_s7 + $0x308] sm:$0xff] }
  0xc5   :  { %455 = vst [vmem:[#allocation3 + $0x110] sm:$0xff] %v454_v2  ;;  %v582_v2 = vld [vmem:[%s8687_s7 + $0x310] sm:$0xff] }
  0xc6   :  { %457 = vst [vmem:[#allocation3 + $0x118] sm:$0xff] %v456_v3  ;;  %v584_v3 = vld [vmem:[%s8687_s7 + $0x318] sm:$0xff] }
  0xc7   :  { %459 = vst [vmem:[#allocation3 + $0x120] sm:$0xff] %v458_v4  ;;  %v586_v4 = vld [vmem:[%s8687_s7 + $0x320] sm:$0xff] }
  0xc8   :  { %461 = vst [vmem:[#allocation3 + $0x128] sm:$0xff] %v460_v5  ;;  %v588_v5 = vld [vmem:[%s8687_s7 + $0x328] sm:$0xff] }
  0xc9   :  { %463 = vst [vmem:[#allocation3 + $0x130] sm:$0xff] %v462_v6  ;;  %v590_v6 = vld [vmem:[%s8687_s7 + $0x330] sm:$0xff] }
  0xca   :  { %465 = vst [vmem:[#allocation3 + $0x138] sm:$0xff] %v464_v7  ;;  %v592_v7 = vld [vmem:[%s8687_s7 + $0x338] sm:$0xff] }
  0xcb   :  { %467 = vst [vmem:[#allocation3 + $0x140] sm:$0xff] %v466_v8  ;;  %v594_v8 = vld [vmem:[%s8687_s7 + $0x340] sm:$0xff] }
  0xcc   :  { %469 = vst [vmem:[#allocation3 + $0x148] sm:$0xff] %v468_v9  ;;  %v596_v9 = vld [vmem:[%s8687_s7 + $0x348] sm:$0xff] }
  0xcd   :  { %471 = vst [vmem:[#allocation3 + $0x150] sm:$0xff] %v470_v10  ;;  %v598_v10 = vld [vmem:[%s8687_s7 + $0x350] sm:$0xff] }
  0xce   :  { %473 = vst [vmem:[#allocation3 + $0x158] sm:$0xff] %v472_v11  ;;  %v600_v11 = vld [vmem:[%s8687_s7 + $0x358] sm:$0xff] }
  0xcf   :  { %475 = vst [vmem:[#allocation3 + $0x160] sm:$0xff] %v474_v12  ;;  %v602_v12 = vld [vmem:[%s8687_s7 + $0x360] sm:$0xff] }
  0xd0   :  { %477 = vst [vmem:[#allocation3 + $0x168] sm:$0xff] %v476_v13  ;;  %v604_v13 = vld [vmem:[%s8687_s7 + $0x368] sm:$0xff] }
  0xd1   :  { %479 = vst [vmem:[#allocation3 + $0x170] sm:$0xff] %v478_v14  ;;  %v606_v14 = vld [vmem:[%s8687_s7 + $0x370] sm:$0xff] }
  0xd2   :  { %481 = vst [vmem:[#allocation3 + $0x178] sm:$0xff] %v480_v15  ;;  %v608_v15 = vld [vmem:[%s8687_s7 + $0x378] sm:$0xff] }
  0xd3   :  { %483 = vst [vmem:[#allocation3 + $0x180] sm:$0xff] %v482_v16  ;;  %v610_v16 = vld [vmem:[%s8687_s7 + $0x380] sm:$0xff] }
  0xd4   :  { %485 = vst [vmem:[#allocation3 + $0x188] sm:$0xff] %v484_v17  ;;  %v612_v17 = vld [vmem:[%s8687_s7 + $0x388] sm:$0xff] }
  0xd5   :  { %487 = vst [vmem:[#allocation3 + $0x190] sm:$0xff] %v486_v18  ;;  %v614_v18 = vld [vmem:[%s8687_s7 + $0x390] sm:$0xff] }
  0xd6   :  { %489 = vst [vmem:[#allocation3 + $0x198] sm:$0xff] %v488_v19  ;;  %v616_v19 = vld [vmem:[%s8687_s7 + $0x398] sm:$0xff] }
  0xd7   :  { %491 = vst [vmem:[#allocation3 + $0x1a0] sm:$0xff] %v490_v20  ;;  %v618_v20 = vld [vmem:[%s8687_s7 + $0x3a0] sm:$0xff] }
  0xd8   :  { %493 = vst [vmem:[#allocation3 + $0x1a8] sm:$0xff] %v492_v21  ;;  %v620_v21 = vld [vmem:[%s8687_s7 + $0x3a8] sm:$0xff] }
  0xd9   :  { %495 = vst [vmem:[#allocation3 + $0x1b0] sm:$0xff] %v494_v22  ;;  %v622_v22 = vld [vmem:[%s8687_s7 + $0x3b0] sm:$0xff] }
  0xda   :  { %497 = vst [vmem:[#allocation3 + $0x1b8] sm:$0xff] %v496_v23  ;;  %v624_v23 = vld [vmem:[%s8687_s7 + $0x3b8] sm:$0xff] }
  0xdb   :  { %499 = vst [vmem:[#allocation3 + $0x1c0] sm:$0xff] %v498_v24  ;;  %v626_v24 = vld [vmem:[%s8687_s7 + $0x3c0] sm:$0xff] }
  0xdc   :  { %501 = vst [vmem:[#allocation3 + $0x1c8] sm:$0xff] %v500_v25  ;;  %v628_v25 = vld [vmem:[%s8687_s7 + $0x3c8] sm:$0xff] }
  0xdd   :  { %503 = vst [vmem:[#allocation3 + $0x1d0] sm:$0xff] %v502_v26  ;;  %v630_v26 = vld [vmem:[%s8687_s7 + $0x3d0] sm:$0xff] }
  0xde   :  { %505 = vst [vmem:[#allocation3 + $0x1d8] sm:$0xff] %v504_v27  ;;  %v632_v27 = vld [vmem:[%s8687_s7 + $0x3d8] sm:$0xff] }
  0xdf   :  { %507 = vst [vmem:[#allocation3 + $0x1e0] sm:$0xff] %v506_v28  ;;  %v634_v28 = vld [vmem:[%s8687_s7 + $0x3e0] sm:$0xff] }
  0xe0   :  { %509 = vst [vmem:[#allocation3 + $0x1e8] sm:$0xff] %v508_v29  ;;  %v636_v29 = vld [vmem:[%s8687_s7 + $0x3e8] sm:$0xff] }
  0xe1   :  { %511 = vst [vmem:[#allocation3 + $0x1f0] sm:$0xff] %v510_v30  ;;  %v638_v30 = vld [vmem:[%s8687_s7 + $0x3f0] sm:$0xff] }
  0xe2   :  { %513 = vst [vmem:[#allocation3 + $0x1f8] sm:$0xff] %v512_v31  ;;  %v640_v31 = vld [vmem:[%s8687_s7 + $0x3f8] sm:$0xff] }
  0xe3   :  { %515 = vst [vmem:[#allocation3 + $0x200] sm:$0xff] %v514_v32  ;;  %v642_v32 = vld [vmem:[%s8687_s7 + $0x400] sm:$0xff] }
  0xe4   :  { %517 = vst [vmem:[#allocation3 + $0x208] sm:$0xff] %v516_v33  ;;  %v644_v33 = vld [vmem:[%s8687_s7 + $0x408] sm:$0xff] }
  0xe5   :  { %519 = vst [vmem:[#allocation3 + $0x210] sm:$0xff] %v518_v34  ;;  %v646_v34 = vld [vmem:[%s8687_s7 + $0x410] sm:$0xff] }
  0xe6   :  { %521 = vst [vmem:[#allocation3 + $0x218] sm:$0xff] %v520_v35  ;;  %v648_v35 = vld [vmem:[%s8687_s7 + $0x418] sm:$0xff] }
  0xe7   :  { %523 = vst [vmem:[#allocation3 + $0x220] sm:$0xff] %v522_v36  ;;  %v650_v36 = vld [vmem:[%s8687_s7 + $0x420] sm:$0xff] }
  0xe8   :  { %525 = vst [vmem:[#allocation3 + $0x228] sm:$0xff] %v524_v37  ;;  %v652_v37 = vld [vmem:[%s8687_s7 + $0x428] sm:$0xff] }
  0xe9   :  { %527 = vst [vmem:[#allocation3 + $0x230] sm:$0xff] %v526_v38  ;;  %v654_v38 = vld [vmem:[%s8687_s7 + $0x430] sm:$0xff] }
  0xea   :  { %529 = vst [vmem:[#allocation3 + $0x238] sm:$0xff] %v528_v39  ;;  %v656_v39 = vld [vmem:[%s8687_s7 + $0x438] sm:$0xff] }
  0xeb   :  { %531 = vst [vmem:[#allocation3 + $0x240] sm:$0xff] %v530_v40  ;;  %v658_v40 = vld [vmem:[%s8687_s7 + $0x440] sm:$0xff] }
  0xec   :  { %533 = vst [vmem:[#allocation3 + $0x248] sm:$0xff] %v532_v41  ;;  %v660_v41 = vld [vmem:[%s8687_s7 + $0x448] sm:$0xff] }
  0xed   :  { %535 = vst [vmem:[#allocation3 + $0x250] sm:$0xff] %v534_v42  ;;  %v662_v42 = vld [vmem:[%s8687_s7 + $0x450] sm:$0xff] }
  0xee   :  { %537 = vst [vmem:[#allocation3 + $0x258] sm:$0xff] %v536_v43  ;;  %v664_v43 = vld [vmem:[%s8687_s7 + $0x458] sm:$0xff] }
  0xef   :  { %539 = vst [vmem:[#allocation3 + $0x260] sm:$0xff] %v538_v44  ;;  %v666_v44 = vld [vmem:[%s8687_s7 + $0x460] sm:$0xff] }
  0xf0   :  { %541 = vst [vmem:[#allocation3 + $0x268] sm:$0xff] %v540_v45  ;;  %v668_v45 = vld [vmem:[%s8687_s7 + $0x468] sm:$0xff] }
  0xf1   :  { %543 = vst [vmem:[#allocation3 + $0x270] sm:$0xff] %v542_v46  ;;  %v670_v46 = vld [vmem:[%s8687_s7 + $0x470] sm:$0xff] }
  0xf2   :  { %545 = vst [vmem:[#allocation3 + $0x278] sm:$0xff] %v544_v47  ;;  %v672_v47 = vld [vmem:[%s8687_s7 + $0x478] sm:$0xff] }
  0xf3   :  { %547 = vst [vmem:[#allocation3 + $0x280] sm:$0xff] %v546_v48  ;;  %v674_v48 = vld [vmem:[%s8687_s7 + $0x480] sm:$0xff] }
  0xf4   :  { %549 = vst [vmem:[#allocation3 + $0x288] sm:$0xff] %v548_v49  ;;  %v676_v49 = vld [vmem:[%s8687_s7 + $0x488] sm:$0xff] }
  0xf5   :  { %551 = vst [vmem:[#allocation3 + $0x290] sm:$0xff] %v550_v50  ;;  %v678_v50 = vld [vmem:[%s8687_s7 + $0x490] sm:$0xff] }
  0xf6   :  { %553 = vst [vmem:[#allocation3 + $0x298] sm:$0xff] %v552_v51  ;;  %v680_v51 = vld [vmem:[%s8687_s7 + $0x498] sm:$0xff] }
  0xf7   :  { %555 = vst [vmem:[#allocation3 + $0x2a0] sm:$0xff] %v554_v52  ;;  %v682_v52 = vld [vmem:[%s8687_s7 + $0x4a0] sm:$0xff] }
  0xf8   :  { %557 = vst [vmem:[#allocation3 + $0x2a8] sm:$0xff] %v556_v53  ;;  %v684_v53 = vld [vmem:[%s8687_s7 + $0x4a8] sm:$0xff] }
  0xf9   :  { %559 = vst [vmem:[#allocation3 + $0x2b0] sm:$0xff] %v558_v54  ;;  %v686_v54 = vld [vmem:[%s8687_s7 + $0x4b0] sm:$0xff] }
  0xfa   :  { %561 = vst [vmem:[#allocation3 + $0x2b8] sm:$0xff] %v560_v55  ;;  %v688_v55 = vld [vmem:[%s8687_s7 + $0x4b8] sm:$0xff] }
  0xfb   :  { %563 = vst [vmem:[#allocation3 + $0x2c0] sm:$0xff] %v562_v56  ;;  %v690_v56 = vld [vmem:[%s8687_s7 + $0x4c0] sm:$0xff] }
  0xfc   :  { %565 = vst [vmem:[#allocation3 + $0x2c8] sm:$0xff] %v564_v57  ;;  %v692_v57 = vld [vmem:[%s8687_s7 + $0x4c8] sm:$0xff] }
  0xfd   :  { %567 = vst [vmem:[#allocation3 + $0x2d0] sm:$0xff] %v566_v58  ;;  %v694_v58 = vld [vmem:[%s8687_s7 + $0x4d0] sm:$0xff] }
  0xfe   :  { %569 = vst [vmem:[#allocation3 + $0x2d8] sm:$0xff] %v568_v59  ;;  %v696_v59 = vld [vmem:[%s8687_s7 + $0x4d8] sm:$0xff] }
  0xff   :  { %571 = vst [vmem:[#allocation3 + $0x2e0] sm:$0xff] %v570_v60  ;;  %v698_v60 = vld [vmem:[%s8687_s7 + $0x4e0] sm:$0xff] }
 0x100   :  { %573 = vst [vmem:[#allocation3 + $0x2e8] sm:$0xff] %v572_v61  ;;  %v700_v61 = vld [vmem:[%s8687_s7 + $0x4e8] sm:$0xff] }
 0x101   :  { %575 = vst [vmem:[#allocation3 + $0x2f0] sm:$0xff] %v574_v62  ;;  %v702_v62 = vld [vmem:[%s8687_s7 + $0x4f0] sm:$0xff] }
 0x102   :  { %577 = vst [vmem:[#allocation3 + $0x2f8] sm:$0xff] %v576_v63  ;;  %v704_v63 = vld [vmem:[%s8687_s7 + $0x4f8] sm:$0xff] }
 0x103   :  { %579 = vst [vmem:[#allocation3 + $0x300] sm:$0xff] %v578_v0  ;;  %v7647_v0 = vld [vmem:[%s8680_s0] sm:$0xff] }
 0x104   :  { %581 = vst [vmem:[#allocation3 + $0x308] sm:$0xff] %v580_v1  ;;  %v7652_v1 = vld [vmem:[%s8680_s0 + $0x8] sm:$0xff] }
 0x105   :  { %583 = vst [vmem:[#allocation3 + $0x310] sm:$0xff] %v582_v2  ;;  %v7657_v2 = vld [vmem:[%s8680_s0 + $0x10] sm:$0xff] }
 0x106   :  { %585 = vst [vmem:[#allocation3 + $0x318] sm:$0xff] %v584_v3  ;;  %v745_v3 = vlaneseq }
 0x107   :  { %587 = vst [vmem:[#allocation3 + $0x320] sm:$0xff] %v586_v4  ;;  %v6538_v4 = vpack.i.bf16 %v7652_v1, %v7647_v0 }
 0x108   :  { %589 = vst [vmem:[#allocation3 + $0x328] sm:$0xff] %v588_v5  ;;  %v7664_v5 = vld [vmem:[%s8680_s0 + $0x18] sm:$0xff] }
 0x109   :  { %591 = vst [vmem:[#allocation3 + $0x330] sm:$0xff] %v590_v6  ;;  %v766_v6 = vrot.slane %v7647_v0, 1 }
 0x10a   :  { %593 = vst [vmem:[#allocation3 + $0x338] sm:$0xff] %v592_v7  ;;  %v768_v7 = vrot.slane %v7652_v1, 1 }
 0x10b   :  { %595 = vst [vmem:[#allocation3 + $0x340] sm:$0xff] %v594_v8 }
 0x10c   :  { %597 = vst [vmem:[#allocation3 + $0x348] sm:$0xff] %v596_v9 }
 0x10d   :  { %599 = vst [vmem:[#allocation3 + $0x350] sm:$0xff] %v598_v10 }
 0x10e   :  { %601 = vst [vmem:[#allocation3 + $0x358] sm:$0xff] %v600_v11 }
 0x10f   :  { %603 = vst [vmem:[#allocation3 + $0x360] sm:$0xff] %v602_v12 }
 0x110   :  { %605 = vst [vmem:[#allocation3 + $0x368] sm:$0xff] %v604_v13 }
 0x111   :  { %607 = vst [vmem:[#allocation3 + $0x370] sm:$0xff] %v606_v14 }
 0x112   :  { %609 = vst [vmem:[#allocation3 + $0x378] sm:$0xff] %v608_v15 }
 0x113   :  { %611 = vst [vmem:[#allocation3 + $0x380] sm:$0xff] %v610_v16 }
 0x114   :  { %613 = vst [vmem:[#allocation3 + $0x388] sm:$0xff] %v612_v17 }
 0x115   :  { %615 = vst [vmem:[#allocation3 + $0x390] sm:$0xff] %v614_v18 }
 0x116   :  { %617 = vst [vmem:[#allocation3 + $0x398] sm:$0xff] %v616_v19 }
 0x117   :  { %619 = vst [vmem:[#allocation3 + $0x3a0] sm:$0xff] %v618_v20 }
 0x118   :  { %621 = vst [vmem:[#allocation3 + $0x3a8] sm:$0xff] %v620_v21 }
 0x119   :  { %623 = vst [vmem:[#allocation3 + $0x3b0] sm:$0xff] %v622_v22 }
 0x11a   :  { %625 = vst [vmem:[#allocation3 + $0x3b8] sm:$0xff] %v624_v23 }
 0x11b   :  { %627 = vst [vmem:[#allocation3 + $0x3c0] sm:$0xff] %v626_v24 }
 0x11c   :  { %629 = vst [vmem:[#allocation3 + $0x3c8] sm:$0xff] %v628_v25 }
 0x11d   :  { %631 = vst [vmem:[#allocation3 + $0x3d0] sm:$0xff] %v630_v26 }
 0x11e   :  { %633 = vst [vmem:[#allocation3 + $0x3d8] sm:$0xff] %v632_v27 }
 0x11f   :  { %635 = vst [vmem:[#allocation3 + $0x3e0] sm:$0xff] %v634_v28 }
 0x120   :  { %637 = vst [vmem:[#allocation3 + $0x3e8] sm:$0xff] %v636_v29 }
 0x121   :  { %639 = vst [vmem:[#allocation3 + $0x3f0] sm:$0xff] %v638_v30 }
 0x122   :  { %641 = vst [vmem:[#allocation3 + $0x3f8] sm:$0xff] %v640_v31 }
 0x123   :  { %643 = vst [vmem:[#allocation3 + $0x400] sm:$0xff] %v642_v32 }
 0x124   :  { %645 = vst [vmem:[#allocation3 + $0x408] sm:$0xff] %v644_v33 }
 0x125   :  { %647 = vst [vmem:[#allocation3 + $0x410] sm:$0xff] %v646_v34 }
 0x126   :  { %649 = vst [vmem:[#allocation3 + $0x418] sm:$0xff] %v648_v35 }
 0x127   :  { %651 = vst [vmem:[#allocation3 + $0x420] sm:$0xff] %v650_v36 }
 0x128   :  { %653 = vst [vmem:[#allocation3 + $0x428] sm:$0xff] %v652_v37 }
 0x129   :  { %655 = vst [vmem:[#allocation3 + $0x430] sm:$0xff] %v654_v38 }
 0x12a   :  { %657 = vst [vmem:[#allocation3 + $0x438] sm:$0xff] %v656_v39 }
 0x12b   :  { %659 = vst [vmem:[#allocation3 + $0x440] sm:$0xff] %v658_v40 }
 0x12c   :  { %661 = vst [vmem:[#allocation3 + $0x448] sm:$0xff] %v660_v41 }
 0x12d   :  { %663 = vst [vmem:[#allocation3 + $0x450] sm:$0xff] %v662_v42 }
 0x12e   :  { %665 = vst [vmem:[#allocation3 + $0x458] sm:$0xff] %v664_v43 }
 0x12f   :  { %667 = vst [vmem:[#allocation3 + $0x460] sm:$0xff] %v666_v44 }
 0x130   :  { %669 = vst [vmem:[#allocation3 + $0x468] sm:$0xff] %v668_v45 }
 0x131   :  { %671 = vst [vmem:[#allocation3 + $0x470] sm:$0xff] %v670_v46 }
 0x132   :  { %673 = vst [vmem:[#allocation3 + $0x478] sm:$0xff] %v672_v47 }
 0x133   :  { %675 = vst [vmem:[#allocation3 + $0x480] sm:$0xff] %v674_v48 }
 0x134   :  { %677 = vst [vmem:[#allocation3 + $0x488] sm:$0xff] %v676_v49 }
 0x135   :  { %679 = vst [vmem:[#allocation3 + $0x490] sm:$0xff] %v678_v50 }
 0x136   :  { %681 = vst [vmem:[#allocation3 + $0x498] sm:$0xff] %v680_v51 }
 0x137   :  { %683 = vst [vmem:[#allocation3 + $0x4a0] sm:$0xff] %v682_v52 }
 0x138   :  { %685 = vst [vmem:[#allocation3 + $0x4a8] sm:$0xff] %v684_v53 }
 0x139   :  { %687 = vst [vmem:[#allocation3 + $0x4b0] sm:$0xff] %v686_v54 }
 0x13a   :  { %689 = vst [vmem:[#allocation3 + $0x4b8] sm:$0xff] %v688_v55 }
 0x13b   :  { %691 = vst [vmem:[#allocation3 + $0x4c0] sm:$0xff] %v690_v56 }
 0x13c   :  { %693 = vst [vmem:[#allocation3 + $0x4c8] sm:$0xff] %v692_v57 }
 0x13d   :  { %695 = vst [vmem:[#allocation3 + $0x4d0] sm:$0xff] %v694_v58 }
 0x13e   :  { %697 = vst [vmem:[#allocation3 + $0x4d8] sm:$0xff] %v696_v59 }
 0x13f   :  { %699 = vst [vmem:[#allocation3 + $0x4e0] sm:$0xff] %v698_v60 }
 0x140   :  { %701 = vst [vmem:[#allocation3 + $0x4e8] sm:$0xff] %v700_v61 }
 0x141   :  { %703 = vst [vmem:[#allocation3 + $0x4f0] sm:$0xff] %v702_v62 }
 0x142   :  { %705 = vst [vmem:[#allocation3 + $0x4f8] sm:$0xff] %v704_v63 }
 0x143   :  { %711 = vsyncadd [#allocation4 + $0x1], 20480  ;;  %v6548_v8 = vpack.i.bf16 %v7664_v5, %v7657_v2  ;;  %v7671_v9 = vshrl.u32 %v745_v3, 7  ;;  %v750_v10 = vperm.slane %v7652_v1, 7  ;;  %v767_v11 = vrot.slane %v7657_v2, 1  ;;  %v742_v13 = vld [vmem:[%s8681_s1 + $0xd0] sm:$0xff] }
 0x144   :  { %v4764_v12 = vld [vmem:[%s8681_s1 + $0x70] sm:$0xf]  ;;  %s6613_s24 = smov 72   ;;  %v751_v14 = vperm.slane %v7664_v5, 7  ;;  %v769_v15 = vrot.slane %v7664_v5, 1  ;;  %v906_v18 = vunpack.c.l.b16 %v742_v13  ;;  %v907_v23 = vunpack.c.h.b16 %v742_v13  ;;  %s6614_s25 = smov 16  }
 0x145   :  { %6539 = vrot.lane.b32.xlu0 %v6538_v4, %s6613_s24  ;;  %v6185_v16 = vld [vmem:[%s8681_s1 + $0x74] sm:$0xf0]  ;;  %v6184_v17 = vld [vmem:[%s8681_s1 + $0x74] sm:$0xf]  ;;  %6549 = vrot.lane.b32.xlu1 %v6548_v8, %s6613_s24  ;;  %v7690_v19 = vadd.s32 8, %v7671_v9  ;;  %vm770_vm0 = vcmp.lt.s32.totalorder %v7671_v9, 7 }
 0x146   :  { %v4765_v20 = vor.u32 %v6185_v16, %v4764_v12  ;;  %v4766_v21 = vld [vmem:[%s8681_s1 + $0x78] sm:$0xf0]  ;;  %v4756_v22 = vld [vmem:[%s8681_s1 + $0x60] sm:$0xf]  ;;  %v771_v24 = vsel %vm770_vm0, %v766_v6, %v768_v7  ;;  %v773_v25 = vsel %vm770_vm0, %v768_v7, %v766_v6  ;;  %v772_v26 = vsel %vm770_vm0, %v767_v11, %v769_v15  ;;  %v6183_v28 = vld [vmem:[%s8681_s1 + $0x64] sm:$0xf0] }
 0x147   :  { %v774_v27 = vsel %vm770_vm0, %v769_v15, %v767_v11  ;;  %v6182_v29 = vld [vmem:[%s8681_s1 + $0x64] sm:$0xf]  ;;  %v4758_v30 = vld [vmem:[%s8681_s1 + $0x68] sm:$0xf0]  ;;  %vm776_vm1 = vcmp.ge.s32.totalorder %v7690_v19, 15  ;;  %v4769_v31 = vor.u32 %v6184_v17, %v4766_v21  ;;  %v4757_v32 = vor.u32 %v6183_v28, %v4756_v22 }
 0x148   :  { %976 = vmatpush.bf16.msra.mxu0 %v4765_v20  ;;  %vm969_vm2 = vcmask 1043456   ;;  %v778_v33 = vsel %vm776_vm1, %v750_v10, %v773_v25  ;;  %v780_v34 = vsel %vm776_vm1, %v751_v14, %v774_v27  ;;  %v4748_v35 = vld [vmem:[%s8681_s1 + $0x50] sm:$0xf]  ;;  %v6181_v36 = vld [vmem:[%s8681_s1 + $0x54] sm:$0xf0]  ;;  %v934_v37 = vpack.c.b16 %v906_v18, %v906_v18 }
 0x149   :  { %v6543_v38 = vpack.i.bf16 %v778_v33, %v771_v24  ;;  %v6553_v39 = vpack.i.bf16 %v780_v34, %v772_v26  ;;  %1014 = vmatpush.bf16.msra.mxu2 %v4769_v31  ;;  %v4761_v40 = vor.u32 %v6182_v29, %v4758_v30  ;;  %v935_v41 = vpack.c.b16 %v907_v23, %v907_v23  ;;  %v6180_v42 = vld [vmem:[%s8681_s1 + $0x54] sm:$0xf]  ;;  %v4750_v43 = vld [vmem:[%s8681_s1 + $0x58] sm:$0xf0]  ;;  %v4740_v47 = vld [vmem:[%s8681_s1 + $0x40] sm:$0xf] }
 0x14a   :  { %v971_v44 = vsel %vm969_vm2, %v934_v37, 0  ;;  %v4749_v45 = vor.u32 %v6181_v36, %v4748_v35  ;;  %v6179_v48 = vld [vmem:[%s8681_s1 + $0x44] sm:$0xf0]  ;;  %v4804_v49 = vld [vmem:[%s8681_s1 + $0xc0] sm:$0xf]  ;;  %v4753_v50 = vor.u32 %v6180_v42, %v4750_v43  ;;  %vm756_vm3 = vcmp.lt.s32.totalorder %v7671_v9, 1 }
 0x14b   :  { %997 = vmatpush.bf16.msra.mxu1 %v971_v44  ;;  %v974_v46 = vsel %vm969_vm2, %v935_v41, 0  ;;  %v6178_v51 = vld [vmem:[%s8681_s1 + $0x44] sm:$0xf]  ;;  %v6195_v52 = vld [vmem:[%s8681_s1 + $0xc4] sm:$0xf0]  ;;  %v4741_v57 = vor.u32 %v6179_v48, %v4740_v47  ;;  %vm813_vm4 = vcmask 588800  }
 0x14c   :  { %977 = vmatpush.bf16.msra.mxu0 %v4757_v32  ;;  %1035 = vmatpush.bf16.msra.mxu3 %v974_v46  ;;  %v4742_v53 = vld [vmem:[%s8681_s1 + $0x48] sm:$0xf0]  ;;  %v4805_v54 = vor.u32 %v6195_v52, %v4804_v49  ;;  %v6194_v55 = vld [vmem:[%s8681_s1 + $0xc4] sm:$0xf]  ;;  %v4796_v59 = vld [vmem:[%s8681_s1 + $0xb0] sm:$0xf] }
 0x14d   :  { %6544 = vrot.lane.b32.xlu0 %v6543_v38, %s6614_s25  ;;  %6554 = vrot.lane.b32.xlu1 %v6553_v39, %s6614_s25  ;;  %v4806_v56 = vld [vmem:[%s8681_s1 + $0xc8] sm:$0xf0]  ;;  %v6193_v60 = vld [vmem:[%s8681_s1 + $0xb4] sm:$0xf0]  ;;  %v4745_v6 = vor.u32 %v6178_v51, %v4742_v53  ;;  %v752_v51 = vrot.slane %v7647_v0, 7  ;;  %v754_v52 = vrot.slane %v7652_v1, 7 }
 0x14e   :  { %1015 = vmatpush.bf16.msra.mxu2 %v4761_v40  ;;  %v4809_v58 = vor.u32 %v6194_v55, %v4806_v56  ;;  %v4732_v61 = vld [vmem:[%s8681_s1 + $0x30] sm:$0xf]  ;;  %v6177_v62 = vld [vmem:[%s8681_s1 + $0x34] sm:$0xf0]  ;;  %v4797_v63 = vor.u32 %v6193_v60, %v4796_v59  ;;  %v6192_v4 = vld [vmem:[%s8681_s1 + $0xb4] sm:$0xf] }
 0x14f   :  { %998 = vmatpush.bf16.msra.mxu1 %v4805_v54  ;;  %v4798_v7 = vld [vmem:[%s8681_s1 + $0xb8] sm:$0xf0]  ;;  %v6176_v8 = vld [vmem:[%s8681_s1 + $0x34] sm:$0xf]  ;;  %v4733_v12 = vor.u32 %v6177_v62, %v4732_v61  ;;  %v4724_v13 = vld [vmem:[%s8681_s1 + $0x20] sm:$0xf]  ;;  %v759_v54 = vsel %vm756_vm3, %v754_v52, %v752_v51  ;;  %v757_v56 = vsel %vm756_vm3, %v752_v51, %v754_v52 }
 0x150   :  { %978 = vmatpush.bf16.msra.mxu0 %v4749_v45  ;;  %1036 = vmatpush.bf16.msra.mxu3 %v4809_v58  ;;  %v4734_v10 = vld [vmem:[%s8681_s1 + $0x38] sm:$0xf0]  ;;  %v4801_v11 = vor.u32 %v6192_v4, %v4798_v7  ;;  %v6175_v14 = vld [vmem:[%s8681_s1 + $0x24] sm:$0xf0]  ;;  %v6174_v16 = vld [vmem:[%s8681_s1 + $0x24] sm:$0xf] }
 0x151   :  { %v4737_v15 = vor.u32 %v6176_v8, %v4734_v10  ;;  %v4726_v17 = vld [vmem:[%s8681_s1 + $0x28] sm:$0xf0]  ;;  %v4725_v18 = vor.u32 %v6175_v14, %v4724_v13  ;;  %v4716_v20 = vld [vmem:[%s8681_s1 + $0x10] sm:$0xf]  ;;  %v6173_v21 = vld [vmem:[%s8681_s1 + $0x14] sm:$0xf0] }
 0x152   :  { %1016 = vmatpush.bf16.msra.mxu2 %v4753_v50  ;;  %v4729_v22 = vor.u32 %v6174_v16, %v4726_v17  ;;  %v6172_v23 = vld [vmem:[%s8681_s1 + $0x14] sm:$0xf]  ;;  %v4718_v24 = vld [vmem:[%s8681_s1 + $0x18] sm:$0xf0]  ;;  %v4717_v25 = vor.u32 %v6173_v21, %v4716_v20  ;;  %v4708_v27 = vld [vmem:[%s8681_s1] sm:$0xf] }
 0x153   :  { %999 = vmatpush.bf16.msra.mxu1 %v4797_v63  ;;  %v4721_v26 = vor.u32 %v6172_v23, %v4718_v24  ;;  %v6171_v28 = vld [vmem:[%s8681_s1 + $0x4] sm:$0xf0]  ;;  %v4788_v29 = vld [vmem:[%s8681_s1 + $0xa0] sm:$0xf]  ;;  %v6170_v32 = vld [vmem:[%s8681_s1 + $0x4] sm:$0xf] }
 0x154   :  { %979 = vmatpush.bf16.msra.mxu0 %v4741_v57  ;;  %1037 = vmatpush.bf16.msra.mxu3 %v4801_v11  ;;  %v4709_v30 = vor.u32 %v6171_v28, %v4708_v27  ;;  %v6191_v31 = vld [vmem:[%s8681_s1 + $0xa4] sm:$0xf0]  ;;  %v4710_v33 = vld [vmem:[%s8681_s1 + $0x8] sm:$0xf0]  ;;  %v6190_v36 = vld [vmem:[%s8681_s1 + $0xa4] sm:$0xf] }
 0x155   :  { %v4789_v34 = vor.u32 %v6191_v31, %v4788_v29  ;;  %v4713_v35 = vor.u32 %v6170_v32, %v4710_v33  ;;  %v4790_v37 = vld [vmem:[%s8681_s1 + $0xa8] sm:$0xf0]  ;;  %v4780_v39 = vld [vmem:[%s8681_s1 + $0x90] sm:$0xf]  ;;  %v6189_v40 = vld [vmem:[%s8681_s1 + $0x94] sm:$0xf0] }
 0x156   :  { %1017 = vmatpush.bf16.msra.mxu2 %v4745_v6  ;;  %v4793_v38 = vor.u32 %v6190_v36, %v4790_v37  ;;  %v6188_v41 = vld [vmem:[%s8681_s1 + $0x94] sm:$0xf]  ;;  %v4781_v42 = vor.u32 %v6189_v40, %v4780_v39  ;;  %v4782_v43 = vld [vmem:[%s8681_s1 + $0x98] sm:$0xf0]  ;;  %v4772_v45 = vld [vmem:[%s8681_s1 + $0x80] sm:$0xf] }
 0x157   :  { %1000 = vmatpush.bf16.msra.mxu1 %v4789_v34  ;;  %v4785_v44 = vor.u32 %v6188_v41, %v4782_v43  ;;  %v6187_v46 = vld [vmem:[%s8681_s1 + $0x84] sm:$0xf0]  ;;  %v6186_v47 = vld [vmem:[%s8681_s1 + $0x84] sm:$0xf]  ;;  %v4774_v49 = vld [vmem:[%s8681_s1 + $0x88] sm:$0xf0] }
 0x158   :  { %980 = vmatpush.bf16.msra.mxu0 %v4733_v12  ;;  %1038 = vmatpush.bf16.msra.mxu3 %v4793_v38  ;;  %v4773_v48 = vor.u32 %v6187_v46, %v4772_v45  ;;  %v4777_v50 = vor.u32 %v6186_v47, %v4774_v49  ;;  %v748_v53 = vperm.slane %v7647_v0, 0  ;;  %v753_v0 = vrot.slane %v7657_v2, 7 }
 0x159   :  { %v755_v62 = vrot.slane %v7664_v5, 7  ;;  %vm818_vm5 = vcmask 130048   ;;  %v749_v6 = vperm.slane %v7657_v2, 0  ;;  %vm962_vm6 = vcmask 719872  }
 0x15a   :  { %1018 = vmatpush.bf16.msra.mxu2 %v4737_v15  ;;  %v762_v57 = vsel %vm756_vm3, %v748_v53, %v759_v54  ;;  %vm1129_vm12 = vcmask 1040384  }
 0x15b   :  { %1001 = vmatpush.bf16.msra.mxu1 %v4781_v42  ;;  %v760_v10 = vsel %vm756_vm3, %v755_v62, %v753_v0  ;;  %v758_v15 = vsel %vm756_vm3, %v753_v0, %v755_v62 }
 0x15c   :  { %981 = vmatpush.bf16.msra.mxu0 %v4725_v18  ;;  %1039 = vmatpush.bf16.msra.mxu3 %v4785_v44  ;;  %v764_v16 = vsel %vm756_vm3, %v749_v6, %v760_v10 }
 0x15e   :  { %1019 = vmatpush.bf16.msra.mxu2 %v4729_v22 }
 0x15f   :  { %1002 = vmatpush.bf16.msra.mxu1 %v4773_v48 }
 0x160   :  { %982 = vmatpush.bf16.msra.mxu0 %v4717_v25  ;;  %1040 = vmatpush.bf16.msra.mxu3 %v4777_v50 }
 0x162   :  { %1020 = vmatpush.bf16.msra.mxu2 %v4721_v26 }
 0x164   :  { %983 = vmatpush.bf16.msra.mxu0 %v4709_v30 }
 0x166   :  { %1021 = vmatpush.bf16.msra.mxu2 %v4713_v35 }
 0x1b7   :  { %v6540_v55 = vpop.permute.xlu0 %6539  ;;  %v6550_v63 = vpop.permute.xlu1 %6549 }
 0x1b8   :  { %v6542_v58 = vunpack.i.h.bf16 %v6540_v55  ;;  %v6541_v59 = vunpack.i.l.bf16 %v6540_v55  ;;  %v6552_v11 = vunpack.i.h.bf16 %v6550_v63  ;;  %v6551_v12 = vunpack.i.l.bf16 %v6550_v63 }
 0x1ba   :  { %v814_v60 = vsel %vm813_vm4, %v762_v57, %v6541_v59  ;;  %v815_v1 = vsel %vm813_vm4, %v757_v56, %v6542_v58  ;;  %v816_v2 = vsel %vm813_vm4, %v764_v16, %v6551_v12  ;;  %v817_v17 = vsel %vm813_vm4, %v758_v15, %v6552_v11 }
 0x1bb   :  { %v823_v61 = vpack.c.bf16 %v815_v1, %v814_v60  ;;  %v825_v20 = vpack.c.bf16 %v817_v17, %v816_v2 }
 0x1bd   :  { %984 = vmatmul.bf16.vlgmr.msra.gmra.mxu0 %v823_v61  ;;  %1022 = vmatmul.bf16.vlgmr.msra.gmra.mxu2 %v823_v61 }
 0x1bf   :  { %v6545_v4 = vpop.permute.xlu0 %6544  ;;  %v6555_v18 = vpop.permute.xlu1 %6554 }
 0x1c0   :  { %v6547_v7 = vunpack.i.h.bf16 %v6545_v4  ;;  %v6546_v8 = vunpack.i.l.bf16 %v6545_v4  ;;  %v6557_v21 = vunpack.i.h.bf16 %v6555_v18  ;;  %v6556_v22 = vunpack.i.l.bf16 %v6555_v18 }
 0x1c2   :  { %v819_v13 = vsel %vm818_vm5, %v6541_v59, %v6546_v8  ;;  %v820_v14 = vsel %vm818_vm5, %v6542_v58, %v6547_v7  ;;  %v821_v23 = vsel %vm818_vm5, %v6551_v12, %v6556_v22  ;;  %v822_v24 = vsel %vm818_vm5, %v6552_v11, %v6557_v21 }
 0x1c3   :  { %v824_v5 = vpack.c.bf16 %v820_v14, %v819_v13  ;;  %v826_v25 = vpack.c.bf16 %v822_v24, %v821_v23 }
 0x1c5   :  { %4810 = vmatmul.msk.bf16.vlgmr.msra.gmra.mxu1 %vm962_vm6, %v824_v5  ;;  %4812 = vmatmul.msk.bf16.vlgmr.msra.gmra.mxu3 %vm962_vm6, %v824_v5 }
 0x1cd   :  { %989 = vmatmul.bf16.gmra.mxu0 %v825_v20  ;;  %1027 = vmatmul.bf16.gmra.mxu2 %v825_v20 }
 0x1d5   :  { %4811 = vmatmul.msk.bf16.gmra.mxu1 %vm962_vm6, %v826_v25  ;;  %4813 = vmatmul.msk.bf16.gmra.mxu3 %vm962_vm6, %v826_v25 }
 0x23a   :  { %v985_v26 = vpop.f32.mrf.mxu0 }
 0x240   :  { %v1023_v27 = vpop.f32.mrf.mxu2 }
 0x242   :  { %v1004_v28 = vpop.f32.mrf.mxu1  ;;  %v987_v29 = vpop.f32.mrf.mxu0 }
 0x243   :  { %v7888_v37 = vadd.f32 %v1004_v28, %v985_v26 }
 0x245   :  { %v1072_v43 = vmul.f32 %v7888_v37, %v7888_v37 }
 0x248   :  { %v1042_v30 = vpop.f32.mrf.mxu3  ;;  %v1025_v32 = vpop.f32.mrf.mxu2 }
 0x249   :  { %v7902_v46 = vadd.f32 %v1042_v30, %v1023_v27 }
 0x24a   :  { %v1006_v31 = vpop.f32.mrf.mxu1  ;;  %v990_v33 = vpop.f32.mrf.mxu0 }
 0x24b   :  { %v7886_v36 = vadd.f32 %v1006_v31, %v987_v29  ;;  %v1073_v57 = vmul.f32 %v7902_v46, %v7902_v46 }
 0x24d   :  { %v1074_v40 = vmul.f32 %v7886_v36, %v7886_v36  ;;  %v1052_v44 = vadd.f32 %v7886_v36, %v7888_v37 }
 0x24f   :  { %v1080_v50 = vadd.f32 %v1074_v40, %v1072_v43 }
 0x250   :  { %v1044_v34 = vpop.f32.mrf.mxu3  ;;  %v1028_v39 = vpop.f32.mrf.mxu2 }
 0x251   :  { %v7894_v41 = vadd.f32 %v1044_v34, %v1025_v32 }
 0x252   :  { %v1009_v35 = vpop.f32.mrf.mxu1  ;;  %v992_v47 = vpop.f32.mrf.mxu0 }
 0x253   :  { %v7890_v38 = vadd.f32 %v1009_v35, %v990_v33  ;;  %v1075_v53 = vmul.f32 %v7894_v41, %v7894_v41  ;;  %v1061_v59 = vadd.f32 %v7894_v41, %v7902_v46 }
 0x255   :  { %v1076_v45 = vmul.f32 %v7890_v38, %v7890_v38  ;;  %v1053_v51 = vadd.f32 %v1052_v44, %v7890_v38  ;;  %v1089_v61 = vadd.f32 %v1075_v53, %v1073_v57 }
 0x257   :  { %v1081_v54 = vadd.f32 %v1080_v50, %v1076_v45 }
 0x258   :  { %v1047_v42 = vpop.f32.mrf.mxu3  ;;  %v1030_v0 = vpop.f32.mrf.mxu2 }
 0x259   :  { %v7904_v48 = vadd.f32 %v1047_v42, %v1028_v39 }
 0x25a   :  { %v1011_v49 = vpop.f32.mrf.mxu1 }
 0x25b   :  { %v7907_v52 = vadd.f32 %v1011_v49, %v992_v47  ;;  %v1077_v58 = vmul.f32 %v7904_v48, %v7904_v48  ;;  %v1062_v63 = vadd.f32 %v1061_v59, %v7904_v48 }
 0x25d   :  { %v1054_v55 = vadd.f32 %v1053_v51, %v7907_v52  ;;  %v1078_v56 = vmul.f32 %v7907_v52, %v7907_v52  ;;  %v1090_v8 = vadd.f32 %v1089_v61, %v1077_v58 }
 0x25f   :  { %v1055_v60 = vrot.slane %v1054_v55, 4  ;;  %v1082_v1 = vadd.f32 %v1081_v54, %v1078_v56 }
 0x260   :  { %v1049_v62 = vpop.f32.mrf.mxu3 }
 0x261   :  { %v1056_v4 = vadd.f32 %v1055_v60, %v1054_v55  ;;  %v1083_v6 = vrot.slane %v1082_v1, 4  ;;  %v7921_v7 = vadd.f32 %v1049_v62, %v1030_v0  ;;  %v743_v0 = vld [vmem:[%s8682_s2] sm:$0x3] }
 0x263   :  { %v1057_v10 = vrot.slane %v1056_v4, 2  ;;  %v1084_v11 = vadd.f32 %v1083_v6, %v1082_v1  ;;  %v1063_v12 = vadd.f32 %v1062_v63, %v7921_v7  ;;  %v1079_v13 = vmul.f32 %v7921_v7, %v7921_v7 }
 0x265   :  { %v1058_v14 = vadd.f32 %v1057_v10, %v1056_v4  ;;  %v1085_v5 = vrot.slane %v1084_v11, 2  ;;  %v1064_v15 = vrot.slane %v1063_v12, 4  ;;  %v1091_v16 = vadd.f32 %v1090_v8, %v1079_v13 }
 0x267   :  { %v1059_v2 = vrot.slane %v1058_v14, 1  ;;  %v1086_v17 = vadd.f32 %v1085_v5, %v1084_v11  ;;  %v1065_v18 = vadd.f32 %v1064_v15, %v1063_v12  ;;  %v1092_v20 = vrot.slane %v1091_v16, 4  ;;  %v744_v12 = vld [vmem:[%s8683_s3] sm:$0x3] }
 0x269   :  { %v1060_v21 = vadd.f32 %v1059_v2, %v1058_v14  ;;  %v1087_v22 = vrot.slane %v1086_v17, 1  ;;  %v1066_v23 = vrot.slane %v1065_v18, 2  ;;  %v1093_v24 = vadd.f32 %v1092_v20, %v1091_v16 }
 0x26b   :  { %v1070_v25 = vmul.f32 0.03125, %v1060_v21  ;;  %v1088_v26 = vadd.f32 %v1087_v22, %v1086_v17  ;;  %v1067_v27 = vadd.f32 %v1066_v23, %v1065_v18  ;;  %v1094_v28 = vrot.slane %v1093_v24, 2 }
 0x26d   :  { %v1098_v29 = vmul.f32 0.03125, %v1088_v26  ;;  %v1100_v30 = vmul.f32 %v1070_v25, %v1070_v25  ;;  %v1068_v31 = vrot.slane %v1067_v27, 1  ;;  %v1095_v32 = vadd.f32 %v1094_v28, %v1093_v24 }
 0x26f   :  { %v1102_v33 = vsub.f32 %v1098_v29, %v1100_v30  ;;  %v1069_v34 = vadd.f32 %v1068_v31, %v1067_v27  ;;  %v1096_v35 = vrot.slane %v1095_v32, 1 }
 0x271   :  { %v1104_v39 = vadd.f32 1e-05, %v1102_v33  ;;  %v1071_v40 = vmul.f32 0.03125, %v1069_v34  ;;  %v1097_v42 = vadd.f32 %v1096_v35, %v1095_v32 }
 0x273   :  { %6558 = vrsqrt.f32 %v1104_v39  ;;  %v1099_v43 = vmul.f32 0.03125, %v1097_v42  ;;  %v1101_v44 = vmul.f32 %v1071_v40, %v1071_v40  ;;  %vm1112_vm11 = vweird.f32 %v1104_v39 }
 0x275   :  { %v1103_v45 = vsub.f32 %v1099_v43, %v1101_v44 }
 0x277   :  { %v1105_v47 = vadd.f32 1e-05, %v1103_v45 }
 0x279   :  { %v6559_v49 = vpop.eup %6558  ;;  %6560 = vrsqrt.f32 %v1105_v47  ;;  %vm1122_vm9 = vweird.f32 %v1105_v47 }
 0x27a   :  { %v1107_v50 = vmul.f32 %v6559_v49, %v1104_v39  ;;  %vm1113_vm8 = vweird.f32 %v6559_v49 }
 0x27b   :  { %vm1114_vm13 = vmor %vm1112_vm11, %vm1113_vm8 }
 0x27c   :  { %v1108_v51 = vmul.f32 %v6559_v49, %v1107_v50 }
 0x27e   :  { %v1109_v54 = vmul.f32 0.5, %v1108_v51 }
 0x27f   :  { %v6561_v53 = vpop.eup %6560 }
 0x280   :  { %v1117_v55 = vmul.f32 %v6561_v53, %v1105_v47  ;;  %v1110_v57 = vsub.f32 1.5, %v1109_v54  ;;  %vm1123_vm7 = vweird.f32 %v6561_v53 }
 0x281   :  { %vm1124_vm10 = vmor %vm1122_vm9, %vm1123_vm7 }
 0x282   :  { %v1118_v56 = vmul.f32 %v6561_v53, %v1117_v55  ;;  %v1111_v60 = vmul.f32 %v6559_v49, %v1110_v57 }
 0x284   :  { %v1119_v58 = vmul.f32 0.5, %v1118_v56  ;;  %v1115_v63 = vsel %vm1114_vm13, %v6559_v49, %v1111_v60 }
 0x286   :  { %v1120_v59 = vsub.f32 1.5, %v1119_v58 }
 0x288   :  { %v1121_v1 = vmul.f32 %v6561_v53, %v1120_v59 }
 0x28a   :  { %v1125_v61 = vsel %vm1124_vm10, %v6561_v53, %v1121_v1 }
 0x28b   :  { %v1128_v62 = vrot.slane %v1125_v61, 7 }
 0x28d   :  { %v1130_v4 = vsel %vm1129_vm12, %v1115_v63, %v1128_v62 }
 0x28e   :  { %v1132_v6 = vmul.f32 %v1130_v4, %v743_v0 }
 0x290   :  { %v1134_v8 = vperm.slane %v1132_v6, 0  ;;  %v1135_v10 = vperm.slane %v1132_v6, 1 }
 0x292   :  { %v1139_v11 = vmul.f32 %v1135_v10, %v1071_v40  ;;  %v1138_v13 = vmul.f32 %v1134_v8, %v1070_v25  ;;  %v1146_v16 = vmul.f32 %v1134_v8, %v7888_v37  ;;  %v1147_v2 = vmul.f32 %v1135_v10, %v7902_v46 }
 0x293   :  { %v1148_v17 = vmul.f32 %v1134_v8, %v7886_v36  ;;  %v1149_v18 = vmul.f32 %v1135_v10, %v7894_v41  ;;  %v1150_v22 = vmul.f32 %v1134_v8, %v7890_v38  ;;  %v1151_v23 = vmul.f32 %v1135_v10, %v7904_v48 }
 0x294   :  { %v1142_v14 = vrot.slane %v1139_v11, 7  ;;  %v1152_v24 = vmul.f32 %v1134_v8, %v7907_v52  ;;  %v1153_v25 = vmul.f32 %v1135_v10, %v7921_v7 }
 0x296   :  { %v1143_v5 = vsel %vm1129_vm12, %v1138_v13, %v1142_v14 }
 0x297   :  { %v1145_v15 = vsub.f32 %v744_v12, %v1143_v5 }
 0x299   :  { %v1155_v20 = vperm.slane %v1145_v15, 0  ;;  %v1156_v21 = vperm.slane %v1145_v15, 1 }
 0x29b   :  { %v1159_v26 = vadd.f32 %v1155_v20, %v1146_v16  ;;  %v1160_v27 = vadd.f32 %v1156_v21, %v1147_v2  ;;  %v1161_v28 = vadd.f32 %v1155_v20, %v1148_v17  ;;  %v1162_v37 = vadd.f32 %v1156_v21, %v1149_v18 }
 0x29c   :  { %v1163_v29 = vadd.f32 %v1155_v20, %v1150_v22  ;;  %v1164_v46 = vadd.f32 %v1156_v21, %v1151_v23  ;;  %v1165_v30 = vadd.f32 %v1155_v20, %v1152_v24  ;;  %v1166_v36 = vadd.f32 %v1156_v21, %v1153_v25 }
 0x29d   :  { %v7942_v31 = vmax.f32 %v1159_v26, 0.0  ;;  %v7944_v41 = vmax.f32 %v1160_v27, 0.0  ;;  %v7946_v32 = vmax.f32 %v1161_v28, 0.0  ;;  %v7948_v38 = vmax.f32 %v1162_v37, 0.0 }
 0x29e   :  { %v7950_v48 = vmax.f32 %v1163_v29, 0.0  ;;  %v7952_v52 = vmax.f32 %v1164_v46, 0.0  ;;  %v7954_v7 = vmax.f32 %v1165_v30, 0.0  ;;  %v7956_v33 = vmax.f32 %v1166_v36, 0.0 }
 0x29f   :  { %6607 = dma.done.wait [#allocation4], 20480 }
 0x2a0   :  { %6608 = vsyncadd [#allocation4], 4294946816  ;;  %v4872_v34 = vld [vmem:[#allocation2 + $0x70] sm:$0xf]  ;;  %v6211_v35 = vld [vmem:[#allocation2 + $0x74] sm:$0xf0] }
 0x2a1   :  { %v4936_v39 = vld [vmem:[#allocation2 + $0xf0] sm:$0xf]  ;;  %v4873_v40 = vor.u32 %v6211_v35, %v4872_v34  ;;  %v6227_v42 = vld [vmem:[#allocation2 + $0xf4] sm:$0xf0]  ;;  %v4864_v51 = vld [vmem:[#allocation2 + $0x60] sm:$0xf] }
 0x2a2   :  { %v5000_v43 = vld [vmem:[#allocation2 + $0x170] sm:$0xf]  ;;  %v6243_v44 = vld [vmem:[#allocation2 + $0x174] sm:$0xf0]  ;;  %v4937_v45 = vor.u32 %v6227_v42, %v4936_v39  ;;  %v6209_v54 = vld [vmem:[#allocation2 + $0x64] sm:$0xf0] }
 0x2a3   :  { %v5001_v47 = vor.u32 %v6243_v44, %v5000_v43  ;;  %v5064_v49 = vld [vmem:[#allocation2 + $0x1f0] sm:$0xf]  ;;  %v6259_v50 = vld [vmem:[#allocation2 + $0x1f4] sm:$0xf0]  ;;  %2270 = vmatpush.bf16.msrb.mxu1 %v4873_v40  ;;  %v4928_v55 = vld [vmem:[#allocation2 + $0xe0] sm:$0xf]  ;;  %v4865_v57 = vor.u32 %v6209_v54, %v4864_v51 }
 0x2a4   :  { %v5065_v53 = vor.u32 %v6259_v50, %v5064_v49  ;;  %v6225_v56 = vld [vmem:[#allocation2 + $0xe4] sm:$0xf0]  ;;  %2289 = vmatpush.bf16.msrb.mxu3 %v4937_v45  ;;  %v4992_v59 = vld [vmem:[#allocation2 + $0x160] sm:$0xf]  ;;  %v4856_v62 = vld [vmem:[#allocation2 + $0x50] sm:$0xf] }
 0x2a5   :  { %2308 = vmatpush.bf16.msrb.mxu0 %v5001_v47  ;;  %v4929_v58 = vor.u32 %v6225_v56, %v4928_v55  ;;  %v6241_v60 = vld [vmem:[#allocation2 + $0x164] sm:$0xf0]  ;;  %v5056_v1 = vld [vmem:[#allocation2 + $0x1e0] sm:$0xf]  ;;  %v6207_v63 = vld [vmem:[#allocation2 + $0x54] sm:$0xf0] }
 0x2a6   :  { %2327 = vmatpush.bf16.msrb.mxu2 %v5065_v53  ;;  %v4993_v61 = vor.u32 %v6241_v60, %v4992_v59  ;;  %v6257_v0 = vld [vmem:[#allocation2 + $0x1e4] sm:$0xf0]  ;;  %v4920_v6 = vld [vmem:[#allocation2 + $0xd0] sm:$0xf]  ;;  %v6223_v8 = vld [vmem:[#allocation2 + $0xd4] sm:$0xf0]  ;;  %v4857_v11 = vor.u32 %v6207_v63, %v4856_v62 }
 0x2a7   :  { %v5057_v4 = vor.u32 %v6257_v0, %v5056_v1  ;;  %v4984_v10 = vld [vmem:[#allocation2 + $0x150] sm:$0xf]  ;;  %2271 = vmatpush.bf16.msrb.mxu1 %v4865_v57  ;;  %v6239_v12 = vld [vmem:[#allocation2 + $0x154] sm:$0xf0]  ;;  %v4921_v5 = vor.u32 %v6223_v8, %v4920_v6  ;;  %v4848_v16 = vld [vmem:[#allocation2 + $0x40] sm:$0xf] }
 0x2a8   :  { %v5048_v13 = vld [vmem:[#allocation2 + $0x1d0] sm:$0xf]  ;;  %v6255_v14 = vld [vmem:[#allocation2 + $0x1d4] sm:$0xf0]  ;;  %2290 = vmatpush.bf16.msrb.mxu3 %v4929_v58  ;;  %v4985_v15 = vor.u32 %v6239_v12, %v4984_v10  ;;  %v6205_v2 = vld [vmem:[#allocation2 + $0x44] sm:$0xf0] }
 0x2a9   :  { %2309 = vmatpush.bf16.msrb.mxu0 %v4993_v61  ;;  %v4912_v17 = vld [vmem:[#allocation2 + $0xc0] sm:$0xf]  ;;  %v5049_v18 = vor.u32 %v6255_v14, %v5048_v13  ;;  %v6221_v20 = vld [vmem:[#allocation2 + $0xc4] sm:$0xf0]  ;;  %v4849_v25 = vor.u32 %v6205_v2, %v4848_v16  ;;  %v4840_v28 = vld [vmem:[#allocation2 + $0x30] sm:$0xf] }
 0x2aa   :  { %2328 = vmatpush.bf16.msrb.mxu2 %v5057_v4  ;;  %v4976_v21 = vld [vmem:[#allocation2 + $0x140] sm:$0xf]  ;;  %v6237_v22 = vld [vmem:[#allocation2 + $0x144] sm:$0xf0]  ;;  %v4913_v26 = vor.u32 %v6221_v20, %v4912_v17  ;;  %v6203_v37 = vld [vmem:[#allocation2 + $0x34] sm:$0xf0] }
 0x2ab   :  { %v5040_v23 = vld [vmem:[#allocation2 + $0x1c0] sm:$0xf]  ;;  %v6253_v24 = vld [vmem:[#allocation2 + $0x1c4] sm:$0xf0]  ;;  %2272 = vmatpush.bf16.msrb.mxu1 %v4857_v11  ;;  %v4977_v27 = vor.u32 %v6237_v22, %v4976_v21  ;;  %v4904_v29 = vld [vmem:[#allocation2 + $0xb0] sm:$0xf]  ;;  %v4841_v40 = vor.u32 %v6203_v37, %v4840_v28 }
 0x2ac   :  { %2291 = vmatpush.bf16.msrb.mxu3 %v4921_v5  ;;  %v5041_v46 = vor.u32 %v6253_v24, %v5040_v23  ;;  %v6219_v30 = vld [vmem:[#allocation2 + $0xb4] sm:$0xf0]  ;;  %v4968_v36 = vld [vmem:[#allocation2 + $0x130] sm:$0xf]  ;;  %v1349_v42 = vrot.slane %v7942_v31, 6  ;;  %v1353_v57 = vrot.slane %v7946_v32, 6 }
 0x2ad   :  { %2310 = vmatpush.bf16.msrb.mxu0 %v4985_v15  ;;  %v6235_v34 = vld [vmem:[#allocation2 + $0x134] sm:$0xf0]  ;;  %v5032_v35 = vld [vmem:[#allocation2 + $0x1b0] sm:$0xf]  ;;  %v4905_v43 = vor.u32 %v6219_v30, %v4904_v29  ;;  %v4832_v45 = vld [vmem:[#allocation2 + $0x20] sm:$0xf] }
 0x2ae   :  { %2329 = vmatpush.bf16.msrb.mxu2 %v5049_v18  ;;  %v6251_v39 = vld [vmem:[#allocation2 + $0x1b4] sm:$0xf0]  ;;  %v4969_v44 = vor.u32 %v6235_v34, %v4968_v36  ;;  %v6201_v47 = vld [vmem:[#allocation2 + $0x24] sm:$0xf0]  ;;  %v4896_v49 = vld [vmem:[#allocation2 + $0xa0] sm:$0xf] }
 0x2af   :  { %2273 = vmatpush.bf16.msrb.mxu1 %v4849_v25  ;;  %v5033_v50 = vor.u32 %v6251_v39, %v5032_v35  ;;  %v6217_v51 = vld [vmem:[#allocation2 + $0xa4] sm:$0xf0]  ;;  %v4960_v53 = vld [vmem:[#allocation2 + $0x120] sm:$0xf]  ;;  %v1350_v58 = vrot.slane %v7944_v41, 6  ;;  %v4833_v59 = vor.u32 %v6201_v47, %v4832_v45  ;;  %v1341_v1 = vperm.slane %v7942_v31, 0 }
 0x2b0   :  { %2292 = vmatpush.bf16.msrb.mxu3 %v4913_v26  ;;  %v6233_v54 = vld [vmem:[#allocation2 + $0x124] sm:$0xf0]  ;;  %v5024_v55 = vld [vmem:[#allocation2 + $0x1a0] sm:$0xf]  ;;  %v4824_v60 = vld [vmem:[#allocation2 + $0x10] sm:$0xf]  ;;  %v4897_v0 = vor.u32 %v6217_v51, %v4896_v49 }
 0x2b1   :  { %2311 = vmatpush.bf16.msrb.mxu0 %v4977_v27  ;;  %v6249_v56 = vld [vmem:[#allocation2 + $0x1a4] sm:$0xf0]  ;;  %vm1357_vm14 = vcmp.lt.s32.totalorder %v7671_v9, 2  ;;  %v1354_v61 = vrot.slane %v7948_v38, 6  ;;  %v4961_v62 = vor.u32 %v6233_v54, %v4960_v53  ;;  %v6199_v63 = vld [vmem:[#allocation2 + $0x14] sm:$0xf0] }
 0x2b2   :  { %2330 = vmatpush.bf16.msrb.mxu2 %v5041_v46  ;;  %v4888_v4 = vld [vmem:[#allocation2 + $0x90] sm:$0xf]  ;;  %v6215_v6 = vld [vmem:[#allocation2 + $0x94] sm:$0xf0]  ;;  %v5025_v8 = vor.u32 %v6249_v56, %v5024_v55  ;;  %v1375_v12 = vrot.slane %v7942_v31, 7  ;;  %v1379_v13 = vrot.slane %v7946_v32, 7  ;;  %v4825_v2 = vor.u32 %v6199_v63, %v4824_v60 }
 0x2b3   :  { %2274 = vmatpush.bf16.msrb.mxu1 %v4841_v40  ;;  %v4952_v10 = vld [vmem:[#allocation2 + $0x110] sm:$0xf]  ;;  %v6231_v11 = vld [vmem:[#allocation2 + $0x114] sm:$0xf0]  ;;  %v1376_v15 = vrot.slane %v7944_v41, 7  ;;  %v1380_v16 = vrot.slane %v7948_v38, 7  ;;  %v1362_v18 = vsel %vm1357_vm14, %v1353_v57, %v1349_v42  ;;  %v4889_v21 = vor.u32 %v6215_v6, %v4888_v4 }
 0x2b4   :  { %2293 = vmatpush.bf16.msrb.mxu3 %v4905_v43  ;;  %v5016_v14 = vld [vmem:[#allocation2 + $0x190] sm:$0xf]  ;;  %v6247_v5 = vld [vmem:[#allocation2 + $0x194] sm:$0xf0]  ;;  %v4816_v17 = vld [vmem:[#allocation2] sm:$0xf]  ;;  %v4953_v22 = vor.u32 %v6231_v11, %v4952_v10  ;;  %v1363_v26 = vsel %vm1357_vm14, %v1354_v61, %v1350_v58  ;;  %v1387_v46 = vsel %vm756_vm3, %v1379_v13, %v1375_v12  ;;  %v1358_v36 = vsel %vm1357_vm14, %v1349_v42, %v1353_v57 }
 0x2b5   :  { %2312 = vmatpush.bf16.msrb.mxu0 %v4969_v44  ;;  %v1342_v20 = vperm.slane %v7944_v41, 0  ;;  %v6197_v23 = vld [vmem:[#allocation2 + $0x4] sm:$0xf0]  ;;  %v4880_v24 = vld [vmem:[#allocation2 + $0x80] sm:$0xf]  ;;  %v5017_v27 = vor.u32 %v6247_v5, %v5016_v14  ;;  %v1367_v34 = vsel %vm1357_vm14, %v1341_v1, %v1362_v18  ;;  %v1388_v35 = vsel %vm756_vm3, %v1380_v16, %v1376_v15 }
 0x2b6   :  { %2331 = vmatpush.bf16.msrb.mxu2 %v5033_v50  ;;  %v6213_v25 = vld [vmem:[#allocation2 + $0x84] sm:$0xf0]  ;;  %v4944_v28 = vld [vmem:[#allocation2 + $0x100] sm:$0xf]  ;;  %v5192_v39 = vld [vmem:[#allocation2 + $0x2f0] sm:$0xf]  ;;  %v4817_v43 = vor.u32 %v6197_v23, %v4816_v17  ;;  %v1359_v45 = vsel %vm1357_vm14, %v1350_v58, %v1354_v61  ;;  %v1383_v51 = vsel %vm756_vm3, %v1375_v12, %v1379_v13  ;;  %v1391_v53 = vsel %vm756_vm3, %v1341_v1, %v1387_v46 }
 0x2b7   :  { %2275 = vmatpush.bf16.msrb.mxu1 %v4833_v59  ;;  %v6229_v37 = vld [vmem:[#allocation2 + $0x104] sm:$0xf0]  ;;  %v5008_v29 = vld [vmem:[#allocation2 + $0x180] sm:$0xf]  ;;  %v6291_v40 = vld [vmem:[#allocation2 + $0x2f4] sm:$0xf0]  ;;  %v4881_v44 = vor.u32 %v6213_v25, %v4880_v24  ;;  %v1368_v47 = vsel %vm1357_vm14, %v1342_v20, %v1363_v26  ;;  %v1384_v55 = vsel %vm756_vm3, %v1376_v15, %v1380_v16  ;;  %v1392_v56 = vsel %vm756_vm3, %v1342_v20, %v1388_v35 }
 0x2b8   :  { %2294 = vmatpush.bf16.msrb.mxu3 %v4897_v0  ;;  %v6245_v30 = vld [vmem:[#allocation2 + $0x184] sm:$0xf0]  ;;  %v5256_v49 = vld [vmem:[#allocation2 + $0x370] sm:$0xf]  ;;  %v6307_v50 = vld [vmem:[#allocation2 + $0x374] sm:$0xf0]  ;;  %v4945_v42 = vor.u32 %v6229_v37, %v4944_v28  ;;  %v5193_v57 = vor.u32 %v6291_v40, %v5192_v39  ;;  %v7993_v61 = vpack.c.bf16 %v1358_v36, %v1367_v34  ;;  %v7995_v1 = vpack.c.bf16 %v1359_v45, %v1368_v47 }
 0x2b9   :  { %2313 = vmatpush.bf16.msrb.mxu0 %v4961_v62  ;;  %v5009_v54 = vor.u32 %v6245_v30, %v5008_v29  ;;  %v5128_v58 = vld [vmem:[#allocation2 + $0x270] sm:$0xf]  ;;  %v6275_v59 = vld [vmem:[#allocation2 + $0x274] sm:$0xf0]  ;;  %v5257_v0 = vor.u32 %v6307_v50, %v5256_v49  ;;  %v5184_v63 = vld [vmem:[#allocation2 + $0x2e0] sm:$0xf]  ;;  %v7997_v6 = vpack.c.bf16 %v1383_v51, %v1391_v53  ;;  %v7999_v11 = vpack.c.bf16 %v1384_v55, %v1392_v56 }
 0x2ba   :  { %2332 = vmatpush.bf16.msrb.mxu2 %v5025_v8  ;;  %v5320_v60 = vld [vmem:[#allocation2 + $0x3f0] sm:$0xf]  ;;  %v6323_v62 = vld [vmem:[#allocation2 + $0x3f4] sm:$0xf0]  ;;  %v6289_v4 = vld [vmem:[#allocation2 + $0x2e4] sm:$0xf0]  ;;  %v5129_v12 = vor.u32 %v6275_v59, %v5128_v58 }
 0x2bb   :  { %2276 = vmatpush.bf16.msrb.mxu1 %v4825_v2  ;;  %v5248_v8 = vld [vmem:[#allocation2 + $0x360] sm:$0xf]  ;;  %v6305_v10 = vld [vmem:[#allocation2 + $0x364] sm:$0xf0]  ;;  %v5321_v15 = vor.u32 %v6323_v62, %v5320_v60  ;;  %v5185_v16 = vor.u32 %v6289_v4, %v5184_v63  ;;  %v5176_v17 = vld [vmem:[#allocation2 + $0x2d0] sm:$0xf] }
 0x2bc   :  { %2295 = vmatpush.bf16.msrb.mxu3 %v4889_v21  ;;  %v5120_v13 = vld [vmem:[#allocation2 + $0x260] sm:$0xf]  ;;  %v6273_v14 = vld [vmem:[#allocation2 + $0x264] sm:$0xf0]  ;;  %v6287_v18 = vld [vmem:[#allocation2 + $0x2d4] sm:$0xf0]  ;;  %v5249_v20 = vor.u32 %v6305_v10, %v5248_v8 }
 0x2bd   :  { %2314 = vmatpush.bf16.msrb.mxu0 %v4953_v22  ;;  %v5312_v5 = vld [vmem:[#allocation2 + $0x3e0] sm:$0xf]  ;;  %v6321_v2 = vld [vmem:[#allocation2 + $0x3e4] sm:$0xf0]  ;;  %v5121_v21 = vor.u32 %v6273_v14, %v5120_v13  ;;  %v5112_v22 = vld [vmem:[#allocation2 + $0x250] sm:$0xf]  ;;  %v5177_v28 = vor.u32 %v6287_v18, %v5176_v17 }
 0x2be   :  { %2333 = vmatpush.bf16.msrb.mxu2 %v5017_v27  ;;  %v6271_v23 = vld [vmem:[#allocation2 + $0x254] sm:$0xf0]  ;;  %v5240_v24 = vld [vmem:[#allocation2 + $0x350] sm:$0xf]  ;;  %v5313_v27 = vor.u32 %v6321_v2, %v5312_v5  ;;  %v5168_v29 = vld [vmem:[#allocation2 + $0x2c0] sm:$0xf] }
 0x2bf   :  { %2277 = vmatpush.bf16.msrb.mxu1 %v4817_v43  ;;  %v6303_v25 = vld [vmem:[#allocation2 + $0x354] sm:$0xf0]  ;;  %v5304_v26 = vld [vmem:[#allocation2 + $0x3d0] sm:$0xf]  ;;  %v1351_v46 = vrot.slane %v7950_v48, 6  ;;  %v1355_v30 = vrot.slane %v7954_v7, 6  ;;  %v5113_v53 = vor.u32 %v6271_v23, %v5112_v22 }
 0x2c0   :  { %2296 = vmatpush.bf16.msrb.mxu3 %v4881_v44  ;;  %v6319_v37 = vld [vmem:[#allocation2 + $0x3d4] sm:$0xf0]  ;;  %v6285_v36 = vld [vmem:[#allocation2 + $0x2c4] sm:$0xf0]  ;;  %v1352_v34 = vrot.slane %v7952_v52, 6  ;;  %v1356_v35 = vrot.slane %v7956_v33, 6  ;;  %v5241_v43 = vor.u32 %v6303_v25, %v5240_v24 }
 0x2c1   :  { %2315 = vmatpush.bf16.msrb.mxu0 %v4945_v42  ;;  %v1377_v39 = vrot.slane %v7950_v48, 7  ;;  %v1381_v40 = vrot.slane %v7954_v7, 7  ;;  %v5104_v44 = vld [vmem:[#allocation2 + $0x240] sm:$0xf]  ;;  %v6269_v45 = vld [vmem:[#allocation2 + $0x244] sm:$0xf0]  ;;  %v5169_v59 = vor.u32 %v6285_v36, %v5168_v29  ;;  %v1360_v13 = vsel %vm1357_vm14, %v1351_v46, %v1355_v30 }
 0x2c2   :  { %2334 = vmatpush.bf16.msrb.mxu2 %v5009_v54  ;;  %2278 = vmatmul.bf16.vlgmr.msrb.gmra.mxu1 %v7993_v61  ;;  %v1378_v47 = vrot.slane %v7952_v52, 7  ;;  %v1382_v49 = vrot.slane %v7956_v33, 7  ;;  %v5232_v50 = vld [vmem:[#allocation2 + $0x340] sm:$0xf]  ;;  %v6301_v42 = vld [vmem:[#allocation2 + $0x344] sm:$0xf0]  ;;  %v5305_v54 = vor.u32 %v6319_v37, %v5304_v26  ;;  %v1365_v60 = vsel %vm1357_vm14, %v1356_v35, %v1352_v34 }
 0x2c3   :  { %2297 = vmatmul.bf16.vlgmr.msrb.gmra.mxu3 %v7995_v1  ;;  %2346 = vmatpush.bf16.msra.mxu1 %v5129_v12  ;;  %v1343_v51 = vperm.slane %v7950_v48, 0  ;;  %v5296_v55 = vld [vmem:[#allocation2 + $0x3c0] sm:$0xf]  ;;  %v6317_v56 = vld [vmem:[#allocation2 + $0x3c4] sm:$0xf0]  ;;  %v1344_v58 = vperm.slane %v7952_v52, 0  ;;  %v5233_v62 = vor.u32 %v6301_v42, %v5232_v50  ;;  %v5105_v10 = vor.u32 %v6269_v45, %v5104_v44 }
 0x2c4   :  { %2365 = vmatpush.bf16.msra.mxu3 %v5193_v57  ;;  %2316 = vmatmul.bf16.vlgmr.msrb.gmra.mxu0 %v7997_v6  ;;  %v1364_v57 = vsel %vm1357_vm14, %v1355_v30, %v1351_v46  ;;  %v1390_v63 = vsel %vm756_vm3, %v1382_v49, %v1378_v47  ;;  %v5160_v4 = vld [vmem:[#allocation2 + $0x2b0] sm:$0xf]  ;;  %v6283_v8 = vld [vmem:[#allocation2 + $0x2b4] sm:$0xf0]  ;;  %v5297_v12 = vor.u32 %v6317_v56, %v5296_v55  ;;  %v5152_v37 = vld [vmem:[#allocation2 + $0x2a0] sm:$0xf] }
 0x2c5   :  { %2384 = vmatpush.bf16.msra.mxu0 %v5257_v0  ;;  %2335 = vmatmul.bf16.vlgmr.msrb.gmra.mxu2 %v7999_v11  ;;  %v1389_v0 = vsel %vm756_vm3, %v1381_v40, %v1377_v39  ;;  %v1371_v14 = vsel %vm1357_vm14, %v1343_v51, %v1364_v57  ;;  %v5224_v5 = vld [vmem:[#allocation2 + $0x330] sm:$0xf]  ;;  %v1372_v2 = vsel %vm1357_vm14, %v1344_v58, %v1365_v60  ;;  %v6267_v24 = vld [vmem:[#allocation2 + $0x234] sm:$0xf0]  ;;  %v6281_v29 = vld [vmem:[#allocation2 + $0x2a4] sm:$0xf0] }
 0x2c6   :  { %2403 = vmatpush.bf16.msra.mxu2 %v5321_v15  ;;  %v6299_v15 = vld [vmem:[#allocation2 + $0x334] sm:$0xf0]  ;;  %v1385_v17 = vsel %vm756_vm3, %v1377_v39, %v1381_v40  ;;  %v1395_v18 = vsel %vm756_vm3, %v1343_v51, %v1389_v0  ;;  %v5161_v22 = vor.u32 %v6283_v8, %v5160_v4  ;;  %v5096_v23 = vld [vmem:[#allocation2 + $0x230] sm:$0xf]  ;;  %v8039_v26 = vpack.c.bf16 %v1360_v13, %v1371_v14  ;;  %v5216_v36 = vld [vmem:[#allocation2 + $0x320] sm:$0xf] }
 0x2c7   :  { %2347 = vmatpush.bf16.msra.mxu1 %v5121_v21  ;;  %v1396_v21 = vsel %vm756_vm3, %v1344_v58, %v1390_v63  ;;  %v5288_v25 = vld [vmem:[#allocation2 + $0x3b0] sm:$0xf]  ;;  %v8043_v30 = vpack.c.bf16 %v1385_v17, %v1395_v18  ;;  %v5097_v39 = vor.u32 %v6267_v24, %v5096_v23  ;;  %v5088_v44 = vld [vmem:[#allocation2 + $0x220] sm:$0xf]  ;;  %v6265_v45 = vld [vmem:[#allocation2 + $0x224] sm:$0xf0] }
 0x2c8   :  { %2366 = vmatpush.bf16.msra.mxu3 %v5185_v16  ;;  %v1361_v16 = vsel %vm1357_vm14, %v1352_v34, %v1356_v35  ;;  %v6297_v34 = vld [vmem:[#allocation2 + $0x324] sm:$0xf0]  ;;  %v5144_v42 = vld [vmem:[#allocation2 + $0x290] sm:$0xf]  ;;  %v6279_v51 = vld [vmem:[#allocation2 + $0x294] sm:$0xf0]  ;;  %v5089_v55 = vor.u32 %v6265_v45, %v5088_v44 }
 0x2c9   :  { %2385 = vmatpush.bf16.msra.mxu0 %v5249_v20  ;;  %v1386_v20 = vsel %vm756_vm3, %v1378_v47, %v1382_v49  ;;  %v8041_v46 = vpack.c.bf16 %v1361_v16, %v1372_v2  ;;  %v5280_v47 = vld [vmem:[#allocation2 + $0x3a0] sm:$0xf]  ;;  %v5217_v49 = vor.u32 %v6297_v34, %v5216_v36  ;;  %v6313_v50 = vld [vmem:[#allocation2 + $0x3a4] sm:$0xf0]  ;;  %v5080_v56 = vld [vmem:[#allocation2 + $0x210] sm:$0xf]  ;;  %v5145_v60 = vor.u32 %v6279_v51, %v5144_v42 }
 0x2ca   :  { %2404 = vmatpush.bf16.msra.mxu2 %v5313_v27  ;;  %v5225_v27 = vor.u32 %v6299_v15, %v5224_v5  ;;  %v8045_v35 = vpack.c.bf16 %v1386_v20, %v1396_v21  ;;  %v6263_v57 = vld [vmem:[#allocation2 + $0x214] sm:$0xf0]  ;;  %v5272_v58 = vld [vmem:[#allocation2 + $0x390] sm:$0xf]  ;;  %v1399_v63 = vrot.slane %v7942_v31, 1  ;;  %v1403_v4 = vrot.slane %v7946_v32, 1 }
 0x2cb   :  { %2348 = vmatpush.bf16.msra.mxu1 %v5113_v53  ;;  %v5208_v53 = vld [vmem:[#allocation2 + $0x310] sm:$0xf]  ;;  %v6311_v0 = vld [vmem:[#allocation2 + $0x394] sm:$0xf0]  ;;  %v1400_v13 = vrot.slane %v7944_v41, 1  ;;  %v1404_v14 = vrot.slane %v7948_v38, 1  ;;  %v5081_v18 = vor.u32 %v6263_v57, %v5080_v56 }
 0x2cc   :  { %2367 = vmatpush.bf16.msra.mxu3 %v5177_v28  ;;  %v6315_v28 = vld [vmem:[#allocation2 + $0x3b4] sm:$0xf0]  ;;  %v5072_v5 = vld [vmem:[#allocation2 + $0x200] sm:$0xf]  ;;  %v6261_v15 = vld [vmem:[#allocation2 + $0x204] sm:$0xf0]  ;;  %v5273_v23 = vor.u32 %v6311_v0, %v5272_v58  ;;  %v1407_v51 = vsel %vm770_vm0, %v1399_v63, %v1403_v4 }
 0x2cd   :  { %2386 = vmatpush.bf16.msra.mxu0 %v5241_v43  ;;  %v5289_v40 = vor.u32 %v6315_v28, %v5288_v25  ;;  %v5153_v43 = vor.u32 %v6281_v29, %v5152_v37  ;;  %v6293_v16 = vld [vmem:[#allocation2 + $0x304] sm:$0xf0]  ;;  %v5448_v2 = vld [vmem:[#allocation2 + $0x4f0] sm:$0xf]  ;;  %v6355_v17 = vld [vmem:[#allocation2 + $0x4f4] sm:$0xf0]  ;;  %v1411_v28 = vsel %vm770_vm0, %v1403_v4, %v1399_v63  ;;  %v1412_v36 = vsel %vm770_vm0, %v1404_v14, %v1400_v13 }
 0x2ce   :  { %2405 = vmatpush.bf16.msra.mxu2 %v5305_v54  ;;  %v6295_v54 = vld [vmem:[#allocation2 + $0x314] sm:$0xf0]  ;;  %v1345_v20 = vperm.slane %v7946_v32, 7  ;;  %v6210_v21 = vld [vmem:[#allocation2 + $0x74] sm:$0xf]  ;;  %v1346_v37 = vperm.slane %v7948_v38, 7  ;;  %v5449_v34 = vor.u32 %v6355_v17, %v5448_v2  ;;  %v8075_v4 = vpack.c.bf16 %v7946_v32, %v7942_v31 }
 0x2cf   :  { %2349 = vmatpush.bf16.msra.mxu1 %v5105_v10  ;;  %v5209_v8 = vor.u32 %v6295_v54, %v5208_v53  ;;  %v6277_v10 = vld [vmem:[#allocation2 + $0x284] sm:$0xf0]  ;;  %v5264_v25 = vld [vmem:[#allocation2 + $0x380] sm:$0xf]  ;;  %v4938_v45 = vld [vmem:[#allocation2 + $0xf8] sm:$0xf0]  ;;  %v1408_v54 = vsel %vm770_vm0, %v1400_v13, %v1404_v14 }
 0x2d0   :  { %2368 = vmatpush.bf16.msra.mxu3 %v5169_v59  ;;  %v5281_v59 = vor.u32 %v6313_v50, %v5280_v47  ;;  %v5440_v47 = vld [vmem:[#allocation2 + $0x4e0] sm:$0xf]  ;;  %v5073_v50 = vor.u32 %v6261_v15, %v5072_v5  ;;  %v1417_v53 = vsel %vm776_vm1, %v1345_v20, %v1411_v28  ;;  %v6337_v58 = vld [vmem:[#allocation2 + $0x464] sm:$0xf0]  ;;  %v6208_v0 = vld [vmem:[#allocation2 + $0x64] sm:$0xf] }
 0x2d1   :  { %2387 = vmatpush.bf16.msra.mxu0 %v5233_v62  ;;  %v5136_v62 = vld [vmem:[#allocation2 + $0x280] sm:$0xf]  ;;  %v6224_v63 = vld [vmem:[#allocation2 + $0xe4] sm:$0xf]  ;;  %v6351_v13 = vld [vmem:[#allocation2 + $0x4d4] sm:$0xf0]  ;;  %v8081_v14 = vpack.c.bf16 %v1417_v53, %v1407_v51 }
 0x2d2   :  { %2406 = vmatpush.bf16.msra.mxu2 %v5297_v12  ;;  %2283 = vmatmul.bf16.gmra.mxu1 %v8039_v26  ;;  %v5200_v12 = vld [vmem:[#allocation2 + $0x300] sm:$0xf]  ;;  %v5137_v24 = vor.u32 %v6277_v10, %v5136_v62  ;;  %v4866_v62 = vld [vmem:[#allocation2 + $0x68] sm:$0xf0]  ;;  %v5368_v2 = vld [vmem:[#allocation2 + $0x450] sm:$0xf] }
 0x2d3   :  { %2302 = vmatmul.bf16.gmra.mxu3 %v8041_v46  ;;  %2350 = vmatpush.bf16.msra.mxu1 %v5097_v39  ;;  %v5201_v29 = vor.u32 %v6293_v16, %v5200_v12  ;;  %v5384_v39 = vld [vmem:[#allocation2 + $0x470] sm:$0xf]  ;;  %v5376_v57 = vld [vmem:[#allocation2 + $0x460] sm:$0xf]  ;;  %v4930_v10 = vld [vmem:[#allocation2 + $0xe8] sm:$0xf0]  ;;  %v4869_v16 = vor.u32 %v6208_v0, %v4866_v62 }
 0x2d4   :  { %2369 = vmatpush.bf16.msra.mxu3 %v5161_v22  ;;  %2321 = vmatmul.bf16.gmra.mxu0 %v8043_v30  ;;  %v4874_v22 = vld [vmem:[#allocation2 + $0x78] sm:$0xf0]  ;;  %v5432_v12 = vld [vmem:[#allocation2 + $0x4d0] sm:$0xf]  ;;  %v5377_v15 = vor.u32 %v6337_v58, %v5376_v57  ;;  %v6335_v17 = vld [vmem:[#allocation2 + $0x454] sm:$0xf0] }
 0x2d5   :  { %2388 = vmatpush.bf16.msra.mxu0 %v5225_v27  ;;  %2340 = vmatmul.bf16.gmra.mxu2 %v8045_v35  ;;  %v6309_v27 = vld [vmem:[#allocation2 + $0x384] sm:$0xf0]  ;;  %v4877_v44 = vor.u32 %v6210_v21, %v4874_v22  ;;  %v5433_v21 = vor.u32 %v6351_v13, %v5432_v12  ;;  %v6206_v22 = vld [vmem:[#allocation2 + $0x54] sm:$0xf]  ;;  %v1406_v51 = vrot.slane %v7956_v33, 1  ;;  %vm1431_vm15 = vcmp.lt.s32.totalorder %v7671_v9, 6 }
 0x2d6   :  { %2407 = vmatpush.bf16.msra.mxu2 %v5289_v40  ;;  %v6339_v40 = vld [vmem:[#allocation2 + $0x474] sm:$0xf0]  ;;  %v5265_v42 = vor.u32 %v6309_v27, %v5264_v25  ;;  %v4922_v25 = vld [vmem:[#allocation2 + $0xd8] sm:$0xf0]  ;;  %v5424_v27 = vld [vmem:[#allocation2 + $0x4c0] sm:$0xf] }
 0x2d7   :  { %2351 = vmatpush.bf16.msra.mxu1 %v5089_v55  ;;  %v1418_v55 = vsel %vm776_vm1, %v1346_v37, %v1412_v36  ;;  %v5385_v56 = vor.u32 %v6339_v40, %v5384_v39  ;;  %v6349_v28 = vld [vmem:[#allocation2 + $0x4c4] sm:$0xf0]  ;;  %v5369_v36 = vor.u32 %v6335_v17, %v5368_v2  ;;  %v6204_v40 = vld [vmem:[#allocation2 + $0x44] sm:$0xf]  ;;  %v4914_v53 = vld [vmem:[#allocation2 + $0xc8] sm:$0xf0] }
 0x2d8   :  { %2370 = vmatpush.bf16.msra.mxu3 %v5153_v43  ;;  %v6226_v43 = vld [vmem:[#allocation2 + $0xf4] sm:$0xf]  ;;  %v8083_v5 = vpack.c.bf16 %v1418_v55, %v1408_v54  ;;  %v6333_v39 = vld [vmem:[#allocation2 + $0x444] sm:$0xf0]  ;;  %v5416_v54 = vld [vmem:[#allocation2 + $0x4b0] sm:$0xf] }
 0x2d9   :  { %2389 = vmatpush.bf16.msra.mxu0 %v5217_v49  ;;  %v6353_v49 = vld [vmem:[#allocation2 + $0x4e4] sm:$0xf0]  ;;  %v6347_v55 = vld [vmem:[#allocation2 + $0x4b4] sm:$0xf0]  ;;  %v5352_v0 = vld [vmem:[#allocation2 + $0x430] sm:$0xf] }
 0x2da   :  { %2408 = vmatpush.bf16.msra.mxu2 %v5281_v59  ;;  %v4941_v59 = vor.u32 %v6226_v43, %v4938_v45  ;;  %v1401_v43 = vrot.slane %v7950_v48, 1  ;;  %v6331_v62 = vld [vmem:[#allocation2 + $0x434] sm:$0xf0]  ;;  %v5417_v12 = vor.u32 %v6347_v55, %v5416_v54  ;;  %v6202_v13 = vld [vmem:[#allocation2 + $0x34] sm:$0xf]  ;;  %vm1441_vm2 = vcmp.ge.s32.totalorder %v7690_v19, 14 }
 0x2db   :  { %2352 = vmatpush.bf16.msra.mxu1 %v5081_v18  ;;  %v4933_v18 = vor.u32 %v6224_v63, %v4930_v10  ;;  %v4906_v2 = vld [vmem:[#allocation2 + $0xb8] sm:$0xf0]  ;;  %v5408_v17 = vld [vmem:[#allocation2 + $0x4a0] sm:$0xf] }
 0x2dc   :  { %2371 = vmatpush.bf16.msra.mxu3 %v5145_v60  ;;  %v5441_v60 = vor.u32 %v6353_v49, %v5440_v47  ;;  %v5425_v47 = vor.u32 %v6349_v28, %v5424_v27  ;;  %v4850_v49 = vld [vmem:[#allocation2 + $0x48] sm:$0xf0]  ;;  %v5344_v28 = vld [vmem:[#allocation2 + $0x420] sm:$0xf] }
 0x2dd   :  { %2390 = vmatpush.bf16.msra.mxu0 %v5209_v8  ;;  %v8079_v8 = vpack.c.bf16 %v7948_v38, %v7944_v41  ;;  %v4853_v58 = vor.u32 %v6204_v40, %v4850_v49  ;;  %v4834_v40 = vld [vmem:[#allocation2 + $0x28] sm:$0xf0]  ;;  %v5400_v49 = vld [vmem:[#allocation2 + $0x490] sm:$0xf] }
 0x2de   :  { %2409 = vmatpush.bf16.msra.mxu2 %v5273_v23  ;;  %v4858_v23 = vld [vmem:[#allocation2 + $0x58] sm:$0xf0] }
 0x2df   :  { %2353 = vmatpush.bf16.msra.mxu1 %v5073_v50  ;;  %v6220_v50 = vld [vmem:[#allocation2 + $0xc4] sm:$0xf] }
 0x2e0   :  { %2372 = vmatpush.bf16.msra.mxu3 %v5137_v24  ;;  %v6222_v24 = vld [vmem:[#allocation2 + $0xd4] sm:$0xf]  ;;  %v4917_v63 = vor.u32 %v6220_v50, %v4914_v53  ;;  %v6343_v50 = vld [vmem:[#allocation2 + $0x494] sm:$0xf0]  ;;  %v5336_v53 = vld [vmem:[#allocation2 + $0x410] sm:$0xf] }
 0x2e1   :  { %2391 = vmatpush.bf16.msra.mxu0 %v5201_v29  ;;  %v5360_v29 = vld [vmem:[#allocation2 + $0x440] sm:$0xf]  ;;  %v4925_v45 = vor.u32 %v6222_v24, %v4922_v25  ;;  %v5353_v25 = vor.u32 %v6331_v62, %v5352_v0  ;;  %v5401_v62 = vor.u32 %v6343_v50, %v5400_v49  ;;  %v6274_v49 = vld [vmem:[#allocation2 + $0x274] sm:$0xf] }
 0x2e2   :  { %2410 = vmatpush.bf16.msra.mxu2 %v5265_v42  ;;  %2354 = vmatmul.bf16.vlgmr.msra.gmra.mxu1 %v8075_v4  ;;  %v1402_v42 = vrot.slane %v7952_v52, 1  ;;  %v5361_v57 = vor.u32 %v6333_v39, %v5360_v29  ;;  %v6329_v29 = vld [vmem:[#allocation2 + $0x424] sm:$0xf0]  ;;  %v6200_v39 = vld [vmem:[#allocation2 + $0x24] sm:$0xf] }
 0x2e3   :  { %2422 = vmatpush.bf16.msrb.mxu1 %v5385_v56  ;;  %2373 = vmatmul.bf16.vlgmr.msra.gmra.mxu3 %v8079_v8  ;;  %v1347_v56 = vperm.slane %v7954_v7, 7  ;;  %v5345_v54 = vor.u32 %v6329_v29, %v5344_v28  ;;  %v4837_v55 = vor.u32 %v6200_v39, %v4834_v40  ;;  %v1428_v28 = vrot.slane %v7948_v38, 2  ;;  %v4882_v39 = vld [vmem:[#allocation2 + $0x88] sm:$0xf0]  ;;  %v5050_v38 = vld [vmem:[#allocation2 + $0x1d8] sm:$0xf0] }
 0x2e4   :  { %2441 = vmatpush.bf16.msrb.mxu3 %v5449_v34  ;;  %2392 = vmatmul.bf16.vlgmr.msra.gmra.mxu0 %v8081_v14  ;;  %v4861_v34 = vor.u32 %v6206_v22, %v4858_v23  ;;  %v1414_v10 = vsel %vm770_vm0, %v1406_v51, %v1402_v42  ;;  %v1410_v23 = vsel %vm770_vm0, %v1402_v42, %v1406_v51 }
 0x2e5   :  { %2460 = vmatpush.bf16.msrb.mxu0 %v4877_v44  ;;  %2411 = vmatmul.bf16.vlgmr.msra.gmra.mxu2 %v8083_v5  ;;  %v1405_v44 = vrot.slane %v7954_v7, 1 }
 0x2e6   :  { %2479 = vmatpush.bf16.msrb.mxu2 %v4941_v59 }
 0x2e7   :  { %2423 = vmatpush.bf16.msrb.mxu1 %v5377_v15  ;;  %v1413_v59 = vsel %vm770_vm0, %v1405_v44, %v1401_v43  ;;  %v4842_v15 = vld [vmem:[#allocation2 + $0x38] sm:$0xf0] }
 0x2e8   :  { %2442 = vmatpush.bf16.msrb.mxu3 %v5441_v60  ;;  %v1348_v60 = vperm.slane %v7956_v33, 7  ;;  %v1421_v22 = vsel %vm776_vm1, %v1347_v56, %v1413_v59  ;;  %v4845_v27 = vor.u32 %v6202_v13, %v4842_v15  ;;  %v4826_v59 = vld [vmem:[#allocation2 + $0x18] sm:$0xf0]  ;;  %v6341_v13 = vld [vmem:[#allocation2 + $0x484] sm:$0xf0] }
 0x2e9   :  { %2461 = vmatpush.bf16.msrb.mxu0 %v4869_v16  ;;  %v6218_v16 = vld [vmem:[#allocation2 + $0xb4] sm:$0xf]  ;;  %v5328_v15 = vld [vmem:[#allocation2 + $0x400] sm:$0xf] }
 0x2ea   :  { %2480 = vmatpush.bf16.msrb.mxu2 %v4933_v18  ;;  %v6345_v18 = vld [vmem:[#allocation2 + $0x4a4] sm:$0xf0]  ;;  %v1422_v24 = vsel %vm776_vm1, %v1348_v60, %v1414_v10  ;;  %v4890_v10 = vld [vmem:[#allocation2 + $0x98] sm:$0xf0] }
 0x2eb   :  { %2424 = vmatpush.bf16.msrb.mxu1 %v5369_v36  ;;  %v4909_v36 = vor.u32 %v6218_v16, %v4906_v2  ;;  %v8121_v51 = vpack.c.bf16 %v1422_v24, %v1410_v23  ;;  %v6325_v16 = vld [vmem:[#allocation2 + $0x404] sm:$0xf0]  ;;  %v4818_v23 = vld [vmem:[#allocation2 + $0x8] sm:$0xf0]  ;;  %v1423_v24 = vrot.slane %v7942_v31, 2 }
 0x2ec   :  { %2443 = vmatpush.bf16.msrb.mxu3 %v5433_v21  ;;  %v1409_v21 = vsel %vm770_vm0, %v1401_v43, %v1405_v44  ;;  %v6216_v43 = vld [vmem:[#allocation2 + $0xa4] sm:$0xf]  ;;  %v8113_v44 = vpack.c.bf16 %v7954_v7, %v7950_v48  ;;  %v5329_v50 = vor.u32 %v6325_v16, %v5328_v15  ;;  %v5130_v31 = vld [vmem:[#allocation2 + $0x278] sm:$0xf0]  ;;  %v4994_v15 = vld [vmem:[#allocation2 + $0x168] sm:$0xf0] }
 0x2ed   :  { %2462 = vmatpush.bf16.msrb.mxu0 %v4861_v34  ;;  %v5409_v34 = vor.u32 %v6345_v18, %v5408_v17  ;;  %v8119_v42 = vpack.c.bf16 %v1421_v22, %v1409_v21  ;;  %v6196_v18 = vld [vmem:[#allocation2 + $0x4] sm:$0xf]  ;;  %v6258_v21 = vld [vmem:[#allocation2 + $0x1f4] sm:$0xf]  ;;  %v5066_v22 = vld [vmem:[#allocation2 + $0x1f8] sm:$0xf0] }
 0x2ee   :  { %2481 = vmatpush.bf16.msrb.mxu2 %v4925_v45  ;;  %v8117_v45 = vpack.c.bf16 %v7956_v33, %v7952_v52  ;;  %v5069_v40 = vor.u32 %v6258_v21, %v5066_v22  ;;  %v6272_v21 = vld [vmem:[#allocation2 + $0x264] sm:$0xf]  ;;  %v5122_v22 = vld [vmem:[#allocation2 + $0x268] sm:$0xf0] }
 0x2ef   :  { %2425 = vmatpush.bf16.msrb.mxu1 %v5361_v57  ;;  %v6327_v57 = vld [vmem:[#allocation2 + $0x414] sm:$0xf0] }
 0x2f0   :  { %2444 = vmatpush.bf16.msrb.mxu3 %v5425_v47  ;;  %v4898_v47 = vld [vmem:[#allocation2 + $0xa8] sm:$0xf0]  ;;  %v5337_v2 = vor.u32 %v6327_v57, %v5336_v53  ;;  %v6290_v53 = vld [vmem:[#allocation2 + $0x2f4] sm:$0xf] }
 0x2f1   :  { %2463 = vmatpush.bf16.msrb.mxu0 %v4853_v58  ;;  %v6198_v58 = vld [vmem:[#allocation2 + $0x14] sm:$0xf]  ;;  %v4901_v0 = vor.u32 %v6216_v43, %v4898_v47  ;;  %v5002_v47 = vld [vmem:[#allocation2 + $0x178] sm:$0xf0] }
 0x2f2   :  { %2482 = vmatpush.bf16.msrb.mxu2 %v4917_v63  ;;  %v6214_v63 = vld [vmem:[#allocation2 + $0x94] sm:$0xf]  ;;  %2359 = vmatmul.bf16.gmra.mxu1 %v8113_v44  ;;  %v4829_v17 = vor.u32 %v6198_v58, %v4826_v59  ;;  %v6256_v58 = vld [vmem:[#allocation2 + $0x1e4] sm:$0xf]  ;;  %v5058_v59 = vld [vmem:[#allocation2 + $0x1e8] sm:$0xf0] }
 0x2f3   :  { %2426 = vmatpush.bf16.msrb.mxu1 %v5353_v25  ;;  %2378 = vmatmul.bf16.gmra.mxu3 %v8117_v45  ;;  %v1427_v25 = vrot.slane %v7946_v32, 2  ;;  %v4893_v29 = vor.u32 %v6214_v63, %v4890_v10  ;;  %v6242_v43 = vld [vmem:[#allocation2 + $0x174] sm:$0xf]  ;;  %v5133_v10 = vor.u32 %v6274_v49, %v5130_v31  ;;  %v6288_v32 = vld [vmem:[#allocation2 + $0x2e4] sm:$0xf] }
 0x2f4   :  { %2445 = vmatpush.bf16.msrb.mxu3 %v5417_v12  ;;  %v5392_v12 = vld [vmem:[#allocation2 + $0x480] sm:$0xf]  ;;  %2397 = vmatmul.bf16.gmra.mxu0 %v8119_v42  ;;  %v5042_v31 = vld [vmem:[#allocation2 + $0x1c8] sm:$0xf0] }
 0x2f5   :  { %2464 = vmatpush.bf16.msrb.mxu0 %v4845_v27  ;;  %2416 = vmatmul.bf16.gmra.mxu2 %v8121_v51  ;;  %v1424_v27 = vrot.slane %v7944_v41, 2  ;;  %v4821_v41 = vor.u32 %v6196_v18, %v4818_v23  ;;  %v1432_v63 = vsel %vm1431_vm15, %v1423_v24, %v1427_v25  ;;  %v5061_v18 = vor.u32 %v6256_v58, %v5058_v59  ;;  %v5106_v58 = vld [vmem:[#allocation2 + $0x248] sm:$0xf0] }
 0x2f6   :  { %2483 = vmatpush.bf16.msrb.mxu2 %v4909_v36  ;;  %v5393_v36 = vor.u32 %v6341_v13, %v5392_v12  ;;  %v6240_v13 = vld [vmem:[#allocation2 + $0x164] sm:$0xf]  ;;  %v1425_v59 = vrot.slane %v7950_v48, 2 }
 0x2f7   :  { %2427 = vmatpush.bf16.msrb.mxu1 %v5345_v54  ;;  %v5194_v54 = vld [vmem:[#allocation2 + $0x2f8] sm:$0xf0]  ;;  %v1437_v57 = vsel %vm1431_vm15, %v1428_v28, %v1424_v27  ;;  %v4997_v23 = vor.u32 %v6240_v13, %v4994_v15  ;;  %v6250_v13 = vld [vmem:[#allocation2 + $0x1b4] sm:$0xf] }
 0x2f8   :  { %2446 = vmatpush.bf16.msrb.mxu3 %v5409_v34  ;;  %v6212_v34 = vld [vmem:[#allocation2 + $0x84] sm:$0xf]  ;;  %v5197_v12 = vor.u32 %v6290_v53, %v5194_v54  ;;  %v4978_v54 = vld [vmem:[#allocation2 + $0x148] sm:$0xf0]  ;;  %v5034_v15 = vld [vmem:[#allocation2 + $0x1b8] sm:$0xf0] }
 0x2f9   :  { %2465 = vmatpush.bf16.msrb.mxu0 %v4837_v55  ;;  %v1436_v55 = vsel %vm1431_vm15, %v1427_v25, %v1423_v24  ;;  %v5186_v24 = vld [vmem:[#allocation2 + $0x2e8] sm:$0xf0]  ;;  %v6254_v25 = vld [vmem:[#allocation2 + $0x1d4] sm:$0xf]  ;;  %v6236_v53 = vld [vmem:[#allocation2 + $0x144] sm:$0xf] }
 0x2fa   :  { %2484 = vmatpush.bf16.msrb.mxu2 %v4901_v0  ;;  %v4885_v0 = vor.u32 %v6212_v34, %v4882_v39  ;;  %v1444_v16 = vsel %vm1441_vm2, %v1345_v20, %v1436_v55  ;;  %v5189_v34 = vor.u32 %v6288_v32, %v5186_v24  ;;  %v5114_v39 = vld [vmem:[#allocation2 + $0x258] sm:$0xf0]  ;;  %v6282_v24 = vld [vmem:[#allocation2 + $0x2b4] sm:$0xf] }
 0x2fb   :  { %2428 = vmatpush.bf16.msrb.mxu1 %v5337_v2  ;;  %v1433_v2 = vsel %vm1431_vm15, %v1424_v27, %v1428_v28  ;;  %v8149_v20 = vpack.c.bf16 %v1444_v16, %v1432_v63  ;;  %v6238_v27 = vld [vmem:[#allocation2 + $0x154] sm:$0xf]  ;;  %v1430_v63 = vrot.slane %v7956_v33, 2  ;;  %v5018_v33 = vld [vmem:[#allocation2 + $0x198] sm:$0xf0] }
 0x2fc   :  { %2447 = vmatpush.bf16.msrb.mxu3 %v5401_v62  ;;  %v5005_v62 = vor.u32 %v6242_v43, %v5002_v47  ;;  %v6270_v28 = vld [vmem:[#allocation2 + $0x254] sm:$0xf]  ;;  %v5178_v43 = vld [vmem:[#allocation2 + $0x2d8] sm:$0xf0]  ;;  %v5053_v47 = vor.u32 %v6254_v25, %v5050_v38  ;;  %v6248_v38 = vld [vmem:[#allocation2 + $0x1a4] sm:$0xf] }
 0x2fd   :  { %2466 = vmatpush.bf16.msrb.mxu0 %v4829_v17  ;;  %v1445_v17 = vsel %vm1441_vm2, %v1346_v37, %v1437_v57  ;;  %v4986_v37 = vld [vmem:[#allocation2 + $0x158] sm:$0xf0]  ;;  %v6268_v57 = vld [vmem:[#allocation2 + $0x244] sm:$0xf]  ;;  %v6234_v16 = vld [vmem:[#allocation2 + $0x134] sm:$0xf] }
 0x2fe   :  { %2485 = vmatpush.bf16.msrb.mxu2 %v4893_v29  ;;  %v8151_v29 = vpack.c.bf16 %v1445_v17, %v1433_v2  ;;  %v4989_v49 = vor.u32 %v6238_v27, %v4986_v37  ;;  %v4970_v2 = vld [vmem:[#allocation2 + $0x138] sm:$0xf0]  ;;  %v5109_v17 = vor.u32 %v6268_v57, %v5106_v58  ;;  %v5026_v27 = vld [vmem:[#allocation2 + $0x1a8] sm:$0xf0]  ;;  %v6232_v37 = vld [vmem:[#allocation2 + $0x124] sm:$0xf] }
 0x2ff   :  { %2429 = vmatpush.bf16.msrb.mxu1 %v5329_v50  ;;  %v6252_v50 = vld [vmem:[#allocation2 + $0x1c4] sm:$0xf]  ;;  %v4973_v32 = vor.u32 %v6234_v16, %v4970_v2  ;;  %v5162_v25 = vld [vmem:[#allocation2 + $0x2b8] sm:$0xf0]  ;;  %v6230_v57 = vld [vmem:[#allocation2 + $0x114] sm:$0xf] }
 0x300   :  { %2448 = vmatpush.bf16.msrb.mxu3 %v5393_v36  ;;  %v5125_v36 = vor.u32 %v6272_v21, %v5122_v22  ;;  %v6266_v21 = vld [vmem:[#allocation2 + $0x234] sm:$0xf]  ;;  %v5098_v22 = vld [vmem:[#allocation2 + $0x238] sm:$0xf0]  ;;  %v4946_v16 = vld [vmem:[#allocation2 + $0x108] sm:$0xf0] }
 0x301   :  { %2467 = vmatpush.bf16.msrb.mxu0 %v4821_v41  ;;  %v5117_v41 = vor.u32 %v6270_v28, %v5114_v39  ;;  %v4962_v28 = vld [vmem:[#allocation2 + $0x128] sm:$0xf0]  ;;  %v6322_v2 = vld [vmem:[#allocation2 + $0x3f4] sm:$0xf] }
 0x302   :  { %2486 = vmatpush.bf16.msrb.mxu2 %v4885_v0  ;;  %2430 = vmatmul.bf16.vlgmr.msrb.gmra.mxu1 %v8149_v20  ;;  %v1429_v0 = vrot.slane %v7954_v7, 2  ;;  %v5029_v7 = vor.u32 %v6248_v38, %v5026_v27  ;;  %v5138_v38 = vld [vmem:[#allocation2 + $0x288] sm:$0xf0]  ;;  %v6338_v27 = vld [vmem:[#allocation2 + $0x474] sm:$0xf] }
 0x303   :  { %2498 = vmatpush.bf16.msra.mxu1 %v5005_v62  ;;  %2449 = vmatmul.bf16.vlgmr.msrb.gmra.mxu3 %v8151_v29  ;;  %v1426_v62 = vrot.slane %v7952_v52, 2 }
 0x304   :  { %2517 = vmatpush.bf16.msra.mxu3 %v5069_v40  ;;  %v6286_v40 = vld [vmem:[#allocation2 + $0x2d4] sm:$0xf]  ;;  %2468 = vmatmul.bf16.vlgmr.msrb.gmra.mxu0 %v7993_v61  ;;  %v4981_v61 = vor.u32 %v6236_v53, %v4978_v54  ;;  %v6280_v53 = vld [vmem:[#allocation2 + $0x2a4] sm:$0xf] }
 0x305   :  { %2536 = vmatpush.bf16.msra.mxu0 %v5133_v10  ;;  %2487 = vmatmul.bf16.vlgmr.msrb.gmra.mxu2 %v7995_v1  ;;  %v5181_v55 = vor.u32 %v6286_v40, %v5178_v43  ;;  %v5045_v10 = vor.u32 %v6252_v50, %v5042_v31  ;;  %v5170_v1 = vld [vmem:[#allocation2 + $0x2c8] sm:$0xf0]  ;;  %v1439_v52 = vsel %vm1431_vm15, %v1430_v63, %v1426_v62  ;;  %v6246_v54 = vld [vmem:[#allocation2 + $0x194] sm:$0xf] }
 0x306   :  { %2555 = vmatpush.bf16.msra.mxu2 %v5197_v12  ;;  %v6284_v12 = vld [vmem:[#allocation2 + $0x2c4] sm:$0xf]  ;;  %v1435_v39 = vsel %vm1431_vm15, %v1426_v62, %v1430_v63  ;;  %v1449_v40 = vsel %vm1441_vm2, %v1348_v60, %v1439_v52  ;;  %v5101_v43 = vor.u32 %v6266_v21, %v5098_v22  ;;  %v5090_v50 = vld [vmem:[#allocation2 + $0x228] sm:$0xf0]  ;;  %v4965_v31 = vor.u32 %v6232_v37, %v4962_v28  ;;  %v4954_v60 = vld [vmem:[#allocation2 + $0x118] sm:$0xf0] }
 0x307   :  { %2499 = vmatpush.bf16.msra.mxu1 %v4997_v23  ;;  %v5173_v48 = vor.u32 %v6284_v12, %v5170_v1  ;;  %v5037_v23 = vor.u32 %v6250_v13, %v5034_v15  ;;  %v5082_v62 = vld [vmem:[#allocation2 + $0x218] sm:$0xf0]  ;;  %v6278_v63 = vld [vmem:[#allocation2 + $0x294] sm:$0xf]  ;;  %v6244_v1 = vld [vmem:[#allocation2 + $0x184] sm:$0xf] }
 0x308   :  { %2518 = vmatpush.bf16.msra.mxu3 %v5061_v18  ;;  %v1438_v18 = vsel %vm1431_vm15, %v1429_v0, %v1425_v59  ;;  %v5146_v12 = vld [vmem:[#allocation2 + $0x298] sm:$0xf0]  ;;  %v5010_v13 = vld [vmem:[#allocation2 + $0x188] sm:$0xf0]  ;;  %v6228_v15 = vld [vmem:[#allocation2 + $0x104] sm:$0xf] }
 0x309   :  { %2537 = vmatpush.bf16.msra.mxu0 %v5125_v36  ;;  %v1434_v36 = vsel %vm1431_vm15, %v1425_v59, %v1429_v0  ;;  %v6262_v0 = vld [vmem:[#allocation2 + $0x214] sm:$0xf]  ;;  %v5149_v21 = vor.u32 %v6278_v63, %v5146_v12  ;;  %v6260_v22 = vld [vmem:[#allocation2 + $0x204] sm:$0xf]  ;;  %v5386_v37 = vld [vmem:[#allocation2 + $0x478] sm:$0xf0] }
 0x30a   :  { %2556 = vmatpush.bf16.msra.mxu2 %v5189_v34  ;;  %v1448_v34 = vsel %vm1441_vm2, %v1347_v56, %v1438_v18  ;;  %v5154_v56 = vld [vmem:[#allocation2 + $0x2a8] sm:$0xf0]  ;;  %v5258_v18 = vld [vmem:[#allocation2 + $0x378] sm:$0xf0]  ;;  %v5085_v52 = vor.u32 %v6262_v0, %v5082_v62  ;;  %v6302_v62 = vld [vmem:[#allocation2 + $0x354] sm:$0xf] }
 0x30b   :  { %2500 = vmatpush.bf16.msra.mxu1 %v4989_v49  ;;  %v6264_v49 = vld [vmem:[#allocation2 + $0x224] sm:$0xf]  ;;  %v5157_v59 = vor.u32 %v6280_v53, %v5154_v56  ;;  %v5242_v63 = vld [vmem:[#allocation2 + $0x358] sm:$0xf0]  ;;  %v6350_v12 = vld [vmem:[#allocation2 + $0x4d4] sm:$0xf] }
 0x30c   :  { %2519 = vmatpush.bf16.msra.mxu3 %v5053_v47  ;;  %v5165_v47 = vor.u32 %v6282_v24, %v5162_v25  ;;  %v5093_v58 = vor.u32 %v6264_v49, %v5090_v50  ;;  %v5013_v24 = vor.u32 %v6244_v1, %v5010_v13  ;;  %v4949_v25 = vor.u32 %v6228_v15, %v4946_v16  ;;  %v5434_v1 = vld [vmem:[#allocation2 + $0x4d8] sm:$0xf0]  ;;  %v6316_v16 = vld [vmem:[#allocation2 + $0x3c4] sm:$0xf] }
 0x30d   :  { %2538 = vmatpush.bf16.msra.mxu0 %v5117_v41  ;;  %v8177_v41 = vpack.c.bf16 %v1448_v34, %v1434_v36  ;;  %v5450_v36 = vld [vmem:[#allocation2 + $0x4f8] sm:$0xf0]  ;;  %v6320_v34 = vld [vmem:[#allocation2 + $0x3e4] sm:$0xf]  ;;  %v5389_v50 = vor.u32 %v6338_v27, %v5386_v37  ;;  %v5245_v15 = vor.u32 %v6302_v62, %v5242_v63  ;;  %v6326_v63 = vld [vmem:[#allocation2 + $0x414] sm:$0xf] }
 0x30e   :  { %2557 = vmatpush.bf16.msra.mxu2 %v5181_v55  ;;  %v8179_v55 = vpack.c.bf16 %v1449_v40, %v1435_v39  ;;  %v5314_v39 = vld [vmem:[#allocation2 + $0x3e8] sm:$0xf0]  ;;  %v6304_v40 = vld [vmem:[#allocation2 + $0x364] sm:$0xf]  ;;  %v5290_v27 = vld [vmem:[#allocation2 + $0x3b8] sm:$0xf0] }
 0x30f   :  { %2501 = vmatpush.bf16.msra.mxu1 %v4981_v61  ;;  %v4957_v61 = vor.u32 %v6230_v57, %v4954_v60  ;;  %v5317_v53 = vor.u32 %v6320_v34, %v5314_v39  ;;  %v5442_v57 = vld [vmem:[#allocation2 + $0x4e8] sm:$0xf0]  ;;  %v6318_v60 = vld [vmem:[#allocation2 + $0x3d4] sm:$0xf]  ;;  %v5418_v34 = vld [vmem:[#allocation2 + $0x4b8] sm:$0xf0] }
 0x310   :  { %2520 = vmatpush.bf16.msra.mxu3 %v5045_v10  ;;  %v5021_v10 = vor.u32 %v6246_v54, %v5018_v33  ;;  %v5378_v54 = vld [vmem:[#allocation2 + $0x468] sm:$0xf0]  ;;  %v6352_v33 = vld [vmem:[#allocation2 + $0x4e4] sm:$0xf]  ;;  %v5210_v62 = vld [vmem:[#allocation2 + $0x318] sm:$0xf0] }
 0x311   :  { %2539 = vmatpush.bf16.msra.mxu0 %v5109_v17  ;;  %v5322_v17 = vld [vmem:[#allocation2 + $0x3f8] sm:$0xf0]  ;;  %v5445_v0 = vor.u32 %v6352_v33, %v5442_v57  ;;  %v6312_v39 = vld [vmem:[#allocation2 + $0x3a4] sm:$0xf]  ;;  %v6310_v57 = vld [vmem:[#allocation2 + $0x394] sm:$0xf] }
 0x312   :  { %2558 = vmatpush.bf16.msra.mxu2 %v5173_v48  ;;  %2435 = vmatmul.bf16.gmra.mxu1 %v8177_v41  ;;  %v6306_v48 = vld [vmem:[#allocation2 + $0x374] sm:$0xf] }
 0x313   :  { %2502 = vmatpush.bf16.msra.mxu1 %v4973_v32  ;;  %2454 = vmatmul.bf16.gmra.mxu3 %v8179_v55  ;;  %v6276_v32 = vld [vmem:[#allocation2 + $0x284] sm:$0xf]  ;;  %v5261_v28 = vor.u32 %v6306_v48, %v5258_v18  ;;  %v5437_v48 = vor.u32 %v6350_v12, %v5434_v1  ;;  %v5402_v12 = vld [vmem:[#allocation2 + $0x498] sm:$0xf0] }
 0x314   :  { %2521 = vmatpush.bf16.msra.mxu3 %v5037_v23  ;;  %2473 = vmatmul.bf16.gmra.mxu0 %v8039_v26  ;;  %v5074_v23 = vld [vmem:[#allocation2 + $0x208] sm:$0xf0]  ;;  %v5325_v26 = vor.u32 %v6322_v2, %v5322_v17  ;;  %v5141_v49 = vor.u32 %v6276_v32, %v5138_v38  ;;  %v6300_v18 = vld [vmem:[#allocation2 + $0x344] sm:$0xf]  ;;  %v6314_v38 = vld [vmem:[#allocation2 + $0x3b4] sm:$0xf] }
 0x315   :  { %2540 = vmatpush.bf16.msra.mxu0 %v5101_v43  ;;  %2492 = vmatmul.bf16.gmra.mxu2 %v8041_v46  ;;  %v6354_v46 = vld [vmem:[#allocation2 + $0x4f4] sm:$0xf]  ;;  %v5250_v43 = vld [vmem:[#allocation2 + $0x368] sm:$0xf0] }
 0x316   :  { %2559 = vmatpush.bf16.msra.mxu2 %v5165_v47  ;;  %v5077_v47 = vor.u32 %v6260_v22, %v5074_v23  ;;  %v5253_v56 = vor.u32 %v6304_v40, %v5250_v43  ;;  %v5298_v2 = vld [vmem:[#allocation2 + $0x3c8] sm:$0xf0]  ;;  %v6348_v23 = vld [vmem:[#allocation2 + $0x4c4] sm:$0xf] }
 0x317   :  { %2503 = vmatpush.bf16.msra.mxu1 %v4965_v31  ;;  %v6336_v31 = vld [vmem:[#allocation2 + $0x464] sm:$0xf]  ;;  %v5362_v22 = vld [vmem:[#allocation2 + $0x448] sm:$0xf0] }
 0x318   :  { %2522 = vmatpush.bf16.msra.mxu3 %v5029_v7  ;;  %v5453_v7 = vor.u32 %v6354_v46, %v5450_v36  ;;  %v5426_v32 = vld [vmem:[#allocation2 + $0x4c8] sm:$0xf0]  ;;  %v5354_v46 = vld [vmem:[#allocation2 + $0x438] sm:$0xf0]  ;;  %v6346_v36 = vld [vmem:[#allocation2 + $0x4b4] sm:$0xf] }
 0x319   :  { %2541 = vmatpush.bf16.msra.mxu0 %v5093_v58  ;;  %v5306_v58 = vld [vmem:[#allocation2 + $0x3d8] sm:$0xf0]  ;;  %v5282_v40 = vld [vmem:[#allocation2 + $0x3a8] sm:$0xf0] }
 0x31a   :  { %2560 = vmatpush.bf16.msra.mxu2 %v5157_v59  ;;  %v5381_v59 = vor.u32 %v6336_v31, %v5378_v54  ;;  %v5309_v13 = vor.u32 %v6318_v60, %v5306_v58  ;;  %v5346_v31 = vld [vmem:[#allocation2 + $0x428] sm:$0xf0]  ;;  %v5285_v54 = vor.u32 %v6312_v39, %v5282_v40  ;;  %v5274_v60 = vld [vmem:[#allocation2 + $0x398] sm:$0xf0] }
 0x31b   :  { %2504 = vmatpush.bf16.msra.mxu1 %v4957_v61  ;;  %v5370_v61 = vld [vmem:[#allocation2 + $0x458] sm:$0xf0]  ;;  %v5277_v1 = vor.u32 %v6310_v57, %v5274_v60 }
 0x31c   :  { %2523 = vmatpush.bf16.msra.mxu3 %v5021_v10  ;;  %v6334_v10 = vld [vmem:[#allocation2 + $0x454] sm:$0xf] }
 0x31d   :  { %2542 = vmatpush.bf16.msra.mxu0 %v5085_v52  ;;  %v5373_v17 = vor.u32 %v6334_v10, %v5370_v61  ;;  %v5234_v52 = vld [vmem:[#allocation2 + $0x348] sm:$0xf0]  ;;  %v5338_v10 = vld [vmem:[#allocation2 + $0x418] sm:$0xf0]  ;;  %v6342_v61 = vld [vmem:[#allocation2 + $0x494] sm:$0xf] }
 0x31e   :  { %2561 = vmatpush.bf16.msra.mxu2 %v5149_v21  ;;  %v6332_v21 = vld [vmem:[#allocation2 + $0x444] sm:$0xf] }
 0x31f   :  { %2505 = vmatpush.bf16.msra.mxu1 %v4949_v25  ;;  %v5237_v25 = vor.u32 %v6300_v18, %v5234_v52  ;;  %v5365_v37 = vor.u32 %v6332_v21, %v5362_v22  ;;  %v5202_v18 = vld [vmem:[#allocation2 + $0x308] sm:$0xf0]  ;;  %v6324_v52 = vld [vmem:[#allocation2 + $0x404] sm:$0xf] }
 0x320   :  { %2524 = vmatpush.bf16.msra.mxu3 %v5013_v24  ;;  %v5301_v24 = vor.u32 %v6316_v16, %v5298_v2  ;;  %v5266_v16 = vld [vmem:[#allocation2 + $0x388] sm:$0xf0]  ;;  %v5341_v2 = vor.u32 %v6326_v63, %v5338_v10  ;;  %v6340_v22 = vld [vmem:[#allocation2 + $0x484] sm:$0xf] }
 0x321   :  { %2543 = vmatpush.bf16.msra.mxu0 %v5077_v47  ;;  %v5421_v47 = vor.u32 %v6346_v36, %v5418_v34  ;;  %v5330_v21 = vld [vmem:[#allocation2 + $0x408] sm:$0xf0] }
 0x322   :  { %2562 = vmatpush.bf16.msra.mxu2 %v5141_v49  ;;  %2506 = vmatmul.bf16.vlgmr.msra.gmra.mxu1 %v7997_v6  ;;  %v6298_v6 = vld [vmem:[#allocation2 + $0x334] sm:$0xf]  ;;  %v6296_v49 = vld [vmem:[#allocation2 + $0x324] sm:$0xf] }
 0x323   :  { %2574 = vmatpush.bf16.msrb.mxu1 %v5261_v28  ;;  %2525 = vmatmul.bf16.vlgmr.msra.gmra.mxu3 %v7999_v11  ;;  %v5226_v28 = vld [vmem:[#allocation2 + $0x338] sm:$0xf0]  ;;  %v6330_v11 = vld [vmem:[#allocation2 + $0x434] sm:$0xf] }
 0x324   :  { %2593 = vmatpush.bf16.msrb.mxu3 %v5325_v26  ;;  %2544 = vmatmul.bf16.vlgmr.msra.gmra.mxu0 %v8075_v4  ;;  %v5429_v26 = vor.u32 %v6348_v23, %v5426_v32  ;;  %v5293_v4 = vor.u32 %v6314_v38, %v5290_v27  ;;  %v5357_v43 = vor.u32 %v6330_v11, %v5354_v46  ;;  %v5394_v23 = vld [vmem:[#allocation2 + $0x488] sm:$0xf0] }
 0x325   :  { %2612 = vmatpush.bf16.msrb.mxu0 %v5389_v50  ;;  %2563 = vmatmul.bf16.vlgmr.msra.gmra.mxu2 %v8079_v8  ;;  %v5229_v8 = vor.u32 %v6298_v6, %v5226_v28  ;;  %v5218_v50 = vld [vmem:[#allocation2 + $0x328] sm:$0xf0]  ;;  %v5397_v38 = vor.u32 %v6340_v22, %v5394_v23 }
 0x326   :  { %2631 = vmatpush.bf16.msrb.mxu2 %v5453_v7  ;;  %v6328_v7 = vld [vmem:[#allocation2 + $0x424] sm:$0xf]  ;;  %v5221_v33 = vor.u32 %v6296_v49, %v5218_v50 }
 0x327   :  { %2575 = vmatpush.bf16.msrb.mxu1 %v5253_v56  ;;  %v5410_v56 = vld [vmem:[#allocation2 + $0x4a8] sm:$0xf0]  ;;  %v5349_v58 = vor.u32 %v6328_v7, %v5346_v31 }
 0x328   :  { %2594 = vmatpush.bf16.msrb.mxu3 %v5317_v53  ;;  %v6344_v53 = vld [vmem:[#allocation2 + $0x4a4] sm:$0xf] }
 0x329   :  { %2613 = vmatpush.bf16.msrb.mxu0 %v5381_v59  ;;  %v5413_v59 = vor.u32 %v6344_v53, %v5410_v56 }
 0x32a   :  { %2632 = vmatpush.bf16.msrb.mxu2 %v5445_v0  ;;  %v6294_v0 = vld [vmem:[#allocation2 + $0x314] sm:$0xf] }
 0x32b   :  { %2576 = vmatpush.bf16.msrb.mxu1 %v5245_v15  ;;  %v6308_v15 = vld [vmem:[#allocation2 + $0x384] sm:$0xf] }
 0x32c   :  { %2595 = vmatpush.bf16.msrb.mxu3 %v5309_v13  ;;  %v5213_v13 = vor.u32 %v6294_v0, %v5210_v62  ;;  %v5269_v32 = vor.u32 %v6308_v15, %v5266_v16 }
 0x32d   :  { %2614 = vmatpush.bf16.msrb.mxu0 %v5373_v17  ;;  %v5405_v17 = vor.u32 %v6342_v61, %v5402_v12 }
 0x32e   :  { %2633 = vmatpush.bf16.msrb.mxu2 %v5437_v48  ;;  %v6292_v48 = vld [vmem:[#allocation2 + $0x304] sm:$0xf] }
 0x32f   :  { %2577 = vmatpush.bf16.msrb.mxu1 %v5237_v25  ;;  %v5333_v25 = vor.u32 %v6324_v52, %v5330_v21 }
 0x330   :  { %2596 = vmatpush.bf16.msrb.mxu3 %v5301_v24  ;;  %v5205_v24 = vor.u32 %v6292_v48, %v5202_v18 }
 0x331   :  { %2615 = vmatpush.bf16.msrb.mxu0 %v5365_v37 }
 0x332   :  { %2634 = vmatpush.bf16.msrb.mxu2 %v5429_v26  ;;  %2511 = vmatmul.bf16.gmra.mxu1 %v8043_v30 }
 0x333   :  { %2578 = vmatpush.bf16.msrb.mxu1 %v5229_v8  ;;  %2530 = vmatmul.bf16.gmra.mxu3 %v8045_v35 }
 0x334   :  { %2597 = vmatpush.bf16.msrb.mxu3 %v5293_v4  ;;  %2549 = vmatmul.bf16.gmra.mxu0 %v8113_v44 }
 0x335   :  { %2616 = vmatpush.bf16.msrb.mxu0 %v5357_v43  ;;  %2568 = vmatmul.bf16.gmra.mxu2 %v8117_v45 }
 0x336   :  { %2635 = vmatpush.bf16.msrb.mxu2 %v5421_v47 }
 0x337   :  { %2579 = vmatpush.bf16.msrb.mxu1 %v5221_v33 }
 0x338   :  { %2598 = vmatpush.bf16.msrb.mxu3 %v5285_v54 }
 0x339   :  { %2617 = vmatpush.bf16.msrb.mxu0 %v5349_v58 }
 0x33a   :  { %2636 = vmatpush.bf16.msrb.mxu2 %v5413_v59 }
 0x33b   :  { %2580 = vmatpush.bf16.msrb.mxu1 %v5213_v13 }
 0x33c   :  { %2599 = vmatpush.bf16.msrb.mxu3 %v5277_v1 }
 0x33d   :  { %2618 = vmatpush.bf16.msrb.mxu0 %v5341_v2 }
 0x33e   :  { %2637 = vmatpush.bf16.msrb.mxu2 %v5405_v17 }
 0x33f   :  { %2581 = vmatpush.bf16.msrb.mxu1 %v5205_v24  ;;  %v2279_v30 = vpop.f32.mrf.mxu1 }
 0x340   :  { %2600 = vmatpush.bf16.msrb.mxu3 %v5269_v32 }
 0x341   :  { %2619 = vmatpush.bf16.msrb.mxu0 %v5333_v25  ;;  %v2317_v35 = vpop.f32.mrf.mxu0 }
 0x342   :  { %2638 = vmatpush.bf16.msrb.mxu2 %v5397_v38  ;;  %2582 = vmatmul.bf16.vlgmr.msrb.gmra.mxu1 %v8081_v14 }
 0x343   :  { %2601 = vmatmul.bf16.vlgmr.msrb.gmra.mxu3 %v8083_v5 }
 0x344   :  { %2620 = vmatmul.bf16.vlgmr.msrb.gmra.mxu0 %v8149_v20 }
 0x345   :  { %2639 = vmatmul.bf16.vlgmr.msrb.gmra.mxu2 %v8151_v29 }
 0x346   :  { %v2298_v44 = vpop.f32.mrf.mxu3 }
 0x347   :  { %v2299_v45 = vadd.f32 %v2298_v44, %v2279_v30  ;;  %v2281_v37 = vpop.f32.mrf.mxu1 }
 0x348   :  { %v2336_v27 = vpop.f32.mrf.mxu2 }
 0x349   :  { %v2319_v26 = vpop.f32.mrf.mxu0  ;;  %v2318_v6 = vadd.f32 %v2317_v35, %v2299_v45 }
 0x34b   :  { %v2337_v28 = vadd.f32 %v2336_v27, %v2318_v6 }
 0x34e   :  { %v2300_v11 = vpop.f32.mrf.mxu3 }
 0x34f   :  { %v2301_v46 = vadd.f32 %v2300_v11, %v2281_v37  ;;  %v2284_v34 = vpop.f32.mrf.mxu1 }
 0x350   :  { %v2338_v36 = vpop.f32.mrf.mxu2 }
 0x351   :  { %v2322_v4 = vpop.f32.mrf.mxu0  ;;  %v2320_v8 = vadd.f32 %v2319_v26, %v2301_v46 }
 0x352   :  { %2587 = vmatmul.bf16.gmra.mxu1 %v8119_v42 }
 0x353   :  { %v2339_v14 = vadd.f32 %v2338_v36, %v2320_v8  ;;  %2606 = vmatmul.bf16.gmra.mxu3 %v8121_v51 }
 0x354   :  { %2625 = vmatmul.bf16.gmra.mxu0 %v8177_v41 }
 0x355   :  { %2644 = vmatmul.bf16.gmra.mxu2 %v8179_v55 }
 0x356   :  { %v2303_v5 = vpop.f32.mrf.mxu3 }
 0x357   :  { %v2304_v20 = vadd.f32 %v2303_v5, %v2284_v34  ;;  %v2286_v39 = vpop.f32.mrf.mxu1 }
 0x358   :  { %v2341_v29 = vpop.f32.mrf.mxu2 }
 0x359   :  { %v2324_v40 = vpop.f32.mrf.mxu0  ;;  %v2323_v43 = vadd.f32 %v2322_v4, %v2304_v20 }
 0x35b   :  { %v2342_v47 = vadd.f32 %v2341_v29, %v2323_v43 }
 0x35e   :  { %v2305_v49 = vpop.f32.mrf.mxu3 }
 0x35f   :  { %v2306_v50 = vadd.f32 %v2305_v49, %v2286_v39  ;;  %v2355_v31 = vpop.f32.mrf.mxu1 }
 0x360   :  { %v2343_v7 = vpop.f32.mrf.mxu2  ;;  %v2356_v56 = vadd.f32 %v2355_v31, %v2337_v28 }
 0x361   :  { %v2325_v53 = vadd.f32 %v2324_v40, %v2306_v50  ;;  %v2393_v42 = vpop.f32.mrf.mxu0 }
 0x363   :  { %v2344_v54 = vadd.f32 %v2343_v7, %v2325_v53 }
 0x366   :  { %v2374_v51 = vpop.f32.mrf.mxu3 }
 0x367   :  { %v2375_v33 = vadd.f32 %v2374_v51, %v2356_v56  ;;  %v2357_v57 = vpop.f32.mrf.mxu1 }
 0x368   :  { %v2412_v41 = vpop.f32.mrf.mxu2  ;;  %v2358_v60 = vadd.f32 %v2357_v57, %v2339_v14 }
 0x369   :  { %v2394_v55 = vadd.f32 %v2393_v42, %v2375_v33  ;;  %v2395_v58 = vpop.f32.mrf.mxu0 }
 0x36b   :  { %v2413_v59 = vadd.f32 %v2412_v41, %v2394_v55 }
 0x36e   :  { %v2376_v0 = vpop.f32.mrf.mxu3 }
 0x36f   :  { %v2377_v62 = vadd.f32 %v2376_v0, %v2358_v60  ;;  %v2360_v10 = vpop.f32.mrf.mxu1 }
 0x370   :  { %v2414_v63 = vpop.f32.mrf.mxu2  ;;  %v2361_v12 = vadd.f32 %v2360_v10, %v2342_v47 }
 0x371   :  { %v2396_v61 = vadd.f32 %v2395_v58, %v2377_v62  ;;  %v2398_v1 = vpop.f32.mrf.mxu0 }
 0x373   :  { %v2415_v13 = vadd.f32 %v2414_v63, %v2396_v61 }
 0x376   :  { %v2379_v15 = vpop.f32.mrf.mxu3 }
 0x377   :  { %v2380_v16 = vadd.f32 %v2379_v15, %v2361_v12  ;;  %v2362_v17 = vpop.f32.mrf.mxu1 }
 0x378   :  { %v2417_v2 = vpop.f32.mrf.mxu2  ;;  %v2363_v18 = vadd.f32 %v2362_v17, %v2344_v54 }
 0x379   :  { %v2399_v48 = vadd.f32 %v2398_v1, %v2380_v16  ;;  %v2400_v52 = vpop.f32.mrf.mxu0 }
 0x37b   :  { %v2418_v21 = vadd.f32 %v2417_v2, %v2399_v48 }
 0x37e   :  { %v2381_v22 = vpop.f32.mrf.mxu3 }
 0x37f   :  { %v2382_v23 = vadd.f32 %v2381_v22, %v2363_v18  ;;  %v2431_v24 = vpop.f32.mrf.mxu1 }
 0x380   :  { %v2419_v32 = vpop.f32.mrf.mxu2  ;;  %v2432_v38 = vadd.f32 %v2431_v24, %v2413_v59 }
 0x381   :  { %v2401_v25 = vadd.f32 %v2400_v52, %v2382_v23  ;;  %v2469_v30 = vpop.f32.mrf.mxu0 }
 0x383   :  { %v2420_v35 = vadd.f32 %v2419_v32, %v2401_v25 }
 0x386   :  { %v2450_v44 = vpop.f32.mrf.mxu3 }
 0x387   :  { %v8201_v45 = vadd.f32 %v2450_v44, %v2432_v38  ;;  %v2433_v26 = vpop.f32.mrf.mxu1 }
 0x388   :  { %v2488_v27 = vpop.f32.mrf.mxu2  ;;  %v2434_v6 = vadd.f32 %v2433_v26, %v2415_v13 }
 0x389   :  { %v8203_v37 = vadd.f32 %v2488_v27, %v2469_v30  ;;  %v2471_v28 = vpop.f32.mrf.mxu0  ;;  %v2670_v4 = vmul.f32 %v8201_v45, %v8201_v45 }
 0x38e   :  { %v2452_v11 = vpop.f32.mrf.mxu3 }
 0x38f   :  { %v8205_v46 = vadd.f32 %v2452_v11, %v2434_v6  ;;  %v2436_v34 = vpop.f32.mrf.mxu1 }
 0x390   :  { %v2490_v36 = vpop.f32.mrf.mxu2  ;;  %v2437_v5 = vadd.f32 %v2436_v34, %v2418_v21 }
 0x391   :  { %v2650_v8 = vadd.f32 %v8205_v46, %v8201_v45  ;;  %v2672_v14 = vmul.f32 %v8205_v46, %v8205_v46  ;;  %v2474_v20 = vpop.f32.mrf.mxu0  ;;  %v2491_v34 = vadd.f32 %v2490_v36, %v2471_v28 }
 0x393   :  { %v2678_v29 = vadd.f32 %v2672_v14, %v2670_v4 }
 0x396   :  { %v2455_v39 = vpop.f32.mrf.mxu3 }
 0x397   :  { %v8213_v40 = vadd.f32 %v2455_v39, %v2437_v5  ;;  %v2438_v47 = vpop.f32.mrf.mxu1 }
 0x398   :  { %v2493_v43 = vpop.f32.mrf.mxu2  ;;  %v2439_v7 = vadd.f32 %v2438_v47, %v2420_v35 }
 0x399   :  { %v2651_v49 = vadd.f32 %v2650_v8, %v8213_v40  ;;  %v2674_v50 = vmul.f32 %v8213_v40, %v8213_v40  ;;  %v2476_v31 = vpop.f32.mrf.mxu0  ;;  %v2494_v14 = vadd.f32 %v2493_v43, %v2474_v20 }
 0x39b   :  { %v2679_v53 = vadd.f32 %v2678_v29, %v2674_v50 }
 0x39e   :  { %v2457_v56 = vpop.f32.mrf.mxu3 }
 0x39f   :  { %v8218_v42 = vadd.f32 %v2457_v56, %v2439_v7  ;;  %v2507_v51 = vpop.f32.mrf.mxu1 }
 0x3a0   :  { %v2495_v54 = vpop.f32.mrf.mxu2  ;;  %v2508_v5 = vadd.f32 %v2507_v51, %v8203_v37 }
 0x3a1   :  { %v2652_v33 = vadd.f32 %v2651_v49, %v8218_v42  ;;  %v2676_v41 = vmul.f32 %v8218_v42, %v8218_v42  ;;  %v2545_v57 = vpop.f32.mrf.mxu0 }
 0x3a3   :  { %v2653_v55 = vrot.slane %v2652_v33, 4  ;;  %v2680_v60 = vadd.f32 %v2679_v53, %v2676_v41 }
 0x3a5   :  { %v2654_v58 = vadd.f32 %v2653_v55, %v2652_v33  ;;  %v2681_v59 = vrot.slane %v2680_v60, 4  ;;  %v2496_v55 = vadd.f32 %v2495_v54, %v2476_v31 }
 0x3a6   :  { %v2526_v0 = vpop.f32.mrf.mxu3 }
 0x3a7   :  { %v2655_v62 = vrot.slane %v2654_v58, 2  ;;  %v2682_v63 = vadd.f32 %v2681_v59, %v2680_v60  ;;  %v2509_v61 = vpop.f32.mrf.mxu1  ;;  %v2527_v49 = vadd.f32 %v2526_v0, %v2508_v5 }
 0x3a8   :  { %v2564_v10 = vpop.f32.mrf.mxu2  ;;  %v2510_v4 = vadd.f32 %v2509_v61, %v2491_v34 }
 0x3a9   :  { %v2656_v12 = vadd.f32 %v2655_v62, %v2654_v58  ;;  %v2683_v1 = vrot.slane %v2682_v63, 2  ;;  %v2547_v13 = vpop.f32.mrf.mxu0  ;;  %v2546_v33 = vadd.f32 %v2545_v57, %v2527_v49 }
 0x3ab   :  { %v2657_v15 = vrot.slane %v2656_v12, 1  ;;  %v2684_v16 = vadd.f32 %v2683_v1, %v2682_v63  ;;  %v2565_v36 = vadd.f32 %v2564_v10, %v2546_v33 }
 0x3ad   :  { %v2658_v2 = vadd.f32 %v2657_v15, %v2656_v12  ;;  %v2685_v17 = vrot.slane %v2684_v16, 1 }
 0x3ae   :  { %v2528_v48 = vpop.f32.mrf.mxu3 }
 0x3af   :  { %v8223_v18 = vmul.f32 0.03125, %v2658_v2  ;;  %v2686_v52 = vadd.f32 %v2685_v17, %v2684_v16  ;;  %v2512_v22 = vpop.f32.mrf.mxu1  ;;  %v2529_v29 = vadd.f32 %v2528_v48, %v2510_v4 }
 0x3b0   :  { %v2566_v21 = vpop.f32.mrf.mxu2  ;;  %v2513_v50 = vadd.f32 %v2512_v22, %v2494_v14 }
 0x3b1   :  { %v8225_v23 = vmul.f32 0.03125, %v2686_v52  ;;  %v8229_v32 = vmul.f32 %v8223_v18, %v8223_v18  ;;  %v2550_v24 = vpop.f32.mrf.mxu0  ;;  %v2548_v7 = vadd.f32 %v2547_v13, %v2529_v29 }
 0x3b3   :  { %v2700_v25 = vsub.f32 %v8225_v23, %v8229_v32  ;;  %v2567_v60 = vadd.f32 %v2566_v21, %v2548_v7 }
 0x3b6   :  { %v2531_v38 = vpop.f32.mrf.mxu3 }
 0x3b7   :  { %v2514_v35 = vpop.f32.mrf.mxu1  ;;  %v2532_v53 = vadd.f32 %v2531_v38, %v2513_v50 }
 0x3b8   :  { %v2569_v30 = vpop.f32.mrf.mxu2  ;;  %v2515_v62 = vadd.f32 %v2514_v35, %v2496_v55 }
 0x3b9   :  { %v2552_v44 = vpop.f32.mrf.mxu0  ;;  %v2551_v58 = vadd.f32 %v2550_v24, %v2532_v53  ;;  %v2702_v53 = vadd.f32 1e-05, %v2700_v25 }
 0x3bb   :  { %v2570_v43 = vadd.f32 %v2569_v30, %v2551_v58  ;;  %6562 = vrsqrt.f32 %v2702_v53  ;;  %vm2710_vm9 = vweird.f32 %v2702_v53 }
 0x3be   :  { %v2533_v27 = vpop.f32.mrf.mxu3 }
 0x3bf   :  { %v2583_v6 = vpop.f32.mrf.mxu1  ;;  %v2534_v37 = vadd.f32 %v2533_v27, %v2515_v62 }
 0x3c0   :  { %v2571_v26 = vpop.f32.mrf.mxu2  ;;  %v2584_v51 = vadd.f32 %v2583_v6, %v2565_v36 }
 0x3c1   :  { %v2621_v11 = vpop.f32.mrf.mxu0  ;;  %v2553_v13 = vadd.f32 %v2552_v44, %v2534_v37 }
 0x3c3   :  { %v2572_v17 = vadd.f32 %v2571_v26, %v2553_v13 }
 0x3c6   :  { %v2602_v8 = vpop.f32.mrf.mxu3 }
 0x3c7   :  { %v2585_v47 = vpop.f32.mrf.mxu1  ;;  %v2603_v61 = vadd.f32 %v2602_v8, %v2584_v51 }
 0x3c8   :  { %v2640_v39 = vpop.f32.mrf.mxu2  ;;  %v2586_v20 = vadd.f32 %v2585_v47, %v2567_v60 }
 0x3c9   :  { %v2623_v56 = vpop.f32.mrf.mxu0  ;;  %v2622_v31 = vadd.f32 %v2621_v11, %v2603_v61 }
 0x3cb   :  { %v8236_v10 = vadd.f32 %v2640_v39, %v2622_v31 }
 0x3cd   :  { %v2671_v35 = vmul.f32 %v8236_v10, %v8236_v10 }
 0x3ce   :  { %v2604_v41 = vpop.f32.mrf.mxu3 }
 0x3cf   :  { %v2588_v28 = vpop.f32.mrf.mxu1  ;;  %v2605_v63 = vadd.f32 %v2604_v41, %v2586_v20  ;;  %v6563_v20 = vpop.eup %6562 }
 0x3d0   :  { %v2642_v59 = vpop.f32.mrf.mxu2  ;;  %v2589_v0 = vadd.f32 %v2588_v28, %v2570_v43  ;;  %v2705_v51 = vmul.f32 %v6563_v20, %v2702_v53  ;;  %vm2711_vm6 = vweird.f32 %v6563_v20 }
 0x3d1   :  { %v2626_v12 = vpop.f32.mrf.mxu0  ;;  %v2624_v15 = vadd.f32 %v2623_v56, %v2605_v63  ;;  %vm2712_vm10 = vmor %vm2710_vm9, %vm2711_vm6 }
 0x3d2   :  { %v2706_v63 = vmul.f32 %v6563_v20, %v2705_v51 }
 0x3d3   :  { %v8234_v48 = vadd.f32 %v2642_v59, %v2624_v15 }
 0x3d4   :  { %v2707_v23 = vmul.f32 0.5, %v2706_v63 }
 0x3d5   :  { %v2673_v24 = vmul.f32 %v8234_v48, %v8234_v48  ;;  %v2659_v44 = vadd.f32 %v8234_v48, %v8236_v10 }
 0x3d6   :  { %v2607_v1 = vpop.f32.mrf.mxu3 }
 0x3d7   :  { %v2608_v57 = vadd.f32 %v2607_v1, %v2589_v0  ;;  %v2590_v2 = vpop.f32.mrf.mxu1  ;;  %v2687_v11 = vadd.f32 %v2673_v24, %v2671_v35  ;;  %v2708_v0 = vsub.f32 1.5, %v2707_v23 }
 0x3d8   :  { %v2645_v16 = vpop.f32.mrf.mxu2  ;;  %v2591_v21 = vadd.f32 %v2590_v2, %v2572_v17 }
 0x3d9   :  { %v2627_v54 = vadd.f32 %v2626_v12, %v2608_v57  ;;  %v2628_v30 = vpop.f32.mrf.mxu0  ;;  %v2709_v13 = vmul.f32 %v6563_v20, %v2708_v0 }
 0x3db   :  { %v8238_v52 = vadd.f32 %v2645_v16, %v2627_v54  ;;  %v1339_v16 = vld [vmem:[%s8685_s5] sm:$0x3]  ;;  %v2713_v54 = vsel %vm2712_vm10, %v6563_v20, %v2709_v13 }
 0x3dd   :  { %v2675_v27 = vmul.f32 %v8238_v52, %v8238_v52  ;;  %v2660_v34 = vadd.f32 %v2659_v44, %v8238_v52 }
 0x3de   :  { %v2609_v22 = vpop.f32.mrf.mxu3 }
 0x3df   :  { %v2610_v38 = vadd.f32 %v2609_v22, %v2591_v21  ;;  %v2688_v8 = vadd.f32 %v2687_v11, %v2675_v27 }
 0x3e0   :  { %v2647_v6 = vpop.f32.mrf.mxu2 }
 0x3e1   :  { %v2629_v26 = vadd.f32 %v2628_v30, %v2610_v38 }
 0x3e3   :  { %v8249_v4 = vadd.f32 %v2647_v6, %v2629_v26  ;;  %v1340_v26 = vld [vmem:[%s8686_s6] sm:$0x3] }
 0x3e5   :  { %v2661_v14 = vadd.f32 %v2660_v34, %v8249_v4  ;;  %v2677_v5 = vmul.f32 %v8249_v4, %v8249_v4 }
 0x3e7   :  { %v2662_v29 = vrot.slane %v2661_v14, 4  ;;  %v2689_v39 = vadd.f32 %v2688_v8, %v2677_v5 }
 0x3e9   :  { %v2663_v47 = vadd.f32 %v2662_v29, %v2661_v14  ;;  %v2690_v49 = vrot.slane %v2689_v39, 4 }
 0x3eb   :  { %v2664_v50 = vrot.slane %v2663_v47, 2  ;;  %v2691_v7 = vadd.f32 %v2690_v49, %v2689_v39 }
 0x3ed   :  { %v2665_v56 = vadd.f32 %v2664_v50, %v2663_v47  ;;  %v2692_v33 = vrot.slane %v2691_v7, 2 }
 0x3ef   :  { %v2666_v41 = vrot.slane %v2665_v56, 1  ;;  %v2693_v55 = vadd.f32 %v2692_v33, %v2691_v7 }
 0x3f1   :  { %v2667_v60 = vadd.f32 %v2666_v41, %v2665_v56  ;;  %v2694_v58 = vrot.slane %v2693_v55, 1 }
 0x3f3   :  { %v2669_v59 = vmul.f32 0.03125, %v2667_v60  ;;  %v2695_v28 = vadd.f32 %v2694_v58, %v2693_v55 }
 0x3f5   :  { %v2697_v36 = vmul.f32 0.03125, %v2695_v28  ;;  %v2699_v62 = vmul.f32 %v2669_v59, %v2669_v59 }
 0x3f7   :  { %v2701_v43 = vsub.f32 %v2697_v36, %v2699_v62 }
 0x3f9   :  { %v2703_v37 = vadd.f32 1e-05, %v2701_v43 }
 0x3fb   :  { %6564 = vrsqrt.f32 %v2703_v37  ;;  %vm2720_vm7 = vweird.f32 %v2703_v37 }
 0x401   :  { %v6565_v61 = vpop.eup %6564 }
 0x402   :  { %v2715_v32 = vmul.f32 %v6565_v61, %v2703_v37  ;;  %vm2721_vm4 = vweird.f32 %v6565_v61 }
 0x403   :  { %vm2722_vm8 = vmor %vm2720_vm7, %vm2721_vm4 }
 0x404   :  { %v2716_v25 = vmul.f32 %v6565_v61, %v2715_v32 }
 0x406   :  { %v2717_v12 = vmul.f32 0.5, %v2716_v25 }
 0x408   :  { %v2718_v1 = vsub.f32 1.5, %v2717_v12 }
 0x40a   :  { %v2719_v15 = vmul.f32 %v6565_v61, %v2718_v1 }
 0x40c   :  { %v2723_v57 = vsel %vm2722_vm8, %v6565_v61, %v2719_v15 }
 0x40d   :  { %v2726_v31 = vrot.slane %v2723_v57, 7 }
 0x40f   :  { %v2727_v2 = vsel %vm1129_vm12, %v2713_v54, %v2726_v31 }
 0x410   :  { %v2729_v17 = vmul.f32 %v2727_v2, %v1339_v16 }
 0x412   :  { %v2731_v21 = vperm.slane %v2729_v17, 0  ;;  %v2732_v22 = vperm.slane %v2729_v17, 1 }
 0x414   :  { %v2735_v24 = vmul.f32 %v2731_v21, %v8223_v18  ;;  %v2736_v38 = vmul.f32 %v2732_v22, %v2669_v59  ;;  %v2743_v30 = vmul.f32 %v2731_v21, %v8201_v45  ;;  %v2744_v35 = vmul.f32 %v2732_v22, %v8236_v10 }
 0x415   :  { %v2745_v44 = vmul.f32 %v2731_v21, %v8205_v46  ;;  %v2747_v27 = vmul.f32 %v2731_v21, %v8213_v40  ;;  %v2749_v11 = vmul.f32 %v2731_v21, %v8218_v42  ;;  %v2746_v18 = vmul.f32 %v2732_v22, %v8234_v48 }
 0x416   :  { %v2739_v6 = vrot.slane %v2736_v38, 7  ;;  %v2748_v10 = vmul.f32 %v2732_v22, %v8238_v52  ;;  %v2750_v46 = vmul.f32 %v2732_v22, %v8249_v4 }
 0x418   :  { %v2740_v34 = vsel %vm1129_vm12, %v2735_v24, %v2739_v6 }
 0x419   :  { %v2742_v8 = vsub.f32 %v1340_v26, %v2740_v34 }
 0x41b   :  { %v2752_v14 = vperm.slane %v2742_v8, 0  ;;  %v2753_v45 = vperm.slane %v2742_v8, 1 }
 0x41d   :  { %v2756_v5 = vadd.f32 %v2752_v14, %v2743_v30  ;;  %v2757_v40 = vadd.f32 %v2753_v45, %v2744_v35  ;;  %v2758_v29 = vadd.f32 %v2752_v14, %v2745_v44  ;;  %v2759_v39 = vadd.f32 %v2753_v45, %v2746_v18 }
 0x41e   :  { %v2760_v47 = vadd.f32 %v2752_v14, %v2747_v27  ;;  %v2761_v49 = vadd.f32 %v2753_v45, %v2748_v10  ;;  %v2762_v50 = vadd.f32 %v2752_v14, %v2749_v11  ;;  %v2763_v7 = vadd.f32 %v2753_v45, %v2750_v46 }
 0x41f   :  { %v8274_v42 = vmax.f32 %v2756_v5, 0.0  ;;  %v8276_v53 = vmax.f32 %v2757_v40, 0.0  ;;  %v8278_v56 = vmax.f32 %v2758_v29, 0.0  ;;  %v8280_v48 = vmax.f32 %v2759_v39, 0.0 }
 0x420   :  { %v8282_v33 = vmax.f32 %v2760_v47, 0.0  ;;  %v8284_v52 = vmax.f32 %v2761_v49, 0.0  ;;  %v8286_v4 = vmax.f32 %v2762_v50, 0.0  ;;  %v8288_v41 = vmax.f32 %v2763_v7, 0.0 }
 0x421   :  { %6609 = dma.done.wait [#allocation4 + $0x1], 20480 }
 0x422   :  { %6610 = vsyncadd [#allocation4 + $0x1], 4294946816  ;;  %v5512_v55 = vld [vmem:[#allocation3 + $0x70] sm:$0xf]  ;;  %v6371_v60 = vld [vmem:[#allocation3 + $0x74] sm:$0xf0] }
 0x423   :  { %v5576_v58 = vld [vmem:[#allocation3 + $0xf0] sm:$0xf]  ;;  %v5513_v59 = vor.u32 %v6371_v60, %v5512_v55  ;;  %v6387_v28 = vld [vmem:[#allocation3 + $0xf4] sm:$0xf0]  ;;  %v5504_v63 = vld [vmem:[#allocation3 + $0x60] sm:$0xf] }
 0x424   :  { %v5640_v36 = vld [vmem:[#allocation3 + $0x170] sm:$0xf]  ;;  %v6403_v62 = vld [vmem:[#allocation3 + $0x174] sm:$0xf0]  ;;  %v5577_v20 = vor.u32 %v6387_v28, %v5576_v58  ;;  %v6369_v23 = vld [vmem:[#allocation3 + $0x64] sm:$0xf0] }
 0x425   :  { %v5641_v43 = vor.u32 %v6403_v62, %v5640_v36  ;;  %v5704_v37 = vld [vmem:[#allocation3 + $0x1f0] sm:$0xf]  ;;  %v6419_v51 = vld [vmem:[#allocation3 + $0x1f4] sm:$0xf0]  ;;  %3860 = vmatpush.bf16.msra.mxu1 %v5513_v59  ;;  %v5568_v32 = vld [vmem:[#allocation3 + $0xe0] sm:$0xf]  ;;  %v5505_v0 = vor.u32 %v6369_v23, %v5504_v63 }
 0x426   :  { %v5705_v61 = vor.u32 %v6419_v51, %v5704_v37  ;;  %v6385_v25 = vld [vmem:[#allocation3 + $0xe4] sm:$0xf0]  ;;  %3879 = vmatpush.bf16.msra.mxu3 %v5577_v20  ;;  %v5632_v1 = vld [vmem:[#allocation3 + $0x160] sm:$0xf]  ;;  %v5496_v31 = vld [vmem:[#allocation3 + $0x50] sm:$0xf] }
 0x427   :  { %3898 = vmatpush.bf16.msra.mxu0 %v5641_v43  ;;  %v5569_v12 = vor.u32 %v6385_v25, %v5568_v32  ;;  %v6401_v13 = vld [vmem:[#allocation3 + $0x164] sm:$0xf0]  ;;  %v5696_v15 = vld [vmem:[#allocation3 + $0x1e0] sm:$0xf]  ;;  %v6367_v54 = vld [vmem:[#allocation3 + $0x54] sm:$0xf0] }
 0x428   :  { %3917 = vmatpush.bf16.msra.mxu2 %v5705_v61  ;;  %v5633_v57 = vor.u32 %v6401_v13, %v5632_v1  ;;  %v6417_v16 = vld [vmem:[#allocation3 + $0x1e4] sm:$0xf0]  ;;  %v5560_v17 = vld [vmem:[#allocation3 + $0xd0] sm:$0xf]  ;;  %v6383_v21 = vld [vmem:[#allocation3 + $0xd4] sm:$0xf0]  ;;  %v5497_v24 = vor.u32 %v6367_v54, %v5496_v31 }
 0x429   :  { %v5697_v2 = vor.u32 %v6417_v16, %v5696_v15  ;;  %v5624_v22 = vld [vmem:[#allocation3 + $0x150] sm:$0xf]  ;;  %3861 = vmatpush.bf16.msra.mxu1 %v5505_v0  ;;  %v6399_v38 = vld [vmem:[#allocation3 + $0x154] sm:$0xf0]  ;;  %v5561_v44 = vor.u32 %v6383_v21, %v5560_v17  ;;  %v5488_v26 = vld [vmem:[#allocation3 + $0x40] sm:$0xf] }
 0x42a   :  { %v5688_v30 = vld [vmem:[#allocation3 + $0x1d0] sm:$0xf]  ;;  %v6415_v35 = vld [vmem:[#allocation3 + $0x1d4] sm:$0xf0]  ;;  %3880 = vmatpush.bf16.msra.mxu3 %v5569_v12  ;;  %v5625_v27 = vor.u32 %v6399_v38, %v5624_v22  ;;  %v6365_v6 = vld [vmem:[#allocation3 + $0x44] sm:$0xf0] }
 0x42b   :  { %3899 = vmatpush.bf16.msra.mxu0 %v5633_v57  ;;  %v5552_v11 = vld [vmem:[#allocation3 + $0xc0] sm:$0xf]  ;;  %v5689_v34 = vor.u32 %v6415_v35, %v5688_v30  ;;  %v6381_v8 = vld [vmem:[#allocation3 + $0xc4] sm:$0xf0]  ;;  %v5489_v46 = vor.u32 %v6365_v6, %v5488_v26  ;;  %v5480_v29 = vld [vmem:[#allocation3 + $0x30] sm:$0xf] }
 0x42c   :  { %3918 = vmatpush.bf16.msra.mxu2 %v5697_v2  ;;  %v5616_v18 = vld [vmem:[#allocation3 + $0x140] sm:$0xf]  ;;  %v6397_v14 = vld [vmem:[#allocation3 + $0x144] sm:$0xf0]  ;;  %v5553_v5 = vor.u32 %v6381_v8, %v5552_v11  ;;  %v6363_v39 = vld [vmem:[#allocation3 + $0x34] sm:$0xf0] }
 0x42d   :  { %v5680_v45 = vld [vmem:[#allocation3 + $0x1c0] sm:$0xf]  ;;  %v6413_v10 = vld [vmem:[#allocation3 + $0x1c4] sm:$0xf0]  ;;  %3862 = vmatpush.bf16.msra.mxu1 %v5497_v24  ;;  %v5617_v40 = vor.u32 %v6397_v14, %v5616_v18  ;;  %v5544_v47 = vld [vmem:[#allocation3 + $0xb0] sm:$0xf]  ;;  %v5481_v59 = vor.u32 %v6363_v39, %v5480_v29 }
 0x42e   :  { %3881 = vmatpush.bf16.msra.mxu3 %v5561_v44  ;;  %v5681_v49 = vor.u32 %v6413_v10, %v5680_v45  ;;  %v6379_v50 = vld [vmem:[#allocation3 + $0xb4] sm:$0xf0]  ;;  %v5608_v7 = vld [vmem:[#allocation3 + $0x130] sm:$0xf]  ;;  %v2944_v28 = vrot.slane %v8274_v42, 6  ;;  %v2948_v36 = vrot.slane %v8278_v56, 6 }
 0x42f   :  { %3900 = vmatpush.bf16.msra.mxu0 %v5625_v27  ;;  %v6395_v55 = vld [vmem:[#allocation3 + $0x134] sm:$0xf0]  ;;  %v5672_v60 = vld [vmem:[#allocation3 + $0x1b0] sm:$0xf]  ;;  %v5545_v62 = vor.u32 %v6379_v50, %v5544_v47  ;;  %v5472_v43 = vld [vmem:[#allocation3 + $0x20] sm:$0xf] }
 0x430   :  { %3919 = vmatpush.bf16.msra.mxu2 %v5689_v34  ;;  %v6411_v58 = vld [vmem:[#allocation3 + $0x1b4] sm:$0xf0]  ;;  %v5609_v20 = vor.u32 %v6395_v55, %v5608_v7  ;;  %v6361_v37 = vld [vmem:[#allocation3 + $0x24] sm:$0xf0]  ;;  %v5536_v51 = vld [vmem:[#allocation3 + $0xa0] sm:$0xf]  ;;  %v2956_v34 = vsel %vm1357_vm14, %v2948_v36, %v2944_v28  ;;  %v2952_v7 = vsel %vm1357_vm14, %v2944_v28, %v2948_v36 }
 0x431   :  { %3863 = vmatpush.bf16.msra.mxu1 %v5489_v46  ;;  %v5673_v63 = vor.u32 %v6411_v58, %v5672_v60  ;;  %v6377_v61 = vld [vmem:[#allocation3 + $0xa4] sm:$0xf0]  ;;  %v5600_v23 = vld [vmem:[#allocation3 + $0x120] sm:$0xf]  ;;  %v2945_v12 = vrot.slane %v8276_v53, 6  ;;  %v2949_v1 = vrot.slane %v8280_v48, 6  ;;  %v5473_v13 = vor.u32 %v6361_v37, %v5472_v43 }
 0x432   :  { %3882 = vmatpush.bf16.msra.mxu3 %v5553_v5  ;;  %v6393_v32 = vld [vmem:[#allocation3 + $0x124] sm:$0xf0]  ;;  %v5664_v25 = vld [vmem:[#allocation3 + $0x1a0] sm:$0xf]  ;;  %v2936_v15 = vperm.slane %v8274_v42, 0  ;;  %v2968_v57 = vrot.slane %v8274_v42, 7  ;;  %v5537_v31 = vor.u32 %v6377_v61, %v5536_v51 }
 0x433   :  { %3901 = vmatpush.bf16.msra.mxu0 %v5617_v40  ;;  %v6409_v0 = vld [vmem:[#allocation3 + $0x1a4] sm:$0xf0]  ;;  %v2972_v16 = vrot.slane %v8278_v56, 7  ;;  %v5601_v54 = vor.u32 %v6393_v32, %v5600_v23  ;;  %v5464_v2 = vld [vmem:[#allocation3 + $0x10] sm:$0xf]  ;;  %v2969_v27 = vrot.slane %v8276_v53, 7  ;;  %v2957_v5 = vsel %vm1357_vm14, %v2949_v1, %v2945_v12 }
 0x434   :  { %3920 = vmatpush.bf16.msra.mxu2 %v5681_v49  ;;  %v6359_v17 = vld [vmem:[#allocation3 + $0x14] sm:$0xf0]  ;;  %v5528_v21 = vld [vmem:[#allocation3 + $0x90] sm:$0xf]  ;;  %v5665_v22 = vor.u32 %v6409_v0, %v5664_v25  ;;  %v2973_v26 = vrot.slane %v8280_v48, 7  ;;  %v2937_v8 = vperm.slane %v8276_v53, 0  ;;  %v2960_v55 = vsel %vm1357_vm14, %v2936_v15, %v2956_v34 }
 0x435   :  { %3864 = vmatpush.bf16.msra.mxu1 %v5481_v59  ;;  %v6375_v24 = vld [vmem:[#allocation3 + $0x94] sm:$0xf0]  ;;  %v5592_v38 = vld [vmem:[#allocation3 + $0x110] sm:$0xf]  ;;  %v5465_v6 = vor.u32 %v6359_v17, %v5464_v2  ;;  %v5456_v11 = vld [vmem:[#allocation3] sm:$0xf]  ;;  %v2980_v49 = vsel %vm756_vm3, %v2972_v16, %v2968_v57  ;;  %v2976_v37 = vsel %vm756_vm3, %v2968_v57, %v2972_v16  ;;  %v8324_v57 = vpack.c.bf16 %v2952_v7, %v2960_v55 }
 0x436   :  { %3883 = vmatpush.bf16.msra.mxu3 %v5545_v62  ;;  %v6391_v30 = vld [vmem:[#allocation3 + $0x114] sm:$0xf0]  ;;  %v5656_v35 = vld [vmem:[#allocation3 + $0x190] sm:$0xf]  ;;  %v5529_v18 = vor.u32 %v6375_v24, %v5528_v21  ;;  %v6357_v45 = vld [vmem:[#allocation3 + $0x4] sm:$0xf0]  ;;  %v2981_v60 = vsel %vm756_vm3, %v2973_v26, %v2969_v27  ;;  %v2961_v43 = vsel %vm1357_vm14, %v2937_v8, %v2957_v5  ;;  %v2984_v61 = vsel %vm756_vm3, %v2936_v15, %v2980_v49 }
 0x437   :  { %3902 = vmatpush.bf16.msra.mxu0 %v5609_v20  ;;  %v6407_v44 = vld [vmem:[#allocation3 + $0x194] sm:$0xf0]  ;;  %v5593_v14 = vor.u32 %v6391_v30, %v5592_v38  ;;  %v5520_v10 = vld [vmem:[#allocation3 + $0x80] sm:$0xf]  ;;  %v6373_v46 = vld [vmem:[#allocation3 + $0x84] sm:$0xf0]  ;;  %v5457_v62 = vor.u32 %v6357_v45, %v5456_v11  ;;  %v2953_v20 = vsel %vm1357_vm14, %v2945_v12, %v2949_v1  ;;  %v2977_v32 = vsel %vm756_vm3, %v2969_v27, %v2973_v26 }
 0x438   :  { %3921 = vmatpush.bf16.msra.mxu2 %v5673_v63  ;;  %v5657_v40 = vor.u32 %v6407_v44, %v5656_v35  ;;  %v5584_v29 = vld [vmem:[#allocation3 + $0x100] sm:$0xf]  ;;  %v6389_v39 = vld [vmem:[#allocation3 + $0x104] sm:$0xf0]  ;;  %v5768_v58 = vld [vmem:[#allocation3 + $0x270] sm:$0xf]  ;;  %v5521_v51 = vor.u32 %v6373_v46, %v5520_v10  ;;  %v2985_v25 = vsel %vm756_vm3, %v2937_v8, %v2981_v60  ;;  %v8326_v15 = vpack.c.bf16 %v2953_v20, %v2961_v43 }
 0x439   :  { %3865 = vmatpush.bf16.msra.mxu1 %v5473_v13  ;;  %v5648_v47 = vld [vmem:[#allocation3 + $0x180] sm:$0xf]  ;;  %v6405_v50 = vld [vmem:[#allocation3 + $0x184] sm:$0xf0]  ;;  %v6435_v59 = vld [vmem:[#allocation3 + $0x274] sm:$0xf0]  ;;  %v5585_v63 = vor.u32 %v6389_v39, %v5584_v29  ;;  %v8328_v17 = vpack.c.bf16 %v2976_v37, %v2984_v61  ;;  %v8330_v24 = vpack.c.bf16 %v2977_v32, %v2985_v25 }
 0x43a   :  { %3884 = vmatpush.bf16.msra.mxu3 %v5537_v31  ;;  %v5832_v28 = vld [vmem:[#allocation3 + $0x2f0] sm:$0xf]  ;;  %v6451_v36 = vld [vmem:[#allocation3 + $0x2f4] sm:$0xf0]  ;;  %v5649_v23 = vor.u32 %v6405_v50, %v5648_v47  ;;  %v5769_v0 = vor.u32 %v6435_v59, %v5768_v58  ;;  %v6433_v2 = vld [vmem:[#allocation3 + $0x264] sm:$0xf0] }
 0x43b   :  { %3903 = vmatpush.bf16.msra.mxu0 %v5601_v54  ;;  %v5896_v12 = vld [vmem:[#allocation3 + $0x370] sm:$0xf]  ;;  %v6467_v1 = vld [vmem:[#allocation3 + $0x374] sm:$0xf0]  ;;  %v5833_v16 = vor.u32 %v6451_v36, %v5832_v28  ;;  %v5760_v54 = vld [vmem:[#allocation3 + $0x260] sm:$0xf] }
 0x43c   :  { %3922 = vmatpush.bf16.msra.mxu2 %v5665_v22  ;;  %v5960_v13 = vld [vmem:[#allocation3 + $0x3f0] sm:$0xf]  ;;  %v6483_v31 = vld [vmem:[#allocation3 + $0x3f4] sm:$0xf0]  ;;  %v5824_v21 = vld [vmem:[#allocation3 + $0x2e0] sm:$0xf]  ;;  %v5897_v38 = vor.u32 %v6467_v1, %v5896_v12  ;;  %v5761_v26 = vor.u32 %v6433_v2, %v5760_v54 }
 0x43d   :  { %3866 = vmatpush.bf16.msra.mxu1 %v5465_v6  ;;  %v6449_v22 = vld [vmem:[#allocation3 + $0x2e4] sm:$0xf0]  ;;  %v5888_v30 = vld [vmem:[#allocation3 + $0x360] sm:$0xf]  ;;  %v5961_v27 = vor.u32 %v6483_v31, %v5960_v13  ;;  %v5752_v11 = vld [vmem:[#allocation3 + $0x250] sm:$0xf] }
 0x43e   :  { %3885 = vmatpush.bf16.msra.mxu3 %v5529_v18  ;;  %v6465_v35 = vld [vmem:[#allocation3 + $0x364] sm:$0xf0]  ;;  %v5952_v44 = vld [vmem:[#allocation3 + $0x3e0] sm:$0xf]  ;;  %v6431_v34 = vld [vmem:[#allocation3 + $0x254] sm:$0xf0]  ;;  %v5825_v8 = vor.u32 %v6449_v22, %v5824_v21 }
 0x43f   :  { %3904 = vmatpush.bf16.msra.mxu0 %v5593_v14  ;;  %v6481_v6 = vld [vmem:[#allocation3 + $0x3e4] sm:$0xf0]  ;;  %v5816_v18 = vld [vmem:[#allocation3 + $0x2d0] sm:$0xf]  ;;  %v6447_v14 = vld [vmem:[#allocation3 + $0x2d4] sm:$0xf0]  ;;  %v5889_v45 = vor.u32 %v6465_v35, %v5888_v30  ;;  %v5753_v29 = vor.u32 %v6431_v34, %v5752_v11 }
 0x440   :  { %3923 = vmatpush.bf16.msra.mxu2 %v5657_v40  ;;  %v5880_v10 = vld [vmem:[#allocation3 + $0x350] sm:$0xf]  ;;  %v6463_v46 = vld [vmem:[#allocation3 + $0x354] sm:$0xf0]  ;;  %v5953_v40 = vor.u32 %v6481_v6, %v5952_v44  ;;  %v5744_v47 = vld [vmem:[#allocation3 + $0x240] sm:$0xf] }
 0x441   :  { %3867 = vmatpush.bf16.msra.mxu1 %v5457_v62  ;;  %v5944_v5 = vld [vmem:[#allocation3 + $0x3d0] sm:$0xf]  ;;  %v6479_v39 = vld [vmem:[#allocation3 + $0x3d4] sm:$0xf0]  ;;  %v2946_v49 = vrot.slane %v8282_v33, 6  ;;  %v2950_v50 = vrot.slane %v8286_v4, 6  ;;  %v5817_v62 = vor.u32 %v6447_v14, %v5816_v18  ;;  %v5881_v61 = vor.u32 %v6463_v46, %v5880_v10 }
 0x442   :  { %3886 = vmatpush.bf16.msra.mxu3 %v5521_v51  ;;  %v6429_v7 = vld [vmem:[#allocation3 + $0x244] sm:$0xf0]  ;;  %v2947_v55 = vrot.slane %v8284_v52, 6  ;;  %v2951_v60 = vrot.slane %v8288_v41, 6  ;;  %v2970_v58 = vrot.slane %v8282_v33, 7  ;;  %v2974_v59 = vrot.slane %v8286_v4, 7 }
 0x443   :  { %3905 = vmatpush.bf16.msra.mxu0 %v5585_v63  ;;  %v5808_v20 = vld [vmem:[#allocation3 + $0x2c0] sm:$0xf]  ;;  %v6445_v43 = vld [vmem:[#allocation3 + $0x2c4] sm:$0xf0]  ;;  %v2971_v37 = vrot.slane %v8284_v52, 7  ;;  %v2975_v28 = vrot.slane %v8288_v41, 7  ;;  %v5745_v1 = vor.u32 %v6429_v7, %v5744_v47  ;;  %v2954_v30 = vsel %vm1357_vm14, %v2946_v49, %v2950_v50 }
 0x444   :  { %3924 = vmatpush.bf16.msra.mxu2 %v5649_v23  ;;  %3868 = vmatmul.bf16.vlgmr.msra.gmra.mxu1 %v8324_v57  ;;  %v5872_v36 = vld [vmem:[#allocation3 + $0x340] sm:$0xf]  ;;  %v6461_v51 = vld [vmem:[#allocation3 + $0x344] sm:$0xf0]  ;;  %v2938_v63 = vperm.slane %v8282_v33, 0  ;;  %v5945_v23 = vor.u32 %v6479_v39, %v5944_v5  ;;  %v2939_v12 = vperm.slane %v8284_v52, 0  ;;  %v2959_v13 = vsel %vm1357_vm14, %v2951_v60, %v2947_v55 }
 0x445   :  { %3936 = vmatpush.bf16.msrb.mxu1 %v5769_v0  ;;  %3887 = vmatmul.bf16.vlgmr.msra.gmra.mxu3 %v8326_v15  ;;  %v5936_v32 = vld [vmem:[#allocation3 + $0x3c0] sm:$0xf]  ;;  %v6477_v25 = vld [vmem:[#allocation3 + $0x3c4] sm:$0xf0]  ;;  %v2958_v0 = vsel %vm1357_vm14, %v2950_v50, %v2946_v49  ;;  %v5809_v31 = vor.u32 %v6445_v43, %v5808_v20  ;;  %v2983_v54 = vsel %vm756_vm3, %v2975_v28, %v2971_v37  ;;  %v5736_v2 = vld [vmem:[#allocation3 + $0x230] sm:$0xf] }
 0x446   :  { %3955 = vmatpush.bf16.msrb.mxu3 %v5833_v16  ;;  %3906 = vmatmul.bf16.vlgmr.msra.gmra.mxu0 %v8328_v17  ;;  %v2982_v16 = vsel %vm756_vm3, %v2974_v59, %v2970_v58  ;;  %v6427_v21 = vld [vmem:[#allocation3 + $0x234] sm:$0xf0]  ;;  %v5873_v22 = vor.u32 %v6461_v51, %v5872_v36  ;;  %v2964_v35 = vsel %vm1357_vm14, %v2938_v63, %v2958_v0  ;;  %v5800_v44 = vld [vmem:[#allocation3 + $0x2b0] sm:$0xf]  ;;  %v5728_v39 = vld [vmem:[#allocation3 + $0x220] sm:$0xf] }
 0x447   :  { %3925 = vmatmul.bf16.vlgmr.msra.gmra.mxu2 %v8330_v24  ;;  %3974 = vmatpush.bf16.msrb.mxu0 %v5897_v38  ;;  %v5937_v38 = vor.u32 %v6477_v25, %v5936_v32  ;;  %v2965_v6 = vsel %vm1357_vm14, %v2939_v12, %v2959_v13  ;;  %v2978_v11 = vsel %vm756_vm3, %v2970_v58, %v2974_v59  ;;  %v6459_v10 = vld [vmem:[#allocation3 + $0x334] sm:$0xf0]  ;;  %v5928_v46 = vld [vmem:[#allocation3 + $0x3b0] sm:$0xf]  ;;  %v6425_v47 = vld [vmem:[#allocation3 + $0x224] sm:$0xf0] }
 0x448   :  { %3993 = vmatpush.bf16.msrb.mxu2 %v5961_v27  ;;  %v6443_v27 = vld [vmem:[#allocation3 + $0x2b4] sm:$0xf0]  ;;  %v2988_v34 = vsel %vm756_vm3, %v2938_v63, %v2982_v16  ;;  %v2989_v18 = vsel %vm756_vm3, %v2939_v12, %v2983_v54  ;;  %v5737_v14 = vor.u32 %v6427_v21, %v5736_v2  ;;  %v8370_v5 = vpack.c.bf16 %v2954_v30, %v2964_v35  ;;  %v5792_v7 = vld [vmem:[#allocation3 + $0x2a0] sm:$0xf]  ;;  %v6457_v43 = vld [vmem:[#allocation3 + $0x324] sm:$0xf0] }
 0x449   :  { %3937 = vmatpush.bf16.msrb.mxu1 %v5761_v26  ;;  %v2955_v26 = vsel %vm1357_vm14, %v2947_v55, %v2951_v60  ;;  %v8374_v50 = vpack.c.bf16 %v2978_v11, %v2988_v34  ;;  %v6441_v55 = vld [vmem:[#allocation3 + $0x2a4] sm:$0xf0]  ;;  %v5856_v20 = vld [vmem:[#allocation3 + $0x320] sm:$0xf]  ;;  %v5720_v51 = vld [vmem:[#allocation3 + $0x210] sm:$0xf] }
 0x44a   :  { %3956 = vmatpush.bf16.msrb.mxu3 %v5825_v8  ;;  %v2979_v8 = vsel %vm756_vm3, %v2971_v37, %v2975_v28  ;;  %v8372_v49 = vpack.c.bf16 %v2955_v26, %v2965_v6  ;;  %v5920_v37 = vld [vmem:[#allocation3 + $0x3a0] sm:$0xf]  ;;  %v5793_v28 = vor.u32 %v6441_v55, %v5792_v7  ;;  %v6473_v36 = vld [vmem:[#allocation3 + $0x3a4] sm:$0xf0]  ;;  %v6423_v63 = vld [vmem:[#allocation3 + $0x214] sm:$0xf0]  ;;  %v5857_v25 = vor.u32 %v6457_v43, %v5856_v20 }
 0x44b   :  { %3975 = vmatpush.bf16.msrb.mxu0 %v5889_v45  ;;  %v5864_v45 = vld [vmem:[#allocation3 + $0x330] sm:$0xf]  ;;  %v8376_v60 = vpack.c.bf16 %v2979_v8, %v2989_v18  ;;  %v6455_v0 = vld [vmem:[#allocation3 + $0x314] sm:$0xf0]  ;;  %v5921_v13 = vor.u32 %v6473_v36, %v5920_v37  ;;  %v5721_v16 = vor.u32 %v6423_v63, %v5720_v51  ;;  %v6421_v54 = vld [vmem:[#allocation3 + $0x204] sm:$0xf0] }
 0x44c   :  { %3994 = vmatpush.bf16.msrb.mxu2 %v5953_v40  ;;  %v5801_v40 = vor.u32 %v6443_v27, %v5800_v44  ;;  %v5865_v58 = vor.u32 %v6459_v10, %v5864_v45  ;;  %v5848_v32 = vld [vmem:[#allocation3 + $0x310] sm:$0xf]  ;;  %v2992_v2 = vrot.slane %v8274_v42, 1  ;;  %v2996_v21 = vrot.slane %v8278_v56, 1  ;;  %v6437_v30 = vld [vmem:[#allocation3 + $0x284] sm:$0xf0] }
 0x44d   :  { %3938 = vmatpush.bf16.msrb.mxu1 %v5753_v29  ;;  %v6475_v29 = vld [vmem:[#allocation3 + $0x3b4] sm:$0xf0]  ;;  %v5912_v12 = vld [vmem:[#allocation3 + $0x390] sm:$0xf]  ;;  %v2993_v35 = vrot.slane %v8276_v53, 1  ;;  %v2997_v44 = vrot.slane %v8280_v48, 1  ;;  %v5849_v34 = vor.u32 %v6455_v0, %v5848_v32 }
 0x44e   :  { %3957 = vmatpush.bf16.msrb.mxu3 %v5817_v62  ;;  %v5929_v59 = vor.u32 %v6475_v29, %v5928_v46  ;;  %v5729_v62 = vor.u32 %v6425_v47, %v5728_v39  ;;  %v5840_v27 = vld [vmem:[#allocation3 + $0x300] sm:$0xf]  ;;  %v6453_v26 = vld [vmem:[#allocation3 + $0x304] sm:$0xf0]  ;;  %v6024_v6 = vld [vmem:[#allocation3 + $0x470] sm:$0xf]  ;;  %v3004_v29 = vsel %vm770_vm0, %v2996_v21, %v2992_v2  ;;  %v3000_v36 = vsel %vm770_vm0, %v2992_v2, %v2996_v21 }
 0x44f   :  { %3976 = vmatpush.bf16.msrb.mxu0 %v5881_v61  ;;  %v5784_v61 = vld [vmem:[#allocation3 + $0x290] sm:$0xf]  ;;  %v6499_v11 = vld [vmem:[#allocation3 + $0x474] sm:$0xf0]  ;;  %v2940_v8 = vperm.slane %v8278_v56, 7  ;;  %v2941_v39 = vperm.slane %v8280_v48, 7  ;;  %v3005_v7 = vsel %vm770_vm0, %v2997_v44, %v2993_v35  ;;  %v5841_v37 = vor.u32 %v6453_v26, %v5840_v27 }
 0x450   :  { %3995 = vmatpush.bf16.msrb.mxu2 %v5945_v23  ;;  %v6439_v23 = vld [vmem:[#allocation3 + $0x294] sm:$0xf0]  ;;  %v6088_v18 = vld [vmem:[#allocation3 + $0x4f0] sm:$0xf]  ;;  %v5904_v46 = vld [vmem:[#allocation3 + $0x380] sm:$0xf]  ;;  %v6025_v55 = vor.u32 %v6499_v11, %v6024_v6  ;;  %v3001_v63 = vsel %vm770_vm0, %v2993_v35, %v2997_v44 }
 0x451   :  { %3939 = vmatpush.bf16.msrb.mxu1 %v5745_v1  ;;  %v6471_v1 = vld [vmem:[#allocation3 + $0x394] sm:$0xf0]  ;;  %v6386_v20 = vld [vmem:[#allocation3 + $0xf4] sm:$0xf]  ;;  %v5578_v43 = vld [vmem:[#allocation3 + $0xf8] sm:$0xf0]  ;;  %v3010_v51 = vsel %vm776_vm1, %v2940_v8, %v3004_v29 }
 0x452   :  { %3958 = vmatpush.bf16.msrb.mxu3 %v5809_v31  ;;  %v5712_v31 = vld [vmem:[#allocation3 + $0x200] sm:$0xf]  ;;  %v5913_v45 = vor.u32 %v6471_v1, %v5912_v12  ;;  %v8406_v12 = vpack.c.bf16 %v8278_v56, %v8274_v42  ;;  %v5581_v1 = vor.u32 %v6386_v20, %v5578_v43  ;;  %v8412_v2 = vpack.c.bf16 %v3010_v51, %v3000_v36  ;;  %v6384_v21 = vld [vmem:[#allocation3 + $0xe4] sm:$0xf]  ;;  %v6008_v27 = vld [vmem:[#allocation3 + $0x450] sm:$0xf] }
 0x453   :  { %3977 = vmatpush.bf16.msrb.mxu0 %v5873_v22  ;;  %v5785_v22 = vor.u32 %v6439_v23, %v5784_v61  ;;  %v5713_v10 = vor.u32 %v6421_v54, %v5712_v31  ;;  %v3011_v61 = vsel %vm776_vm1, %v2941_v39, %v3005_v7  ;;  %v6016_v32 = vld [vmem:[#allocation3 + $0x460] sm:$0xf]  ;;  %v5506_v31 = vld [vmem:[#allocation3 + $0x68] sm:$0xf0]  ;;  %v8410_v54 = vpack.c.bf16 %v8280_v48, %v8276_v53  ;;  %v6495_v26 = vld [vmem:[#allocation3 + $0x454] sm:$0xf0] }
 0x454   :  { %3996 = vmatpush.bf16.msrb.mxu2 %v5937_v38  ;;  %3873 = vmatmul.bf16.gmra.mxu1 %v8370_v5  ;;  %v5776_v38 = vld [vmem:[#allocation3 + $0x280] sm:$0xf]  ;;  %v6072_v6 = vld [vmem:[#allocation3 + $0x4d0] sm:$0xf]  ;;  %v6493_v29 = vld [vmem:[#allocation3 + $0x444] sm:$0xf0] }
 0x455   :  { %3940 = vmatpush.bf16.msrb.mxu1 %v5737_v14  ;;  %3892 = vmatmul.bf16.gmra.mxu3 %v8372_v49  ;;  %v6515_v14 = vld [vmem:[#allocation3 + $0x4f4] sm:$0xf0]  ;;  %v5777_v47 = vor.u32 %v6437_v30, %v5776_v38  ;;  %v6080_v0 = vld [vmem:[#allocation3 + $0x4e0] sm:$0xf]  ;;  %v8414_v38 = vpack.c.bf16 %v3011_v61, %v3001_v63  ;;  %v6364_v43 = vld [vmem:[#allocation3 + $0x44] sm:$0xf] }
 0x456   :  { %3959 = vmatpush.bf16.msrb.mxu3 %v5801_v40  ;;  %3911 = vmatmul.bf16.gmra.mxu0 %v8374_v50  ;;  %v6469_v40 = vld [vmem:[#allocation3 + $0x384] sm:$0xf0]  ;;  %v2999_v36 = vrot.slane %v8288_v41, 1  ;;  %v6380_v51 = vld [vmem:[#allocation3 + $0xc4] sm:$0xf]  ;;  %s4673_s19 = sshll.u32 %s8692_s12, 4  ;;  %s4674_s19 = int_to_ptr.hbm [resolvable:$true] %s4673_s19 }
 0x457   :  { %3930 = vmatmul.bf16.gmra.mxu2 %v8376_v60  ;;  %3978 = vmatpush.bf16.msrb.mxu0 %v5865_v58  ;;  %v6370_v58 = vld [vmem:[#allocation3 + $0x74] sm:$0xf]  ;;  %v5554_v63 = vld [vmem:[#allocation3 + $0xc8] sm:$0xf0]  ;;  %s6617_s7 = smov 128   ;;  %s6618_s20 = smov 8  }
 0x458   :  { %3997 = vmatpush.bf16.msrb.mxu2 %v5929_v59  ;;  %v5514_v59 = vld [vmem:[#allocation3 + $0x78] sm:$0xf0] }
 0x459   :  { %3941 = vmatpush.bf16.msrb.mxu1 %v5729_v62  ;;  %v6089_v62 = vor.u32 %v6515_v14, %v6088_v18  ;;  %v5517_v23 = vor.u32 %v6370_v58, %v5514_v59  ;;  %v6366_v18 = vld [vmem:[#allocation3 + $0x54] sm:$0xf]  ;;  %v5498_v14 = vld [vmem:[#allocation3 + $0x58] sm:$0xf0]  ;;  %v6509_v58 = vld [vmem:[#allocation3 + $0x4c4] sm:$0xf0] }
 0x45a   :  { %3960 = vmatpush.bf16.msrb.mxu3 %v5793_v28  ;;  %v5905_v28 = vor.u32 %v6469_v40, %v5904_v46  ;;  %v6009_v46 = vor.u32 %v6495_v26, %v6008_v27  ;;  %v6000_v40 = vld [vmem:[#allocation3 + $0x440] sm:$0xf]  ;;  %v5501_v7 = vor.u32 %v6366_v18, %v5498_v14  ;;  %v2994_v59 = vrot.slane %v8282_v33, 1  ;;  %v6378_v27 = vld [vmem:[#allocation3 + $0xb4] sm:$0xf] }
 0x45b   :  { %3979 = vmatpush.bf16.msrb.mxu0 %v5857_v25  ;;  %v6497_v25 = vld [vmem:[#allocation3 + $0x464] sm:$0xf0]  ;;  %v6001_v61 = vor.u32 %v6493_v29, %v6000_v40  ;;  %v5546_v26 = vld [vmem:[#allocation3 + $0xb8] sm:$0xf0]  ;;  %v6048_v29 = vld [vmem:[#allocation3 + $0x4a0] sm:$0xf] }
 0x45c   :  { %3998 = vmatpush.bf16.msrb.mxu2 %v5921_v13  ;;  %v6513_v13 = vld [vmem:[#allocation3 + $0x4e4] sm:$0xf0]  ;;  %v6017_v30 = vor.u32 %v6497_v25, %v6016_v32  ;;  %v2943_v32 = vperm.slane %v8288_v41, 7 }
 0x45d   :  { %3942 = vmatpush.bf16.msrb.mxu1 %v5721_v16  ;;  %v6368_v16 = vld [vmem:[#allocation3 + $0x64] sm:$0xf]  ;;  %v6081_v35 = vor.u32 %v6513_v13, %v6080_v0  ;;  %v5992_v13 = vld [vmem:[#allocation3 + $0x430] sm:$0xf]  ;;  %v6489_v40 = vld [vmem:[#allocation3 + $0x424] sm:$0xf0] }
 0x45e   :  { %3961 = vmatpush.bf16.msrb.mxu3 %v5785_v22  ;;  %v5570_v22 = vld [vmem:[#allocation3 + $0xe8] sm:$0xf0]  ;;  %v5509_v44 = vor.u32 %v6368_v16, %v5506_v31  ;;  %v6491_v16 = vld [vmem:[#allocation3 + $0x434] sm:$0xf0]  ;;  %v6056_v31 = vld [vmem:[#allocation3 + $0x4b0] sm:$0xf] }
 0x45f   :  { %3980 = vmatpush.bf16.msrb.mxu0 %v5849_v34  ;;  %v5573_v11 = vor.u32 %v6384_v21, %v5570_v22  ;;  %v6511_v34 = vld [vmem:[#allocation3 + $0x4d4] sm:$0xf0]  ;;  %v5557_v21 = vor.u32 %v6380_v51, %v5554_v63  ;;  %v5993_v18 = vor.u32 %v6491_v16, %v5992_v13  ;;  %v5976_v51 = vld [vmem:[#allocation3 + $0x410] sm:$0xf]  ;;  %v6358_v16 = vld [vmem:[#allocation3 + $0x14] sm:$0xf] }
 0x460   :  { %3999 = vmatpush.bf16.msrb.mxu2 %v5913_v45  ;;  %v6382_v45 = vld [vmem:[#allocation3 + $0xd4] sm:$0xf]  ;;  %v6503_v13 = vld [vmem:[#allocation3 + $0x494] sm:$0xf0] }
 0x461   :  { %3943 = vmatpush.bf16.msrb.mxu1 %v5713_v10  ;;  %v5562_v10 = vld [vmem:[#allocation3 + $0xd8] sm:$0xf0] }
 0x462   :  { %3962 = vmatpush.bf16.msrb.mxu3 %v5777_v47  ;;  %v6073_v47 = vor.u32 %v6511_v34, %v6072_v6  ;;  %v5565_v20 = vor.u32 %v6382_v45, %v5562_v10 }
 0x463   :  { %3981 = vmatpush.bf16.msrb.mxu0 %v5841_v37  ;;  %v5490_v37 = vld [vmem:[#allocation3 + $0x48] sm:$0xf0] }
 0x464   :  { %4000 = vmatpush.bf16.msrb.mxu2 %v5905_v28  ;;  %3944 = vmatmul.bf16.vlgmr.msrb.gmra.mxu1 %v8406_v12  ;;  %v2995_v28 = vrot.slane %v8284_v52, 1  ;;  %v5493_v0 = vor.u32 %v6364_v43, %v5490_v37  ;;  %v6376_v43 = vld [vmem:[#allocation3 + $0xa4] sm:$0xf]  ;;  %v5538_v37 = vld [vmem:[#allocation3 + $0xa8] sm:$0xf0] }
 0x465   :  { %4012 = vmatpush.bf16.msra.mxu1 %v6025_v55  ;;  %3963 = vmatmul.bf16.vlgmr.msrb.gmra.mxu3 %v8410_v54  ;;  %v6064_v55 = vld [vmem:[#allocation3 + $0x4c0] sm:$0xf] }
 0x466   :  { %4031 = vmatpush.bf16.msra.mxu3 %v6089_v62  ;;  %3982 = vmatmul.bf16.vlgmr.msrb.gmra.mxu0 %v8412_v2  ;;  %v2998_v62 = vrot.slane %v8286_v4, 1  ;;  %v6065_v25 = vor.u32 %v6509_v58, %v6064_v55  ;;  %v3007_v22 = vsel %vm770_vm0, %v2999_v36, %v2995_v28  ;;  %v3003_v34 = vsel %vm770_vm0, %v2995_v28, %v2999_v36  ;;  %v6505_v55 = vld [vmem:[#allocation3 + $0x4a4] sm:$0xf0]  ;;  %v6360_v58 = vld [vmem:[#allocation3 + $0x24] sm:$0xf] }
 0x467   :  { %4050 = vmatpush.bf16.msra.mxu0 %v5517_v23  ;;  %4001 = vmatmul.bf16.vlgmr.msrb.gmra.mxu2 %v8414_v38  ;;  %v2942_v23 = vperm.slane %v8286_v4, 7  ;;  %v3015_v14 = vsel %vm776_vm1, %v2943_v32, %v3007_v22  ;;  %v6049_v63 = vor.u32 %v6505_v55, %v6048_v29  ;;  %v5530_v22 = vld [vmem:[#allocation3 + $0x98] sm:$0xf0]  ;;  %v6372_v29 = vld [vmem:[#allocation3 + $0x84] sm:$0xf] }
 0x468   :  { %4069 = vmatpush.bf16.msra.mxu2 %v5581_v1  ;;  %v3006_v1 = vsel %vm770_vm0, %v2998_v62, %v2994_v59  ;;  %v3002_v6 = vsel %vm770_vm0, %v2994_v59, %v2998_v62  ;;  %v5474_v59 = vld [vmem:[#allocation3 + $0x28] sm:$0xf0]  ;;  %v8448_v62 = vpack.c.bf16 %v8288_v41, %v8284_v52  ;;  %v8452_v28 = vpack.c.bf16 %v3015_v14, %v3003_v34  ;;  %v6356_v14 = vld [vmem:[#allocation3 + $0x4] sm:$0xf]  ;;  %v6402_v55 = vld [vmem:[#allocation3 + $0x174] sm:$0xf] }
 0x469   :  { %4013 = vmatpush.bf16.msra.mxu1 %v6017_v30  ;;  %v6507_v30 = vld [vmem:[#allocation3 + $0x4b4] sm:$0xf0] }
 0x46a   :  { %4032 = vmatpush.bf16.msra.mxu3 %v6081_v35  ;;  %v6362_v35 = vld [vmem:[#allocation3 + $0x34] sm:$0xf]  ;;  %v6057_v45 = vor.u32 %v6507_v30, %v6056_v31  ;;  %v5466_v31 = vld [vmem:[#allocation3 + $0x18] sm:$0xf0]  ;;  %v5968_v30 = vld [vmem:[#allocation3 + $0x400] sm:$0xf] }
 0x46b   :  { %4051 = vmatpush.bf16.msra.mxu0 %v5509_v44  ;;  %v5482_v44 = vld [vmem:[#allocation3 + $0x38] sm:$0xf0]  ;;  %v5469_v34 = vor.u32 %v6358_v16, %v5466_v31 }
 0x46c   :  { %4070 = vmatpush.bf16.msra.mxu2 %v5573_v11  ;;  %v3014_v11 = vsel %vm776_vm1, %v2942_v23, %v3006_v1  ;;  %v5485_v10 = vor.u32 %v6362_v35, %v5482_v44  ;;  %v5541_v1 = vor.u32 %v6376_v43, %v5538_v37  ;;  %v6485_v44 = vld [vmem:[#allocation3 + $0x404] sm:$0xf0]  ;;  %v5706_v37 = vld [vmem:[#allocation3 + $0x1f8] sm:$0xf0] }
 0x46d   :  { %4014 = vmatpush.bf16.msra.mxu1 %v6009_v46  ;;  %v5984_v46 = vld [vmem:[#allocation3 + $0x420] sm:$0xf] }
 0x46e   :  { %4033 = vmatpush.bf16.msra.mxu3 %v6073_v47  ;;  %v8444_v47 = vpack.c.bf16 %v8286_v4, %v8282_v33  ;;  %v5985_v36 = vor.u32 %v6489_v40, %v5984_v46  ;;  %v5458_v40 = vld [vmem:[#allocation3 + $0x8] sm:$0xf0] }
 0x46f   :  { %4052 = vmatpush.bf16.msra.mxu0 %v5501_v7  ;;  %v5549_v7 = vor.u32 %v6378_v27, %v5546_v26  ;;  %v6032_v27 = vld [vmem:[#allocation3 + $0x480] sm:$0xf]  ;;  %v3016_v26 = vrot.slane %v8274_v42, 2  ;;  %v6418_v42 = vld [vmem:[#allocation3 + $0x1f4] sm:$0xf] }
 0x470   :  { %4071 = vmatpush.bf16.msra.mxu2 %v5565_v20  ;;  %v8450_v20 = vpack.c.bf16 %v3014_v11, %v3002_v6  ;;  %v3020_v6 = vrot.slane %v8278_v56, 2  ;;  %v6416_v56 = vld [vmem:[#allocation3 + $0x1e4] sm:$0xf] }
 0x471   :  { %4015 = vmatpush.bf16.msra.mxu1 %v6001_v61  ;;  %v5477_v61 = vor.u32 %v6360_v58, %v5474_v59  ;;  %v5642_v58 = vld [vmem:[#allocation3 + $0x178] sm:$0xf0]  ;;  %v5969_v59 = vor.u32 %v6485_v44, %v5968_v30 }
 0x472   :  { %4034 = vmatpush.bf16.msra.mxu3 %v6065_v25  ;;  %v6487_v25 = vld [vmem:[#allocation3 + $0x414] sm:$0xf0]  ;;  %v3028_v43 = vsel %vm1431_vm15, %v3020_v6, %v3016_v26  ;;  %v3024_v16 = vsel %vm1431_vm15, %v3016_v26, %v3020_v6  ;;  %v5634_v26 = vld [vmem:[#allocation3 + $0x168] sm:$0xf0] }
 0x473   :  { %4053 = vmatpush.bf16.msra.mxu0 %v5493_v0  ;;  %v6040_v0 = vld [vmem:[#allocation3 + $0x490] sm:$0xf]  ;;  %v5977_v35 = vor.u32 %v6487_v25, %v5976_v51  ;;  %v5770_v51 = vld [vmem:[#allocation3 + $0x278] sm:$0xf0]  ;;  %v6450_v25 = vld [vmem:[#allocation3 + $0x2f4] sm:$0xf]  ;;  %v3034_v31 = vsel %vm1441_vm2, %v2940_v8, %v3028_v43 }
 0x474   :  { %4072 = vmatpush.bf16.msra.mxu2 %v5557_v21  ;;  %3949 = vmatmul.bf16.gmra.mxu1 %v8444_v47  ;;  %v6374_v21 = vld [vmem:[#allocation3 + $0x94] sm:$0xf]  ;;  %v6041_v11 = vor.u32 %v6503_v13, %v6040_v0  ;;  %v5834_v0 = vld [vmem:[#allocation3 + $0x2f8] sm:$0xf0]  ;;  %v5645_v13 = vor.u32 %v6402_v55, %v5642_v58  ;;  %v8478_v6 = vpack.c.bf16 %v3034_v31, %v3024_v16  ;;  %v5698_v8 = vld [vmem:[#allocation3 + $0x1e8] sm:$0xf0] }
 0x475   :  { %4016 = vmatpush.bf16.msra.mxu1 %v5993_v18  ;;  %3968 = vmatmul.bf16.gmra.mxu3 %v8448_v62  ;;  %v6501_v18 = vld [vmem:[#allocation3 + $0x484] sm:$0xf0]  ;;  %v5533_v46 = vor.u32 %v6374_v21, %v5530_v22  ;;  %v5709_v21 = vor.u32 %v6418_v42, %v5706_v37  ;;  %v5837_v44 = vor.u32 %v6450_v25, %v5834_v0  ;;  %v5690_v55 = vld [vmem:[#allocation3 + $0x1d8] sm:$0xf0]  ;;  %v6430_v58 = vld [vmem:[#allocation3 + $0x254] sm:$0xf] }
 0x476   :  { %4035 = vmatpush.bf16.msra.mxu3 %v6057_v45  ;;  %3987 = vmatmul.bf16.gmra.mxu0 %v8450_v20  ;;  %v3017_v45 = vrot.slane %v8276_v53, 2  ;;  %v6033_v53 = vor.u32 %v6501_v18, %v6032_v27  ;;  %v6400_v27 = vld [vmem:[#allocation3 + $0x164] sm:$0xf]  ;;  %v5754_v42 = vld [vmem:[#allocation3 + $0x258] sm:$0xf0] }
 0x477   :  { %4054 = vmatpush.bf16.msra.mxu0 %v5485_v10  ;;  %4006 = vmatmul.bf16.gmra.mxu2 %v8452_v28  ;;  %v3021_v10 = vrot.slane %v8280_v48, 2  ;;  %v6448_v48 = vld [vmem:[#allocation3 + $0x2e4] sm:$0xf]  ;;  %v5818_v43 = vld [vmem:[#allocation3 + $0x2d8] sm:$0xf0] }
 0x478   :  { %4073 = vmatpush.bf16.msra.mxu2 %v5549_v7  ;;  %v5522_v7 = vld [vmem:[#allocation3 + $0x88] sm:$0xf0]  ;;  %v6412_v0 = vld [vmem:[#allocation3 + $0x1c4] sm:$0xf] }
 0x479   :  { %4017 = vmatpush.bf16.msra.mxu1 %v5985_v36  ;;  %v6434_v36 = vld [vmem:[#allocation3 + $0x274] sm:$0xf]  ;;  %v3025_v30 = vsel %vm1431_vm15, %v3017_v45, %v3021_v10  ;;  %v5618_v25 = vld [vmem:[#allocation3 + $0x148] sm:$0xf0]  ;;  %v6428_v16 = vld [vmem:[#allocation3 + $0x244] sm:$0xf] }
 0x47a   :  { %4036 = vmatpush.bf16.msra.mxu3 %v6049_v63  ;;  %v5461_v63 = vor.u32 %v6356_v14, %v5458_v40  ;;  %v5773_v22 = vor.u32 %v6434_v36, %v5770_v51  ;;  %v5826_v14 = vld [vmem:[#allocation3 + $0x2e8] sm:$0xf0]  ;;  %v5626_v40 = vld [vmem:[#allocation3 + $0x158] sm:$0xf0]  ;;  %v6396_v36 = vld [vmem:[#allocation3 + $0x144] sm:$0xf] }
 0x47b   :  { %4055 = vmatpush.bf16.msra.mxu0 %v5477_v61  ;;  %v3029_v61 = vsel %vm1431_vm15, %v3021_v10, %v3017_v45  ;;  %v5701_v45 = vor.u32 %v6416_v56, %v5698_v8  ;;  %v3018_v51 = vrot.slane %v8282_v33, 2  ;;  %v5746_v31 = vld [vmem:[#allocation3 + $0x248] sm:$0xf0]  ;;  %v5621_v33 = vor.u32 %v6396_v36, %v5618_v25  ;;  %v6410_v56 = vld [vmem:[#allocation3 + $0x1b4] sm:$0xf] }
 0x47c   :  { %4074 = vmatpush.bf16.msra.mxu2 %v5541_v1  ;;  %v5525_v1 = vor.u32 %v6372_v29, %v5522_v7  ;;  %v6414_v29 = vld [vmem:[#allocation3 + $0x1d4] sm:$0xf]  ;;  %v5829_v7 = vor.u32 %v6448_v48, %v5826_v14  ;;  %v5738_v48 = vld [vmem:[#allocation3 + $0x238] sm:$0xf0]  ;;  %v5730_v36 = vld [vmem:[#allocation3 + $0x228] sm:$0xf0] }
 0x47d   :  { %4018 = vmatpush.bf16.msra.mxu1 %v5977_v35  ;;  %v3035_v35 = vsel %vm1441_vm2, %v2941_v39, %v3029_v61  ;;  %v5637_v39 = vor.u32 %v6400_v27, %v5634_v26  ;;  %v5757_v61 = vor.u32 %v6430_v58, %v5754_v42  ;;  %v6394_v27 = vld [vmem:[#allocation3 + $0x134] sm:$0xf]  ;;  %v5610_v26 = vld [vmem:[#allocation3 + $0x138] sm:$0xf0]  ;;  %v5602_v58 = vld [vmem:[#allocation3 + $0x128] sm:$0xf0] }
 0x47e   :  { %4037 = vmatpush.bf16.msra.mxu3 %v6041_v11  ;;  %v6432_v11 = vld [vmem:[#allocation3 + $0x264] sm:$0xf]  ;;  %v8480_v18 = vpack.c.bf16 %v3035_v35, %v3025_v30  ;;  %v6390_v25 = vld [vmem:[#allocation3 + $0x114] sm:$0xf] }
 0x47f   :  { %4056 = vmatpush.bf16.msra.mxu0 %v5469_v34  ;;  %v5762_v34 = vld [vmem:[#allocation3 + $0x268] sm:$0xf0]  ;;  %v6408_v42 = vld [vmem:[#allocation3 + $0x1a4] sm:$0xf] }
 0x480   :  { %4075 = vmatpush.bf16.msra.mxu2 %v5533_v46  ;;  %v5765_v10 = vor.u32 %v6432_v11, %v5762_v34  ;;  %v6398_v46 = vld [vmem:[#allocation3 + $0x154] sm:$0xf]  ;;  %v5674_v11 = vld [vmem:[#allocation3 + $0x1b8] sm:$0xf0] }
 0x481   :  { %4019 = vmatpush.bf16.msra.mxu1 %v5969_v59  ;;  %v6446_v59 = vld [vmem:[#allocation3 + $0x2d4] sm:$0xf]  ;;  %v5629_v37 = vor.u32 %v6398_v46, %v5626_v40 }
 0x482   :  { %4038 = vmatpush.bf16.msra.mxu3 %v6033_v53  ;;  %v3022_v53 = vrot.slane %v8286_v4, 2  ;;  %v6426_v34 = vld [vmem:[#allocation3 + $0x234] sm:$0xf]  ;;  %v6392_v4 = vld [vmem:[#allocation3 + $0x124] sm:$0xf] }
 0x483   :  { %4057 = vmatpush.bf16.msra.mxu0 %v5461_v63  ;;  %v5693_v63 = vor.u32 %v6414_v29, %v5690_v55  ;;  %v5613_v29 = vor.u32 %v6394_v27, %v5610_v26  ;;  %v5741_v55 = vor.u32 %v6426_v34, %v5738_v48  ;;  %v5650_v27 = vld [vmem:[#allocation3 + $0x188] sm:$0xf0]  ;;  %v6420_v26 = vld [vmem:[#allocation3 + $0x204] sm:$0xf]  ;;  %v6466_v34 = vld [vmem:[#allocation3 + $0x374] sm:$0xf] }
 0x484   :  { %4076 = vmatpush.bf16.msra.mxu2 %v5525_v1  ;;  %4020 = vmatmul.bf16.vlgmr.msra.gmra.mxu1 %v8478_v6  ;;  %v3019_v1 = vrot.slane %v8284_v52, 2  ;;  %v3030_v30 = vsel %vm1431_vm15, %v3022_v53, %v3018_v51  ;;  %v3026_v14 = vsel %vm1431_vm15, %v3018_v51, %v3022_v53  ;;  %v5794_v53 = vld [vmem:[#allocation3 + $0x2a8] sm:$0xf0]  ;;  %v5898_v48 = vld [vmem:[#allocation3 + $0x378] sm:$0xf0] }
 0x485   :  { %4088 = vmatpush.bf16.msrb.mxu1 %v5645_v13  ;;  %4039 = vmatmul.bf16.vlgmr.msra.gmra.mxu3 %v8480_v18  ;;  %v5821_v13 = vor.u32 %v6446_v59, %v5818_v43  ;;  %v5666_v43 = vld [vmem:[#allocation3 + $0x1a8] sm:$0xf0] }
 0x486   :  { %4107 = vmatpush.bf16.msrb.mxu3 %v5709_v21  ;;  %4058 = vmatmul.bf16.vlgmr.msra.gmra.mxu0 %v8324_v57  ;;  %v3023_v57 = vrot.slane %v8288_v41, 2  ;;  %v6444_v21 = vld [vmem:[#allocation3 + $0x2c4] sm:$0xf] }
 0x487   :  { %4126 = vmatpush.bf16.msrb.mxu0 %v5773_v22  ;;  %4077 = vmatmul.bf16.vlgmr.msra.gmra.mxu2 %v8326_v15  ;;  %v5682_v15 = vld [vmem:[#allocation3 + $0x1c8] sm:$0xf0]  ;;  %v6440_v41 = vld [vmem:[#allocation3 + $0x2a4] sm:$0xf] }
 0x488   :  { %4145 = vmatpush.bf16.msrb.mxu2 %v5837_v44  ;;  %v5810_v22 = vld [vmem:[#allocation3 + $0x2c8] sm:$0xf0]  ;;  %v5685_v35 = vor.u32 %v6412_v0, %v5682_v15  ;;  %v5749_v44 = vor.u32 %v6428_v16, %v5746_v31  ;;  %v3031_v52 = vsel %vm1431_vm15, %v3023_v57, %v3019_v1  ;;  %v3027_v46 = vsel %vm1431_vm15, %v3019_v1, %v3023_v57  ;;  %v5594_v0 = vld [vmem:[#allocation3 + $0x118] sm:$0xf0]  ;;  %v6406_v1 = vld [vmem:[#allocation3 + $0x194] sm:$0xf] }
 0x489   :  { %4089 = vmatpush.bf16.msrb.mxu1 %v5637_v39  ;;  %v5813_v8 = vor.u32 %v6444_v21, %v5810_v22  ;;  %v3038_v39 = vsel %vm1441_vm2, %v2942_v23, %v3030_v30  ;;  %v3039_v40 = vsel %vm1441_vm2, %v2943_v32, %v3031_v52  ;;  %v5605_v32 = vor.u32 %v6392_v4, %v5602_v58  ;;  %v6422_v15 = vld [vmem:[#allocation3 + $0x214] sm:$0xf]  ;;  %v5722_v16 = vld [vmem:[#allocation3 + $0x218] sm:$0xf0]  ;;  %v5586_v30 = vld [vmem:[#allocation3 + $0x108] sm:$0xf0] }
 0x48a   :  { %4108 = vmatpush.bf16.msrb.mxu3 %v5701_v45  ;;  %v6442_v45 = vld [vmem:[#allocation3 + $0x2b4] sm:$0xf]  ;;  %v8506_v23 = vpack.c.bf16 %v3038_v39, %v3026_v14  ;;  %v8508_v51 = vpack.c.bf16 %v3039_v40, %v3027_v46  ;;  %v5797_v57 = vor.u32 %v6440_v41, %v5794_v53  ;;  %v5786_v21 = vld [vmem:[#allocation3 + $0x298] sm:$0xf0]  ;;  %v5597_v22 = vor.u32 %v6390_v25, %v5594_v0  ;;  %v6404_v52 = vld [vmem:[#allocation3 + $0x184] sm:$0xf] }
 0x48b   :  { %4127 = vmatpush.bf16.msrb.mxu0 %v5765_v10  ;;  %v5802_v10 = vld [vmem:[#allocation3 + $0x2b8] sm:$0xf0]  ;;  %v6438_v31 = vld [vmem:[#allocation3 + $0x294] sm:$0xf]  ;;  %v5653_v46 = vor.u32 %v6404_v52, %v5650_v27  ;;  %v5901_v4 = vor.u32 %v6466_v34, %v5898_v48  ;;  %v5954_v41 = vld [vmem:[#allocation3 + $0x3e8] sm:$0xf0] }
 0x48c   :  { %4146 = vmatpush.bf16.msrb.mxu2 %v5829_v7  ;;  %v5677_v7 = vor.u32 %v6410_v56, %v5674_v11  ;;  %v5805_v59 = vor.u32 %v6442_v45, %v5802_v10  ;;  %v5789_v56 = vor.u32 %v6438_v31, %v5786_v21  ;;  %v6436_v11 = vld [vmem:[#allocation3 + $0x284] sm:$0xf]  ;;  %v6482_v14 = vld [vmem:[#allocation3 + $0x3f4] sm:$0xf]  ;;  %v5962_v39 = vld [vmem:[#allocation3 + $0x3f8] sm:$0xf0] }
 0x48d   :  { %4090 = vmatpush.bf16.msrb.mxu1 %v5629_v37  ;;  %v6424_v37 = vld [vmem:[#allocation3 + $0x224] sm:$0xf]  ;;  %v6498_v45 = vld [vmem:[#allocation3 + $0x474] sm:$0xf]  ;;  %v6026_v10 = vld [vmem:[#allocation3 + $0x478] sm:$0xf0]  ;;  %v5965_v58 = vor.u32 %v6482_v14, %v5962_v39 }
 0x48e   :  { %4109 = vmatpush.bf16.msrb.mxu3 %v5693_v63  ;;  %v5669_v63 = vor.u32 %v6408_v42, %v5666_v43  ;;  %v6029_v42 = vor.u32 %v6498_v45, %v6026_v10  ;;  %v6464_v43 = vld [vmem:[#allocation3 + $0x364] sm:$0xf]  ;;  %v5946_v31 = vld [vmem:[#allocation3 + $0x3d8] sm:$0xf0]  ;;  %v6494_v21 = vld [vmem:[#allocation3 + $0x454] sm:$0xf] }
 0x48f   :  { %4128 = vmatpush.bf16.msrb.mxu0 %v5757_v61  ;;  %v5733_v61 = vor.u32 %v6424_v37, %v5730_v36  ;;  %v5890_v37 = vld [vmem:[#allocation3 + $0x368] sm:$0xf0]  ;;  %v6480_v36 = vld [vmem:[#allocation3 + $0x3e4] sm:$0xf]  ;;  %v6458_v14 = vld [vmem:[#allocation3 + $0x334] sm:$0xf] }
 0x490   :  { %4147 = vmatpush.bf16.msrb.mxu2 %v5821_v13  ;;  %v5658_v13 = vld [vmem:[#allocation3 + $0x198] sm:$0xf0]  ;;  %v6496_v53 = vld [vmem:[#allocation3 + $0x464] sm:$0xf]  ;;  %v5893_v25 = vor.u32 %v6464_v43, %v5890_v37  ;;  %v5957_v0 = vor.u32 %v6480_v36, %v5954_v41  ;;  %v6474_v39 = vld [vmem:[#allocation3 + $0x3b4] sm:$0xf] }
 0x491   :  { %4091 = vmatpush.bf16.msrb.mxu1 %v5621_v33  ;;  %v6388_v33 = vld [vmem:[#allocation3 + $0x104] sm:$0xf]  ;;  %v5930_v10 = vld [vmem:[#allocation3 + $0x3b8] sm:$0xf0]  ;;  %v5922_v36 = vld [vmem:[#allocation3 + $0x3a8] sm:$0xf0] }
 0x492   :  { %4110 = vmatpush.bf16.msrb.mxu3 %v5685_v35  ;;  %v5661_v35 = vor.u32 %v6406_v1, %v5658_v13  ;;  %v5882_v13 = vld [vmem:[#allocation3 + $0x358] sm:$0xf0]  ;;  %v6460_v27 = vld [vmem:[#allocation3 + $0x344] sm:$0xf] }
 0x493   :  { %4129 = vmatpush.bf16.msrb.mxu0 %v5749_v44  ;;  %v5725_v44 = vor.u32 %v6422_v15, %v5722_v16  ;;  %v6478_v15 = vld [vmem:[#allocation3 + $0x3d4] sm:$0xf]  ;;  %v6472_v43 = vld [vmem:[#allocation3 + $0x3a4] sm:$0xf] }
 0x494   :  { %4148 = vmatpush.bf16.msrb.mxu2 %v5813_v8  ;;  %4025 = vmatmul.bf16.gmra.mxu1 %v8506_v23  ;;  %v5714_v8 = vld [vmem:[#allocation3 + $0x208] sm:$0xf0]  ;;  %v6488_v41 = vld [vmem:[#allocation3 + $0x424] sm:$0xf] }
 0x495   :  { %4092 = vmatpush.bf16.msrb.mxu1 %v5613_v29  ;;  %4044 = vmatmul.bf16.gmra.mxu3 %v8508_v51  ;;  %v5717_v40 = vor.u32 %v6420_v26, %v5714_v8  ;;  %v6514_v29 = vld [vmem:[#allocation3 + $0x4f4] sm:$0xf]  ;;  %v6476_v26 = vld [vmem:[#allocation3 + $0x3c4] sm:$0xf]  ;;  %v5938_v8 = vld [vmem:[#allocation3 + $0x3c8] sm:$0xf0] }
 0x496   :  { %4111 = vmatpush.bf16.msrb.mxu3 %v5677_v7  ;;  %4063 = vmatmul.bf16.gmra.mxu0 %v8370_v5  ;;  %v5778_v5 = vld [vmem:[#allocation3 + $0x288] sm:$0xf0]  ;;  %v6090_v7 = vld [vmem:[#allocation3 + $0x4f8] sm:$0xf0] }
 0x497   :  { %4130 = vmatpush.bf16.msrb.mxu0 %v5741_v55  ;;  %4082 = vmatmul.bf16.gmra.mxu2 %v8372_v49  ;;  %v5589_v49 = vor.u32 %v6388_v33, %v5586_v30  ;;  %v5781_v55 = vor.u32 %v6436_v11, %v5778_v5  ;;  %v6510_v33 = vld [vmem:[#allocation3 + $0x4d4] sm:$0xf]  ;;  %v6074_v30 = vld [vmem:[#allocation3 + $0x4d8] sm:$0xf0]  ;;  %v6492_v11 = vld [vmem:[#allocation3 + $0x444] sm:$0xf] }
 0x498   :  { %4149 = vmatpush.bf16.msrb.mxu2 %v5805_v59  ;;  %v6093_v59 = vor.u32 %v6514_v29, %v6090_v7  ;;  %v6508_v5 = vld [vmem:[#allocation3 + $0x4c4] sm:$0xf]  ;;  %v6506_v29 = vld [vmem:[#allocation3 + $0x4b4] sm:$0xf]  ;;  %v6058_v7 = vld [vmem:[#allocation3 + $0x4b8] sm:$0xf0] }
 0x499   :  { %4093 = vmatpush.bf16.msrb.mxu1 %v5605_v32  ;;  %v6018_v32 = vld [vmem:[#allocation3 + $0x468] sm:$0xf0]  ;;  %v6061_v37 = vor.u32 %v6506_v29, %v6058_v7 }
 0x49a   :  { %4112 = vmatpush.bf16.msrb.mxu3 %v5669_v63  ;;  %v6512_v63 = vld [vmem:[#allocation3 + $0x4e4] sm:$0xf]  ;;  %v6021_v1 = vor.u32 %v6496_v53, %v6018_v32  ;;  %v5986_v53 = vld [vmem:[#allocation3 + $0x428] sm:$0xf0] }
 0x49b   :  { %4131 = vmatpush.bf16.msrb.mxu0 %v5733_v61  ;;  %v6082_v61 = vld [vmem:[#allocation3 + $0x4e8] sm:$0xf0]  ;;  %v6504_v32 = vld [vmem:[#allocation3 + $0x4a4] sm:$0xf] }
 0x49c   :  { %4150 = vmatpush.bf16.msrb.mxu2 %v5797_v57  ;;  %v6462_v57 = vld [vmem:[#allocation3 + $0x354] sm:$0xf]  ;;  %v6085_v16 = vor.u32 %v6512_v63, %v6082_v61  ;;  %v6050_v63 = vld [vmem:[#allocation3 + $0x4a8] sm:$0xf0] }
 0x49d   :  { %4094 = vmatpush.bf16.msrb.mxu1 %v5597_v22  ;;  %v6010_v22 = vld [vmem:[#allocation3 + $0x458] sm:$0xf0] }
 0x49e   :  { %4113 = vmatpush.bf16.msrb.mxu3 %v5661_v35  ;;  %v5885_v35 = vor.u32 %v6462_v57, %v5882_v13  ;;  %v6013_v52 = vor.u32 %v6494_v21, %v6010_v22  ;;  %v5850_v57 = vld [vmem:[#allocation3 + $0x318] sm:$0xf0]  ;;  %v6470_v13 = vld [vmem:[#allocation3 + $0x394] sm:$0xf] }
 0x49f   :  { %4132 = vmatpush.bf16.msrb.mxu0 %v5725_v44  ;;  %v5949_v44 = vor.u32 %v6478_v15, %v5946_v31  ;;  %v6053_v15 = vor.u32 %v6504_v32, %v6050_v63  ;;  %v6486_v31 = vld [vmem:[#allocation3 + $0x414] sm:$0xf]  ;;  %v5978_v21 = vld [vmem:[#allocation3 + $0x418] sm:$0xf0] }
 0x4a0   :  { %4151 = vmatpush.bf16.msrb.mxu2 %v5789_v56  ;;  %v6077_v56 = vor.u32 %v6510_v33, %v6074_v30  ;;  %v6502_v22 = vld [vmem:[#allocation3 + $0x494] sm:$0xf]  ;;  %v6042_v33 = vld [vmem:[#allocation3 + $0x498] sm:$0xf0] }
 0x4a1   :  { %4095 = vmatpush.bf16.msrb.mxu1 %v5589_v49  ;;  %v5866_v49 = vld [vmem:[#allocation3 + $0x338] sm:$0xf0] }
 0x4a2   :  { %4114 = vmatpush.bf16.msrb.mxu3 %v5653_v46  ;;  %v6490_v46 = vld [vmem:[#allocation3 + $0x434] sm:$0xf] }
 0x4a3   :  { %4133 = vmatpush.bf16.msrb.mxu0 %v5717_v40  ;;  %v5994_v40 = vld [vmem:[#allocation3 + $0x438] sm:$0xf0] }
 0x4a4   :  { %4152 = vmatpush.bf16.msrb.mxu2 %v5781_v55  ;;  %4096 = vmatmul.bf16.vlgmr.msrb.gmra.mxu1 %v8328_v17  ;;  %v5874_v17 = vld [vmem:[#allocation3 + $0x348] sm:$0xf0]  ;;  %v5869_v55 = vor.u32 %v6458_v14, %v5866_v49 }
 0x4a5   :  { %4164 = vmatpush.bf16.msra.mxu1 %v5901_v4  ;;  %4115 = vmatmul.bf16.vlgmr.msrb.gmra.mxu3 %v8330_v24  ;;  %v6002_v24 = vld [vmem:[#allocation3 + $0x448] sm:$0xf0]  ;;  %v5877_v34 = vor.u32 %v6460_v27, %v5874_v17  ;;  %v5933_v4 = vor.u32 %v6474_v39, %v5930_v10  ;;  %v6468_v27 = vld [vmem:[#allocation3 + $0x384] sm:$0xf]  ;;  %v6045_v17 = vor.u32 %v6502_v22, %v6042_v33 }
 0x4a6   :  { %4183 = vmatpush.bf16.msra.mxu3 %v5965_v58  ;;  %4134 = vmatmul.bf16.vlgmr.msrb.gmra.mxu0 %v8406_v12  ;;  %v6066_v12 = vld [vmem:[#allocation3 + $0x4c8] sm:$0xf0]  ;;  %v6005_v48 = vor.u32 %v6492_v11, %v6002_v24  ;;  %v5997_v58 = vor.u32 %v6490_v46, %v5994_v40 }
 0x4a7   :  { %4202 = vmatpush.bf16.msra.mxu0 %v6029_v42  ;;  %4153 = vmatmul.bf16.vlgmr.msrb.gmra.mxu2 %v8410_v54  ;;  %v5941_v54 = vor.u32 %v6476_v26, %v5938_v8  ;;  %v6069_v45 = vor.u32 %v6508_v5, %v6066_v12  ;;  %v6456_v42 = vld [vmem:[#allocation3 + $0x324] sm:$0xf]  ;;  %v5906_v26 = vld [vmem:[#allocation3 + $0x388] sm:$0xf0] }
 0x4a8   :  { %4221 = vmatpush.bf16.msra.mxu2 %v6093_v59  ;;  %v5858_v59 = vld [vmem:[#allocation3 + $0x328] sm:$0xf0]  ;;  %v6500_v8 = vld [vmem:[#allocation3 + $0x484] sm:$0xf] }
 0x4a9   :  { %4165 = vmatpush.bf16.msra.mxu1 %v5893_v25  ;;  %v5861_v61 = vor.u32 %v6456_v42, %v5858_v59  ;;  %v5925_v25 = vor.u32 %v6472_v43, %v5922_v36 }
 0x4aa   :  { %4184 = vmatpush.bf16.msra.mxu3 %v5957_v0  ;;  %v5989_v0 = vor.u32 %v6488_v41, %v5986_v53 }
 0x4ab   :  { %4203 = vmatpush.bf16.msra.mxu0 %v6021_v1  ;;  %v6454_v1 = vld [vmem:[#allocation3 + $0x314] sm:$0xf] }
 0x4ac   :  { %4222 = vmatpush.bf16.msra.mxu2 %v6085_v16  ;;  %v5914_v16 = vld [vmem:[#allocation3 + $0x398] sm:$0xf0]  ;;  %v5853_v30 = vor.u32 %v6454_v1, %v5850_v57 }
 0x4ad   :  { %4166 = vmatpush.bf16.msra.mxu1 %v5885_v35  ;;  %v5917_v35 = vor.u32 %v6470_v13, %v5914_v16 }
 0x4ae   :  { %4185 = vmatpush.bf16.msra.mxu3 %v5949_v44  ;;  %v5981_v44 = vor.u32 %v6486_v31, %v5978_v21 }
 0x4af   :  { %4204 = vmatpush.bf16.msra.mxu0 %v6013_v52  ;;  %v5842_v52 = vld [vmem:[#allocation3 + $0x308] sm:$0xf0] }
 0x4b0   :  { %4223 = vmatpush.bf16.msra.mxu2 %v6077_v56  ;;  %v6484_v56 = vld [vmem:[#allocation3 + $0x404] sm:$0xf] }
 0x4b1   :  { %4167 = vmatpush.bf16.msra.mxu1 %v5877_v34 }
 0x4b2   :  { %4186 = vmatpush.bf16.msra.mxu3 %v5941_v54 }
 0x4b3   :  { %4205 = vmatpush.bf16.msra.mxu0 %v6005_v48 }
 0x4b4   :  { %4224 = vmatpush.bf16.msra.mxu2 %v6069_v45  ;;  %4101 = vmatmul.bf16.gmra.mxu1 %v8374_v50  ;;  %v6452_v50 = vld [vmem:[#allocation3 + $0x304] sm:$0xf] }
 0x4b5   :  { %4168 = vmatpush.bf16.msra.mxu1 %v5869_v55  ;;  %4120 = vmatmul.bf16.gmra.mxu3 %v8376_v60  ;;  %v5970_v60 = vld [vmem:[#allocation3 + $0x408] sm:$0xf0]  ;;  %v5845_v11 = vor.u32 %v6452_v50, %v5842_v52 }
 0x4b6   :  { %4187 = vmatpush.bf16.msra.mxu3 %v5933_v4  ;;  %4139 = vmatmul.bf16.gmra.mxu0 %v8444_v47  ;;  %v6034_v47 = vld [vmem:[#allocation3 + $0x488] sm:$0xf0]  ;;  %v5973_v24 = vor.u32 %v6484_v56, %v5970_v60 }
 0x4b7   :  { %4206 = vmatpush.bf16.msra.mxu0 %v5997_v58  ;;  %4158 = vmatmul.bf16.gmra.mxu2 %v8448_v62  ;;  %v5909_v62 = vor.u32 %v6468_v27, %v5906_v26  ;;  %v6037_v5 = vor.u32 %v6500_v8, %v6034_v47 }
 0x4b8   :  { %4225 = vmatpush.bf16.msra.mxu2 %v6061_v37 }
 0x4b9   :  { %4169 = vmatpush.bf16.msra.mxu1 %v5861_v61 }
 0x4ba   :  { %4188 = vmatpush.bf16.msra.mxu3 %v5925_v25 }
 0x4bb   :  { %4207 = vmatpush.bf16.msra.mxu0 %v5989_v0 }
 0x4bc   :  { %4226 = vmatpush.bf16.msra.mxu2 %v6053_v15 }
 0x4bd   :  { %4170 = vmatpush.bf16.msra.mxu1 %v5853_v30 }
 0x4be   :  { %4189 = vmatpush.bf16.msra.mxu3 %v5917_v35 }
 0x4bf   :  { %4208 = vmatpush.bf16.msra.mxu0 %v5981_v44 }
 0x4c0   :  { %4227 = vmatpush.bf16.msra.mxu2 %v6045_v17 }
 0x4c1   :  { %4171 = vmatpush.bf16.msra.mxu1 %v5845_v11  ;;  %v3869_v12 = vpop.f32.mrf.mxu1 }
 0x4c2   :  { %4190 = vmatpush.bf16.msra.mxu3 %v5909_v62 }
 0x4c3   :  { %4209 = vmatpush.bf16.msra.mxu0 %v5973_v24  ;;  %v3907_v34 = vpop.f32.mrf.mxu0 }
 0x4c4   :  { %4228 = vmatpush.bf16.msra.mxu2 %v6037_v5  ;;  %4172 = vmatmul.bf16.vlgmr.msra.gmra.mxu1 %v8412_v2 }
 0x4c5   :  { %4191 = vmatmul.bf16.vlgmr.msra.gmra.mxu3 %v8414_v38 }
 0x4c6   :  { %4210 = vmatmul.bf16.vlgmr.msra.gmra.mxu0 %v8478_v6 }
 0x4c7   :  { %4229 = vmatmul.bf16.vlgmr.msra.gmra.mxu2 %v8480_v18 }
 0x4c8   :  { %v3888_v54 = vpop.f32.mrf.mxu3 }
 0x4c9   :  { %v3889_v48 = vadd.f32 %v3888_v54, %v3869_v12  ;;  %v3871_v49 = vpop.f32.mrf.mxu1 }
 0x4ca   :  { %v3926_v14 = vpop.f32.mrf.mxu2 }
 0x4cb   :  { %v3909_v39 = vpop.f32.mrf.mxu0  ;;  %v3908_v45 = vadd.f32 %v3907_v34, %v3889_v48 }
 0x4cd   :  { %v3927_v10 = vadd.f32 %v3926_v14, %v3908_v45 }
 0x4d0   :  { %v3890_v46 = vpop.f32.mrf.mxu3 }
 0x4d1   :  { %v3891_v40 = vadd.f32 %v3890_v46, %v3871_v49  ;;  %v3874_v7 = vpop.f32.mrf.mxu1 }
 0x4d2   :  { %v3928_v29 = vpop.f32.mrf.mxu2 }
 0x4d3   :  { %v3912_v55 = vpop.f32.mrf.mxu0  ;;  %v3910_v4 = vadd.f32 %v3909_v39, %v3891_v40 }
 0x4d4   :  { %4177 = vmatmul.bf16.gmra.mxu1 %v8450_v20 }
 0x4d5   :  { %v3929_v2 = vadd.f32 %v3928_v29, %v3910_v4  ;;  %4196 = vmatmul.bf16.gmra.mxu3 %v8452_v28 }
 0x4d6   :  { %4215 = vmatmul.bf16.gmra.mxu0 %v8506_v23 }
 0x4d7   :  { %4234 = vmatmul.bf16.gmra.mxu2 %v8508_v51 }
 0x4d8   :  { %v3893_v38 = vpop.f32.mrf.mxu3 }
 0x4d9   :  { %v3894_v6 = vadd.f32 %v3893_v38, %v3874_v7  ;;  %v3876_v58 = vpop.f32.mrf.mxu1 }
 0x4da   :  { %v3931_v18 = vpop.f32.mrf.mxu2 }
 0x4db   :  { %v3914_v42 = vpop.f32.mrf.mxu0  ;;  %v3913_v59 = vadd.f32 %v3912_v55, %v3894_v6 }
 0x4dd   :  { %v3932_v43 = vadd.f32 %v3931_v18, %v3913_v59 }
 0x4e0   :  { %v3895_v37 = vpop.f32.mrf.mxu3 }
 0x4e1   :  { %v3896_v36 = vadd.f32 %v3895_v37, %v3876_v58  ;;  %v3945_v53 = vpop.f32.mrf.mxu1 }
 0x4e2   :  { %v3933_v41 = vpop.f32.mrf.mxu2  ;;  %v3946_v32 = vadd.f32 %v3945_v53, %v3927_v10 }
 0x4e3   :  { %v3983_v20 = vpop.f32.mrf.mxu0  ;;  %v3915_v63 = vadd.f32 %v3914_v42, %v3896_v36 }
 0x4e5   :  { %v3934_v61 = vadd.f32 %v3933_v41, %v3915_v63 }
 0x4e8   :  { %v3964_v28 = vpop.f32.mrf.mxu3 }
 0x4e9   :  { %v3965_v25 = vadd.f32 %v3964_v28, %v3946_v32  ;;  %v3947_v0 = vpop.f32.mrf.mxu1 }
 0x4ea   :  { %v4002_v23 = vpop.f32.mrf.mxu2  ;;  %v3948_v51 = vadd.f32 %v3947_v0, %v3929_v2 }
 0x4eb   :  { %v3985_v1 = vpop.f32.mrf.mxu0  ;;  %v3984_v57 = vadd.f32 %v3983_v20, %v3965_v25 }
 0x4ed   :  { %v4003_v13 = vadd.f32 %v4002_v23, %v3984_v57 }
 0x4f0   :  { %v3966_v15 = vpop.f32.mrf.mxu3 }
 0x4f1   :  { %v3967_v16 = vadd.f32 %v3966_v15, %v3948_v51  ;;  %v3950_v21 = vpop.f32.mrf.mxu1 }
 0x4f2   :  { %v4004_v31 = vpop.f32.mrf.mxu2  ;;  %v3951_v22 = vadd.f32 %v3950_v21, %v3932_v43 }
 0x4f3   :  { %v3988_v33 = vpop.f32.mrf.mxu0  ;;  %v3986_v30 = vadd.f32 %v3985_v1, %v3967_v16 }
 0x4f5   :  { %v4005_v35 = vadd.f32 %v4004_v31, %v3986_v30 }
 0x4f8   :  { %v3969_v44 = vpop.f32.mrf.mxu3 }
 0x4f9   :  { %v3970_v50 = vadd.f32 %v3969_v44, %v3951_v22  ;;  %v3952_v27 = vpop.f32.mrf.mxu1 }
 0x4fa   :  { %v4007_v52 = vpop.f32.mrf.mxu2  ;;  %v3953_v17 = vadd.f32 %v3952_v27, %v3934_v61 }
 0x4fb   :  { %v3990_v26 = vpop.f32.mrf.mxu0  ;;  %v3989_v56 = vadd.f32 %v3988_v33, %v3970_v50 }
 0x4fd   :  { %v4008_v60 = vadd.f32 %v4007_v52, %v3989_v56 }
 0x500   :  { %v3971_v8 = vpop.f32.mrf.mxu3 }
 0x501   :  { %v3972_v47 = vadd.f32 %v3971_v8, %v3953_v17  ;;  %v4021_v62 = vpop.f32.mrf.mxu1 }
 0x502   :  { %v4009_v11 = vpop.f32.mrf.mxu2  ;;  %v4022_v24 = vadd.f32 %v4021_v62, %v4003_v13 }
 0x503   :  { %v4059_v5 = vpop.f32.mrf.mxu0  ;;  %v3991_v12 = vadd.f32 %v3990_v26, %v3972_v47 }
 0x505   :  { %v4010_v34 = vadd.f32 %v4009_v11, %v3991_v12 }
 0x508   :  { %v4040_v54 = vpop.f32.mrf.mxu3 }
 0x509   :  { %v8530_v48 = vadd.f32 %v4040_v54, %v4022_v24  ;;  %v4023_v49 = vpop.f32.mrf.mxu1 }
 0x50a   :  { %v4078_v14 = vpop.f32.mrf.mxu2  ;;  %v4024_v45 = vadd.f32 %v4023_v49, %v4005_v35 }
 0x50b   :  { %v8532_v39 = vadd.f32 %v4078_v14, %v4059_v5  ;;  %v4061_v10 = vpop.f32.mrf.mxu0  ;;  %v4260_v2 = vmul.f32 %v8530_v48, %v8530_v48 }
 0x510   :  { %v4042_v46 = vpop.f32.mrf.mxu3 }
 0x511   :  { %v8534_v40 = vadd.f32 %v4042_v46, %v4024_v45  ;;  %v4026_v7 = vpop.f32.mrf.mxu1 }
 0x512   :  { %v4080_v29 = vpop.f32.mrf.mxu2  ;;  %v4027_v55 = vadd.f32 %v4026_v7, %v4008_v60 }
 0x513   :  { %v4064_v4 = vpop.f32.mrf.mxu0  ;;  %v4240_v38 = vadd.f32 %v8534_v40, %v8530_v48  ;;  %v4262_v6 = vmul.f32 %v8534_v40, %v8534_v40  ;;  %v4081_v7 = vadd.f32 %v4080_v29, %v4061_v10 }
 0x515   :  { %v4268_v18 = vadd.f32 %v4262_v6, %v4260_v2 }
 0x518   :  { %v4045_v58 = vpop.f32.mrf.mxu3 }
 0x519   :  { %v8542_v42 = vadd.f32 %v4045_v58, %v4027_v55  ;;  %v4028_v43 = vpop.f32.mrf.mxu1 }
 0x51a   :  { %v4083_v59 = vpop.f32.mrf.mxu2  ;;  %v4029_v37 = vadd.f32 %v4028_v43, %v4010_v34 }
 0x51b   :  { %v4066_v36 = vpop.f32.mrf.mxu0  ;;  %v4264_v41 = vmul.f32 %v8542_v42, %v8542_v42  ;;  %v4241_v32 = vadd.f32 %v4240_v38, %v8542_v42  ;;  %v4084_v38 = vadd.f32 %v4083_v59, %v4064_v4 }
 0x51d   :  { %v4269_v25 = vadd.f32 %v4268_v18, %v4264_v41 }
 0x520   :  { %v4047_v53 = vpop.f32.mrf.mxu3 }
 0x521   :  { %v8547_v20 = vadd.f32 %v4047_v53, %v4029_v37  ;;  %v4097_v61 = vpop.f32.mrf.mxu1 }
 0x522   :  { %v4085_v63 = vpop.f32.mrf.mxu2  ;;  %v4098_v6 = vadd.f32 %v4097_v61, %v8532_v39 }
 0x523   :  { %v4135_v28 = vpop.f32.mrf.mxu0  ;;  %v4242_v23 = vadd.f32 %v4241_v32, %v8547_v20  ;;  %v4266_v0 = vmul.f32 %v8547_v20, %v8547_v20 }
 0x525   :  { %v4243_v51 = vrot.slane %v4242_v23, 4  ;;  %v4270_v1 = vadd.f32 %v4269_v25, %v4266_v0 }
 0x527   :  { %v4244_v57 = vadd.f32 %v4243_v51, %v4242_v23  ;;  %v4271_v13 = vrot.slane %v4270_v1, 4  ;;  %v4086_v51 = vadd.f32 %v4085_v63, %v4066_v36 }
 0x528   :  { %v4116_v15 = vpop.f32.mrf.mxu3 }
 0x529   :  { %v4245_v16 = vrot.slane %v4244_v57, 2  ;;  %v4272_v31 = vadd.f32 %v4271_v13, %v4270_v1  ;;  %v4099_v22 = vpop.f32.mrf.mxu1  ;;  %v4117_v37 = vadd.f32 %v4116_v15, %v4098_v6 }
 0x52a   :  { %v4154_v21 = vpop.f32.mrf.mxu2  ;;  %v4100_v55 = vadd.f32 %v4099_v22, %v4081_v7 }
 0x52b   :  { %v4137_v33 = vpop.f32.mrf.mxu0  ;;  %v4246_v30 = vadd.f32 %v4245_v16, %v4244_v57  ;;  %v4273_v35 = vrot.slane %v4272_v31, 2  ;;  %v4136_v23 = vadd.f32 %v4135_v28, %v4117_v37 }
 0x52d   :  { %v4247_v44 = vrot.slane %v4246_v30, 1  ;;  %v4274_v50 = vadd.f32 %v4273_v35, %v4272_v31  ;;  %v4155_v29 = vadd.f32 %v4154_v21, %v4136_v23 }
 0x52f   :  { %v4248_v52 = vadd.f32 %v4247_v44, %v4246_v30  ;;  %v4275_v27 = vrot.slane %v4274_v50, 1 }
 0x530   :  { %v4118_v17 = vpop.f32.mrf.mxu3 }
 0x531   :  { %v8552_v26 = vmul.f32 0.03125, %v4248_v52  ;;  %v4276_v56 = vadd.f32 %v4275_v27, %v4274_v50  ;;  %v4102_v8 = vpop.f32.mrf.mxu1  ;;  %v4119_v18 = vadd.f32 %v4118_v17, %v4100_v55 }
 0x532   :  { %v4156_v60 = vpop.f32.mrf.mxu2  ;;  %v4103_v41 = vadd.f32 %v4102_v8, %v4084_v38  ;;  %v6531_v38 = vld [vmem:[%s8690_s10 + $0x78] sm:$0xff] }
 0x533   :  { %v4140_v47 = vpop.f32.mrf.mxu0  ;;  %v8554_v11 = vmul.f32 0.03125, %v4276_v56  ;;  %v8558_v62 = vmul.f32 %v8552_v26, %v8552_v26  ;;  %v4138_v53 = vadd.f32 %v4137_v33, %v4119_v18  ;;  %4517 = vmatpush.bf16.msrb.mxu3 %v6531_v38 }
 0x535   :  { %v4290_v24 = vsub.f32 %v8554_v11, %v8558_v62  ;;  %v4157_v1 = vadd.f32 %v4156_v60, %v4138_v53  ;;  %v6530_v53 = vld [vmem:[%s8690_s10 + $0x70] sm:$0xff] }
 0x537   :  { %4518 = vmatpush.bf16.msrb.mxu3 %v6530_v53 }
 0x538   :  { %v4121_v5 = vpop.f32.mrf.mxu3 }
 0x539   :  { %v4104_v34 = vpop.f32.mrf.mxu1  ;;  %v4122_v32 = vadd.f32 %v4121_v5, %v4103_v41  ;;  %v6522_v41 = vld [vmem:[%s8690_s10 + $0x30] sm:$0xff] }
 0x53a   :  { %v4159_v12 = vpop.f32.mrf.mxu2  ;;  %v4105_v16 = vadd.f32 %v4104_v34, %v4086_v51  ;;  %v6521_v51 = vld [vmem:[%s8690_s10 + $0x28] sm:$0xff] }
 0x53b   :  { %v4142_v54 = vpop.f32.mrf.mxu0  ;;  %v4141_v57 = vadd.f32 %v4140_v47, %v4122_v32 }
 0x53d   :  { %v4160_v59 = vadd.f32 %v4159_v12, %v4141_v57  ;;  %v4292_v57 = vadd.f32 1e-05, %v4290_v24  ;;  %v6519_v24 = vld [vmem:[%s8690_s10 + $0x18] sm:$0xff] }
 0x53f   :  { %6567 = vrsqrt.f32 %v4292_v57  ;;  %vm4300_vm13 = vweird.f32 %v4292_v57 }
 0x540   :  { %v4123_v14 = vpop.f32.mrf.mxu3 }
 0x541   :  { %v4173_v45 = vpop.f32.mrf.mxu1  ;;  %v4124_v39 = vadd.f32 %v4123_v14, %v4105_v16 }
 0x542   :  { %v4161_v49 = vpop.f32.mrf.mxu2  ;;  %v4174_v61 = vadd.f32 %v4173_v45, %v4155_v29 }
 0x543   :  { %v4211_v46 = vpop.f32.mrf.mxu0  ;;  %v4143_v35 = vadd.f32 %v4142_v54, %v4124_v39 }
 0x545   :  { %v4162_v27 = vadd.f32 %v4161_v49, %v4143_v35  ;;  %v6518_v35 = vld [vmem:[%s8690_s10 + $0x10] sm:$0xff] }
 0x548   :  { %v4192_v2 = vpop.f32.mrf.mxu3 }
 0x549   :  { %v4175_v43 = vpop.f32.mrf.mxu1  ;;  %v4193_v22 = vadd.f32 %v4192_v2, %v4174_v61  ;;  %v6523_v2 = vld [vmem:[%s8690_s10 + $0x38] sm:$0xff] }
 0x54a   :  { %v4230_v58 = vpop.f32.mrf.mxu2  ;;  %v4176_v4 = vadd.f32 %v4175_v43, %v4157_v1  ;;  %4498 = vmatpush.bf16.msrb.mxu1 %v6523_v2  ;;  %v6529_v1 = vld [vmem:[%s8690_s10 + $0x68] sm:$0xff] }
 0x54b   :  { %v4213_v25 = vpop.f32.mrf.mxu0  ;;  %v4212_v36 = vadd.f32 %v4211_v46, %v4193_v22  ;;  %4519 = vmatpush.bf16.msrb.mxu3 %v6529_v1 }
 0x54d   :  { %v8565_v21 = vadd.f32 %v4230_v58, %v4212_v36  ;;  %v6525_v36 = vld [vmem:[%s8690_s10 + $0x48] sm:$0xff] }
 0x54e   :  { %4499 = vmatpush.bf16.msrb.mxu1 %v6522_v41 }
 0x54f   :  { %v4261_v34 = vmul.f32 %v8565_v21, %v8565_v21 }
 0x550   :  { %v4194_v0 = vpop.f32.mrf.mxu3 }
 0x551   :  { %v4178_v10 = vpop.f32.mrf.mxu1  ;;  %v4195_v31 = vadd.f32 %v4194_v0, %v4176_v4  ;;  %v6520_v4 = vld [vmem:[%s8690_s10 + $0x20] sm:$0xff] }
 0x552   :  { %v4232_v13 = vpop.f32.mrf.mxu2  ;;  %v4179_v15 = vadd.f32 %v4178_v10, %v4160_v59  ;;  %4500 = vmatpush.bf16.msrb.mxu1 %v6521_v51  ;;  %v6528_v59 = vld [vmem:[%s8690_s10 + $0x60] sm:$0xff] }
 0x553   :  { %v4216_v30 = vpop.f32.mrf.mxu0  ;;  %v4214_v44 = vadd.f32 %v4213_v25, %v4195_v31  ;;  %4520 = vmatpush.bf16.msrb.mxu3 %v6528_v59  ;;  %v6527_v31 = vld [vmem:[%s8690_s10 + $0x58] sm:$0xff] }
 0x555   :  { %v8563_v17 = vadd.f32 %v4232_v13, %v4214_v44  ;;  %v6526_v44 = vld [vmem:[%s8690_s10 + $0x50] sm:$0xff] }
 0x556   :  { %4501 = vmatpush.bf16.msrb.mxu1 %v6520_v4 }
 0x557   :  { %v4263_v47 = vmul.f32 %v8563_v17, %v8563_v17  ;;  %v4249_v54 = vadd.f32 %v8563_v17, %v8565_v21  ;;  %4521 = vmatpush.bf16.msrb.mxu3 %v6527_v31 }
 0x558   :  { %v4197_v33 = vpop.f32.mrf.mxu3 }
 0x559   :  { %v4198_v28 = vadd.f32 %v4197_v33, %v4179_v15  ;;  %v4180_v52 = vpop.f32.mrf.mxu1  ;;  %v4277_v46 = vadd.f32 %v4263_v47, %v4261_v34 }
 0x55a   :  { %v4235_v50 = vpop.f32.mrf.mxu2  ;;  %v4181_v60 = vadd.f32 %v4180_v52, %v4162_v27  ;;  %4502 = vmatpush.bf16.msrb.mxu1 %v6519_v24  ;;  %v6516_v52 = vld [vmem:[%s8690_s10] sm:$0xff] }
 0x55b   :  { %v4217_v63 = vadd.f32 %v4216_v30, %v4198_v28  ;;  %v4218_v12 = vpop.f32.mrf.mxu0  ;;  %v6568_v30 = vpop.eup %6567  ;;  %4522 = vmatpush.bf16.msrb.mxu3 %v6526_v44  ;;  %v6524_v27 = vld [vmem:[%s8690_s10 + $0x40] sm:$0xff] }
 0x55c   :  { %vm4301_vm1 = vweird.f32 %v6568_v30 }
 0x55d   :  { %v8567_v56 = vadd.f32 %v4235_v50, %v4217_v63  ;;  %v6517_v50 = vld [vmem:[%s8690_s10 + $0x8] sm:$0xff]  ;;  %v4295_v63 = vmul.f32 %v6568_v30, %v4292_v57  ;;  %vm4302_vm14 = vmor %vm4300_vm13, %vm4301_vm1 }
 0x55e   :  { %4503 = vmatpush.bf16.msrb.mxu1 %v6518_v35 }
 0x55f   :  { %v4265_v14 = vmul.f32 %v8567_v56, %v8567_v56  ;;  %v4250_v7 = vadd.f32 %v4249_v54, %v8567_v56  ;;  %4523 = vmatpush.bf16.msrb.mxu3 %v6525_v36 }
 0x560   :  { %v4199_v8 = vpop.f32.mrf.mxu3 }
 0x561   :  { %v4200_v5 = vadd.f32 %v4199_v8, %v4181_v60  ;;  %v4278_v6 = vadd.f32 %v4277_v46, %v4265_v14  ;;  %v4296_v60 = vmul.f32 %v6568_v30, %v4295_v63 }
 0x562   :  { %v4237_v45 = vpop.f32.mrf.mxu2  ;;  %4504 = vmatpush.bf16.msrb.mxu1 %v6517_v50  ;;  %v6566_v50 = vld [vmem:[%s8691_s11] ss:$0 sm:$0xff]  ;;  %s6616_s11 = smov [#allocation5]  }
 0x563   :  { %v4219_v49 = vadd.f32 %v4218_v12, %v4200_v5  ;;  %4524 = vmatpush.bf16.msrb.mxu3 %v6524_v27  ;;  %v4297_v47 = vmul.f32 0.5, %v4296_v60  ;;  %s4671_s16 = sshll.u32 %s6616_s11, 4  ;;  %s4672_s16 = int_to_ptr.vmem [resolvable:$true] %s4671_s16 }
 0x565   :  { %v8578_v55 = vadd.f32 %v4237_v45, %v4219_v49  ;;  %v4298_v34 = vsub.f32 1.5, %v4297_v47 }
 0x566   :  { %4505 = vmatpush.bf16.msrb.mxu1 %v6516_v52 }
 0x567   :  { %v4251_v18 = vadd.f32 %v4250_v7, %v8578_v55  ;;  %v4267_v58 = vmul.f32 %v8578_v55, %v8578_v55  ;;  %v4299_v49 = vmul.f32 %v6568_v30, %v4298_v34  ;;  %v2934_v7 = vld [vmem:[%s8688_s8] sm:$0x3] }
 0x569   :  { %v4252_v43 = vrot.slane %v4251_v18, 4  ;;  %v4279_v37 = vadd.f32 %v4278_v6, %v4267_v58  ;;  %v4303_v38 = vsel %vm4302_vm14, %v6568_v30, %v4299_v49 }
 0x56b   :  { %v4253_v32 = vadd.f32 %v4252_v43, %v4251_v18  ;;  %v4280_v25 = vrot.slane %v4279_v37, 4 }
 0x56d   :  { %v4254_v23 = vrot.slane %v4253_v32, 2  ;;  %v4281_v0 = vadd.f32 %v4280_v25, %v4279_v37 }
 0x56f   :  { %v4255_v13 = vadd.f32 %v4254_v23, %v4253_v32  ;;  %v4282_v10 = vrot.slane %v4281_v0, 2 }
 0x571   :  { %v4256_v29 = vrot.slane %v4255_v13, 1  ;;  %v4283_v16 = vadd.f32 %v4282_v10, %v4281_v0  ;;  %v2935_v0 = vld [vmem:[%s8689_s9] sm:$0x3] }
 0x573   :  { %v4257_v39 = vadd.f32 %v4256_v29, %v4255_v13  ;;  %v4284_v61 = vrot.slane %v4283_v16, 1 }
 0x575   :  { %v4259_v11 = vmul.f32 0.03125, %v4257_v39  ;;  %v4285_v62 = vadd.f32 %v4284_v61, %v4283_v16 }
 0x577   :  { %v4287_v22 = vmul.f32 0.03125, %v4285_v62  ;;  %v4289_v15 = vmul.f32 %v4259_v11, %v4259_v11 }
 0x579   :  { %v4291_v33 = vsub.f32 %v4287_v22, %v4289_v15 }
 0x57b   :  { %v4293_v28 = vadd.f32 1e-05, %v4291_v33 }
 0x57d   :  { %6569 = vrsqrt.f32 %v4293_v28  ;;  %vm4310_vm3 = vweird.f32 %v4293_v28 }
 0x583   :  { %v6570_v8 = vpop.eup %6569 }
 0x584   :  { %v4305_v5 = vmul.f32 %v6570_v8, %v4293_v28  ;;  %vm4311_vm0 = vweird.f32 %v6570_v8 }
 0x585   :  { %vm4312_vm11 = vmor %vm4310_vm3, %vm4311_vm0 }
 0x586   :  { %v4306_v12 = vmul.f32 %v6570_v8, %v4305_v5 }
 0x588   :  { %v4307_v54 = vmul.f32 0.5, %v4306_v12 }
 0x58a   :  { %v4308_v14 = vsub.f32 1.5, %v4307_v54 }
 0x58c   :  { %v4309_v45 = vmul.f32 %v6570_v8, %v4308_v14 }
 0x58e   :  { %v4313_v46 = vsel %vm4312_vm11, %v6570_v8, %v4309_v45 }
 0x58f   :  { %v4316_v2 = vrot.slane %v4313_v46, 7 }
 0x591   :  { %v4317_v6 = vsel %vm1129_vm12, %v4303_v38, %v4316_v2 }
 0x592   :  { %v4319_v18 = vmul.f32 %v4317_v6, %v2934_v7 }
 0x594   :  { %v4321_v58 = vperm.slane %v4319_v18, 0  ;;  %v4322_v43 = vperm.slane %v4319_v18, 1 }
 0x596   :  { %v4325_v37 = vmul.f32 %v4321_v58, %v8552_v26  ;;  %v4326_v41 = vmul.f32 %v4322_v43, %v4259_v11  ;;  %v4340_v53 = vmul.f32 %v4322_v43, %v8578_v55  ;;  %v4333_v32 = vmul.f32 %v4321_v58, %v8530_v48 }
 0x597   :  { %v4335_v25 = vmul.f32 %v4321_v58, %v8534_v40  ;;  %v4334_v23 = vmul.f32 %v4322_v43, %v8565_v21  ;;  %v4338_v1 = vmul.f32 %v4322_v43, %v8567_v56  ;;  %v4336_v10 = vmul.f32 %v4322_v43, %v8563_v17 }
 0x598   :  { %v4329_v51 = vrot.slane %v4326_v41, 7  ;;  %v4337_v48 = vmul.f32 %v4321_v58, %v8542_v42  ;;  %v4339_v40 = vmul.f32 %v4321_v58, %v8547_v20 }
 0x59a   :  { %v4330_v57 = vsel %vm1129_vm12, %v4325_v37, %v4329_v51 }
 0x59b   :  { %v4332_v13 = vsub.f32 %v2935_v0, %v4330_v57 }
 0x59d   :  { %v4342_v26 = vperm.slane %v4332_v13, 0  ;;  %v4343_v55 = vperm.slane %v4332_v13, 1 }
 0x59f   :  { %v4346_v29 = vadd.f32 %v4342_v26, %v4333_v32  ;;  %v4348_v21 = vadd.f32 %v4342_v26, %v4335_v25  ;;  %v4347_v16 = vadd.f32 %v4343_v55, %v4334_v23  ;;  %v4349_v4 = vadd.f32 %v4343_v55, %v4336_v10 }
 0x5a0   :  { %v4350_v59 = vadd.f32 %v4342_v26, %v4337_v48  ;;  %v4352_v39 = vadd.f32 %v4342_v26, %v4339_v40  ;;  %v4351_v61 = vadd.f32 %v4343_v55, %v4338_v1  ;;  %v4353_v11 = vadd.f32 %v4343_v55, %v4340_v53 }
 0x5a1   :  { %v4354_v56 = vmax.f32 %v4346_v29, 0.0  ;;  %v4356_v62 = vmax.f32 %v4348_v21, 0.0  ;;  %v4355_v24 = vmax.f32 %v4347_v16, 0.0  ;;  %v4357_v31 = vmax.f32 %v4349_v4, 0.0 }
 0x5a2   :  { %v4358_v22 = vmax.f32 %v4350_v59, 0.0  ;;  %v4360_v15 = vmax.f32 %v4352_v39, 0.0  ;;  %v4359_v17 = vmax.f32 %v4351_v61, 0.0  ;;  %v4361_v30 = vmax.f32 %v4353_v11, 0.0 }
 0x5a3   :  { %v4394_v33 = vpack.c.bf16 %v4356_v62, %v4354_v56  ;;  %v4395_v42 = vpack.c.bf16 %v4357_v31, %v4355_v24 }
 0x5a4   :  { %v4396_v35 = vpack.c.bf16 %v4360_v15, %v4358_v22  ;;  %v4397_v20 = vpack.c.bf16 %v4361_v30, %v4359_v17 }
 0x5a5   :  { %4506 = vmatmul.bf16.vlgmr.msrb.gmra.mxu1 %v4394_v33  ;;  %4525 = vmatmul.bf16.vlgmr.msrb.gmra.mxu3 %v4395_v42 }
 0x5b5   :  { %4511 = vmatmul.bf16.gmra.mxu1 %v4396_v35  ;;  %4530 = vmatmul.bf16.gmra.mxu3 %v4397_v20 }
 0x622   :  { %v4507_v44 = vpop.f32.mrf.mxu1 }
 0x623   :  { %v4508_v63 = vadd.f32 %v6566_v50, %v4507_v44 }
 0x628   :  { %v4526_v28 = vpop.f32.mrf.mxu3 }
 0x629   :  { %v4527_v52 = vadd.f32 %v4526_v28, %v4508_v63 }
 0x62a   :  { %v4509_v36 = vpop.f32.mrf.mxu1 }
 0x62b   :  { %v4510_v27 = vadd.f32 %v6566_v50, %v4509_v36  ;;  %v4536_v5 = vsel %vm818_vm5, %v4527_v52, -inf  ;;  %v4591_v36 = vand.u32 127, %v745_v3 }
 0x62d   :  { %vm4592_vm12 = vcmp.eq.s32.totalorder %v7671_v9, %v4591_v36  ;;  %vm4593_vm15 = vcmp.eq.s32.totalorder %v7690_v19, %v4591_v36 }
 0x630   :  { %v4528_v60 = vpop.f32.mrf.mxu3 }
 0x631   :  { %v4529_v8 = vadd.f32 %v4528_v60, %v4510_v27 }
 0x632   :  { %v4512_v47 = vpop.f32.mrf.mxu1 }
 0x633   :  { %v4537_v12 = vsel %vm818_vm5, %v4529_v8, -inf  ;;  %v4513_v2 = vadd.f32 %v6566_v50, %v4512_v47 }
 0x634   :  { %v4538_v34 = vmax.f32 %v4536_v5, %v4537_v12 }
 0x636   :  { %v4539_v54 = vrot.slane %v4538_v34, 4 }
 0x638   :  { %v4540_v14 = vmax.f32 %v4538_v34, %v4539_v54  ;;  %v4531_v49 = vpop.f32.mrf.mxu3 }
 0x639   :  { %v4532_v6 = vadd.f32 %v4531_v49, %v4513_v2 }
 0x63a   :  { %v4541_v45 = vrot.slane %v4540_v14, 2  ;;  %v4514_v7 = vpop.f32.mrf.mxu1 }
 0x63b   :  { %v4515_v18 = vadd.f32 %v6566_v50, %v4514_v7  ;;  %v4545_v32 = vsel %vm818_vm5, %v4532_v6, -inf }
 0x63c   :  { %v4542_v46 = vmax.f32 %v4540_v14, %v4541_v45 }
 0x63e   :  { %v4543_v38 = vrot.slane %v4542_v46, 1 }
 0x640   :  { %v4544_v58 = vmax.f32 %v4542_v46, %v4543_v38  ;;  %v4533_v43 = vpop.f32.mrf.mxu3 }
 0x641   :  { %v4534_v37 = vadd.f32 %v4533_v43, %v4515_v18 }
 0x642   :  { %v4554_v41 = vsub.f32 %v4527_v52, %v4544_v58  ;;  %v4555_v53 = vsub.f32 %v4529_v8, %v4544_v58  ;;  %v6615_v8 = vmov 0.0  }
 0x643   :  { %v4546_v25 = vsel %vm818_vm5, %v4534_v37, -inf  ;;  %v6158_v47 = vsel %vm4592_vm12, 1.0, %v6615_v8  ;;  %v6159_v3 = vsel %vm4593_vm15, 1.0, %v6615_v8 }
 0x644   :  { %v4558_v23 = vmul.f32 1.442695, %v4554_v41  ;;  %v4560_v0 = vmul.f32 1.442695, %v4555_v53  ;;  %v4547_v51 = vmax.f32 %v4545_v32, %v4546_v25 }
 0x646   :  { %6571 = vpow2.f32 %v4558_v23  ;;  %v4548_v1 = vrot.slane %v4547_v51, 4 }
 0x647   :  { %6573 = vpow2.f32 %v4560_v0 }
 0x648   :  { %v4549_v57 = vmax.f32 %v4547_v51, %v4548_v1 }
 0x64a   :  { %v4550_v13 = vrot.slane %v4549_v57, 2 }
 0x64c   :  { %v6572_v26 = vpop.eup %6571  ;;  %v4551_v10 = vmax.f32 %v4549_v57, %v4550_v13 }
 0x64d   :  { %v6574_v55 = vpop.eup %6573  ;;  %v4566_v48 = vsel %vm818_vm5, %v6572_v26, 0.0 }
 0x64e   :  { %v4567_v40 = vsel %vm818_vm5, %v6574_v55, 0.0  ;;  %v4552_v29 = vrot.slane %v4551_v10, 1 }
 0x64f   :  { %v4568_v21 = vadd.f32 %v4567_v40, %v4566_v48 }
 0x650   :  { %v4553_v16 = vmax.f32 %v4551_v10, %v4552_v29 }
 0x651   :  { %v4569_v4 = vrot.slane %v4568_v21, 4 }
 0x652   :  { %v4556_v59 = vsub.f32 %v4532_v6, %v4553_v16  ;;  %v4557_v39 = vsub.f32 %v4534_v37, %v4553_v16 }
 0x653   :  { %v4570_v61 = vadd.f32 %v4569_v4, %v4568_v21 }
 0x654   :  { %v4562_v11 = vmul.f32 1.442695, %v4556_v59  ;;  %v4564_v56 = vmul.f32 1.442695, %v4557_v39 }
 0x655   :  { %v4571_v62 = vrot.slane %v4570_v61, 2 }
 0x656   :  { %6575 = vpow2.f32 %v4562_v11 }
 0x657   :  { %v4572_v24 = vadd.f32 %v4571_v62, %v4570_v61  ;;  %6577 = vpow2.f32 %v4564_v56 }
 0x659   :  { %v4573_v31 = vrot.slane %v4572_v24, 1 }
 0x65b   :  { %v4574_v22 = vadd.f32 %v4573_v31, %v4572_v24 }
 0x65c   :  { %v6576_v15 = vpop.eup %6575 }
 0x65d   :  { %v6578_v17 = vpop.eup %6577  ;;  %v4575_v30 = vsel %vm818_vm5, %v6576_v15, 0.0  ;;  %6579 = vrcp.f32 %v4574_v22 }
 0x65e   :  { %v4576_v33 = vsel %vm818_vm5, %v6578_v17, 0.0 }
 0x65f   :  { %v4577_v42 = vadd.f32 %v4576_v33, %v4575_v30 }
 0x661   :  { %v4578_v35 = vrot.slane %v4577_v42, 4 }
 0x663   :  { %v6580_v20 = vpop.eup %6579  ;;  %v4579_v44 = vadd.f32 %v4578_v35, %v4577_v42 }
 0x664   :  { %v4587_v28 = vmul.f32 %v6580_v20, %v6574_v55  ;;  %v4586_v52 = vmul.f32 %v6580_v20, %v6572_v26 }
 0x665   :  { %v4580_v50 = vrot.slane %v4579_v44, 2 }
 0x666   :  { %6160 = vmatpush.xpose.msk.msrb.mxu0 %vm818_vm5, %v4587_v28 }
 0x667   :  { %v4581_v63 = vadd.f32 %v4580_v50, %v4579_v44 }
 0x669   :  { %v4582_v27 = vrot.slane %v4581_v63, 1 }
 0x66a   :  { %6161 = vmatpush.xpose.msk.msrb.mxu0 %vm818_vm5, %v4586_v52 }
 0x66b   :  { %v4583_v60 = vadd.f32 %v4582_v27, %v4581_v63 }
 0x66d   :  { %6581 = vrcp.f32 %v4583_v60  ;;  %6162 = vmatmul.msk.f32.vlgmr.msrb.gmra.mxu0 %vm818_vm5, %v6158_v47 }
 0x673   :  { %v6582_v5 = vpop.eup %6581 }
 0x674   :  { %v4589_v12 = vmul.f32 %v6582_v5, %v6578_v17  ;;  %v4588_v34 = vmul.f32 %v6582_v5, %v6576_v15 }
 0x675   :  { %6163 = vmatmul.msk.f32.gmra.mxu0 %vm818_vm5, %v6159_v3 }
 0x676   :  { %6164 = vmatpush.xpose.msk.msrb.mxu2 %vm818_vm5, %v4589_v12 }
 0x67a   :  { %6165 = vmatpush.xpose.msk.msrb.mxu2 %vm818_vm5, %v4588_v34 }
 0x67d   :  { %6166 = vmatmul.msk.f32.vlgmr.msrb.gmra.mxu2 %vm818_vm5, %v6158_v47 }
 0x685   :  { %6167 = vmatmul.msk.f32.gmra.mxu2 %vm818_vm5, %v6159_v3 }
 0x6ea   :  { %v4627_v9 = vpop.f32.mrf.mxu0 }
 0x6eb   :  { %4633 = vst.msk [vmem:[#allocation5] sm:$0xff] %vm818_vm5, %v4627_v9 }
 0x6f2   :  { %v4630_v54 = vpop.f32.mrf.mxu0 }
 0x6f3   :  { %4634 = vst.msk [vmem:[#allocation5 + $0x8] sm:$0xff] %vm818_vm5, %v4630_v54 }
 0x700   :  { %v4658_v19 = vpop.f32.mrf.mxu2 }
 0x701   :  { %4665 = vst.msk [vmem:[#allocation5 + $0x10] sm:$0xff] %vm818_vm5, %v4658_v19 }
 0x708   :  { %v4661_v14 = vpop.f32.mrf.mxu2 }
 0x709   :  { %4666 = vst.msk [vmem:[#allocation5 + $0x18] sm:$0xff] %vm818_vm5, %v4661_v14 }
 0x70a   :  { %4679 = dma.vmem_to_hbm [thread:$0]  %s4672_s16, 512, %s4674_s19, [#allocation6], %s6617_s7, %s6617_s7, %s6618_s20  }
 0x70b   :  { %6611 = dma.done.wait [#allocation6], 512  }
 0x70c   :  { %6612 = vsyncadd [#allocation6], 4294966784 }
 0x70d   :  { %4684 = vsyncpa [#allocation6], 1 }
 0x70e   :  { %4685 = vsyncmov [#allocation4] }
 0x711   :  { %s4686_s21 = vpop.sfrf %4685 }
 0x712   :  { %p6168_p0 = scmp.ne.s32.totalorder %s4686_s21, 0 }
 0x714   :  { %4690 = shalt.err (%p6168_p0)  }
 0x715   :  { %4692 = vsyncmov [#allocation4 + $0x1] }
 0x718   :  { %s4693_s22 = vpop.sfrf %4692 }
 0x719   :  { %p6169_p1 = scmp.ne.s32.totalorder %s4693_s22, 0 }
 0x71b   :  { %4697 = shalt.err (%p6169_p1)  }

</bundles_post_ra>
